<compile_context>
chip_gen: v5e
topology: v5e:2x2
jax: 0.10.0
libtpu: 0.0.40
codegen_flags: <defaults>
</compile_context>

<pallas_src>
import functools

import jax
import jax.numpy as jnp
from jax.experimental import pallas as pl
from jax.experimental.pallas import tpu as pltpu


def _round_up(n, m):
    return (n + m - 1) // m * m


# ----------------------------------------------------------------------------
# Fused kernel: graph conv + chunked 1x1 conv/ReLU/lane-sum + fc
# ----------------------------------------------------------------------------
def _fused_kernel(x_ref, a_ref, w_ref, b_ref, wfc_ref, bfc_ref, o_ref, *,
                  cout_chunk):
    # x_ref block: (1, Cin, T, Vp) bf16    a_ref  : (Vp, Vp)     bf16
    # w_ref      : (Cout, Cin, 1)  f32     b_ref  : (Cout, 1, 1) f32
    # wfc_ref    : (Cout, K)       bf16 (pre-scaled by 1/V)
    # bfc_ref    : (1, K)          f32  (pre-corrected for padded-lane relu(b))
    x = x_ref[0]                                              # (Cin, T, Vp) bf16
    a = a_ref[...]                                            # (Vp, Vp) bf16
    cin = x.shape[0]

    # Spatial aggregation over joints on the MXU (bf16 inputs, f32 accumulate).
    xa = jnp.einsum('ctv,vu->ctu', x, a,
                    preferred_element_type=jnp.float32)       # (Cin, T, Vp) f32
    xa_c = [xa[c][None] for c in range(cin)]                  # hoisted slices

    w = w_ref[...]                                            # (Cout, Cin, 1) f32
    b = b_ref[...]                                            # (Cout, 1, 1) f32
    cout = w.shape[0]

    # 1x1 channel projection + bias + ReLU + UNMASKED lane-sum, chunked over
    # Cout so the (Cout, T, Vp) f32 intermediate never exists (stays in vregs).
    # Padded lanes (x/A zero-padded) contribute exactly relu(b_c) each; that
    # constant is subtracted from the fc bias at param-prep time, so no mask
    # and no 1/V multiply are needed here.
    pool_chunks = []
    for co in range(0, cout, cout_chunk):
        wc = w[co:co + cout_chunk]                            # (CC, Cin, 1)
        bc = b[co:co + cout_chunk]                            # (CC, 1, 1)
        acc = wc[:, 0:1, :] * xa_c[0]                         # (CC, T, Vp) f32
        for c in range(1, cin):
            acc = acc + wc[:, c:c + 1, :] * xa_c[c]
        hc = jnp.maximum(acc + bc, 0.0)                       # bias + ReLU
        pool_chunks.append(jnp.sum(hc, axis=-1))              # (CC, T) raw sum
    pool = jnp.concatenate(pool_chunks, axis=0)               # (Cout, T) f32

    # fc: contract the channel dim ('ot,ok->tk'): bf16 MXU, f32 accumulation.
    out = jax.lax.dot_general(
        pool.astype(jnp.bfloat16), wfc_ref[...],
        dimension_numbers=(((0,), (0,)), ((), ())),
        preferred_element_type=jnp.float32)                   # (T, K) f32
    o_ref[0] = (out + bfc_ref[...]).astype(o_ref.dtype)


def _fused_call(x_p, A_p, W_k, b_k, Wfc_s, bfc_eff):
    N, Cin, T, Vp = x_p.shape
    Cout, K = Wfc_s.shape

    kernel = functools.partial(_fused_kernel, cout_chunk=8)
    flops = N * (2 * Cin * T * Vp * Vp          # A aggregation
                 + 2 * Cin * Cout * T * Vp      # 1x1 channel projection
                 + 2 * Cout * T * K)            # fc
    bytes_accessed = (x_p.size * 2 + A_p.size * 2 + W_k.size * 4 + b_k.size * 4
                      + Wfc_s.size * 2 + bfc_eff.size * 4 + N * T * K * 4)

    return pl.pallas_call(
        kernel,
        out_shape=jax.ShapeDtypeStruct((N, T, K), jnp.float32),
        grid_spec=pltpu.PrefetchScalarGridSpec(
            num_scalar_prefetch=0,
            grid=(N,),
            in_specs=[
                pl.BlockSpec((1, Cin, T, Vp), lambda n: (n, 0, 0, 0)),
                pl.BlockSpec((Vp, Vp), lambda n: (0, 0)),
                pl.BlockSpec((Cout, Cin, 1), lambda n: (0, 0, 0)),
                pl.BlockSpec((Cout, 1, 1), lambda n: (0, 0, 0)),
                pl.BlockSpec((Cout, K), lambda n: (0, 0)),
                pl.BlockSpec((1, K), lambda n: (0, 0)),
            ],
            out_specs=pl.BlockSpec((1, T, K), lambda n: (n, 0, 0)),
        ),
        compiler_params=pltpu.CompilerParams(
            dimension_semantics=("parallel",)),
        cost_estimate=pl.CostEstimate(
            flops=flops, transcendentals=0, bytes_accessed=bytes_accessed),
    )(x_p, A_p, W_k, b_k, Wfc_s, bfc_eff)


# ----------------------------------------------------------------------------
# One-time parameter preparation (hoisted out of the per-call path)
# ----------------------------------------------------------------------------
def prepare_params(params):
    """Pad / cast / rescale parameters once. Invariants used:
    x and A are zero-padded along joints, so padded xa lanes are exactly zero
    and each padded lane of relu(W.xa + b) equals relu(b_c); ReLU(bias) is
    uniform across padded lanes. Both corrections are folded into the fc."""
    A = params["A"].astype(jnp.float32)
    W = params["W"].astype(jnp.float32)
    b = params["b"].astype(jnp.float32)
    Wfc_t = params["Wfc_t"].astype(jnp.float32)
    bfc = params["bfc"].astype(jnp.float32)

    V = A.shape[0]
    Cout, K = Wfc_t.shape
    Vp = _round_up(V, 128)                        # 78 -> 128 : lane-dense joints

    A_p = jnp.pad(A, ((0, Vp - V), (0, Vp - V))).astype(jnp.bfloat16)
    W_k = W[..., None]                            # (Cout, Cin, 1) f32
    b_k = b.reshape(-1, 1, 1)                     # (Cout, 1, 1)  f32

    # Fold 1/V (mean over joints) into the fc weight; fold the padded-lane
    # relu(b) contamination of the raw lane-sum into the fc bias.
    Wfc_s = (Wfc_t / V).astype(jnp.bfloat16)                              # (Cout, K)
    corr = ((Vp - V) / V) * (jnp.maximum(b, 0.0) @ Wfc_t)                 # (K,)
    bfc_eff = (bfc - corr).reshape(1, K).astype(jnp.float32)              # (1, K)

    return {"A_p": A_p, "W_k": W_k, "b_k": b_k,
            "Wfc_s": Wfc_s, "bfc_eff": bfc_eff}


@jax.jit
def pose_backbone_wrapper_forward(x, prepped):
    """Per-call forward: pad/cast x (data-dependent), then one fused kernel."""
    N, Cin, T, V = x.shape
    A_p = prepped["A_p"]
    Vp = A_p.shape[0]
    x_p = jnp.pad(x, ((0, 0), (0, 0), (0, 0), (0, Vp - V))).astype(jnp.bfloat16)
    return _fused_call(x_p, A_p, prepped["W_k"], prepped["b_k"],
                       prepped["Wfc_s"], prepped["bfc_eff"])


def _reference_forward(x, params):
    """Pure-JAX reference mirroring the PyTorch semantics (bf16 matmul inputs,
    f32 accumulation — same numerics as the kernel)."""
    A, W, b = params["A"], params["W"], params["b"]
    Wfc_t, bfc = params["Wfc_t"], params["bfc"]
    xa = jnp.einsum('nctv,vu->nctu', x.astype(jnp.bfloat16), A.astype(jnp.bfloat16),
                    preferred_element_type=jnp.float32)
    h = jnp.einsum('oc,nctv->notv', W, xa, preferred_element_type=jnp.float32)
    h = jnp.maximum(h + b.reshape(1, -1, 1, 1), 0.0)
    pose_pool = h.mean(-1)                                   # (N, Cout, T)
    prefix = jnp.swapaxes(pose_pool, -1, -2)                 # (N, T, Cout)
    out = jnp.einsum('ntc,ck->ntk', prefix.astype(jnp.bfloat16),
                     Wfc_t.astype(jnp.bfloat16),
                     preferred_element_type=jnp.float32)
    return out + bfc.reshape(1, 1, -1)                       # (N, T, num_class)


if __name__ == "__main__":
    # Small shapes consistent with the module: num_point=78 joints, 3 coord
    # channels, num_person=1, num_class=2000; synthetic backbone width 64.
    N, Cin, T, V = 2, 3, 16, 78
    Cout, NUM_CLASS = 64, 2000

    key = jax.random.PRNGKey(0)
    kx, kA, kW, kb, kWfc, kbfc = jax.random.split(key, 6)

    x = jax.random.normal(kx, (N, Cin, T, V), dtype=jnp.float32)

    A_raw = jax.random.uniform(kA, (V, V), dtype=jnp.float32)
    A = A_raw / jnp.sum(A_raw, axis=0, keepdims=True)        # column-normalized adjacency
    W = jax.random.normal(kW, (Cout, Cin), dtype=jnp.float32) * 0.1
    b = jax.random.normal(kb, (Cout,), dtype=jnp.float32) * 0.01
    # fc: Linear(Cout -> num_class); weight stored pre-transposed (Cout, K)
    Wfc_t = jax.random.normal(kWfc, (Cout, NUM_CLASS), dtype=jnp.float32) * 0.05
    bfc = jax.random.normal(kbfc, (NUM_CLASS,), dtype=jnp.float32) * 0.01

    params = {"A": A, "W": W, "b": b, "Wfc_t": Wfc_t, "bfc": bfc}

    # One-time prep (hoisted out of the per-call path).
    prepped = jax.tree_util.tree_map(jax.block_until_ready, prepare_params(params))

    out = pose_backbone_wrapper_forward(x, prepped)
    out = jax.block_until_ready(out)

    ref = _reference_forward(x, params)
    assert out.shape == (N, T, NUM_CLASS), out.shape
    assert jnp.allclose(out, ref, atol=3e-3, rtol=2e-2), "mismatch vs reference"

    print("KERNEL_OK")
</pallas_src>

<mosaic_0001>
module attributes {stable_mosaic.version = 11 : i64} {
  func.func @_fused_kernel(%arg0: i32, %arg1: memref<1x3x16x128xbf16, #tpu.memory_space<vmem>>, %arg2: memref<128x128xbf16, #tpu.memory_space<vmem>>, %arg3: memref<64x3x1xf32, #tpu.memory_space<vmem>>, %arg4: memref<64x1x1xf32, #tpu.memory_space<vmem>>, %arg5: memref<64x2000xbf16, #tpu.memory_space<vmem>>, %arg6: memref<1x2000xf32, #tpu.memory_space<vmem>>, %arg7: memref<1x16x2000xf32, #tpu.memory_space<vmem>>) attributes {dimension_semantics = [#tpu.dimension_semantics<parallel>], iteration_bounds = array<i64: 2>, scalar_prefetch = 0 : i64, scratch_operands = 0 : i64, tpu.core_type = #tpu.core_type<tc>, window_params = [{transform_indices = @transform_0, window_bounds = array<i64: 1, 3, 16, 128>}, {pipeline_mode = #tpu.pipeline_mode<synchronous>, transform_indices = @transform_1, window_bounds = array<i64: 128, 128>}, {pipeline_mode = #tpu.pipeline_mode<synchronous>, transform_indices = @transform_2, window_bounds = array<i64: 64, 3, 1>}, {pipeline_mode = #tpu.pipeline_mode<synchronous>, transform_indices = @transform_3, window_bounds = array<i64: 64, 1, 1>}, {pipeline_mode = #tpu.pipeline_mode<synchronous>, transform_indices = @transform_4, window_bounds = array<i64: 64, 2000>}, {pipeline_mode = #tpu.pipeline_mode<synchronous>, transform_indices = @transform_5, window_bounds = array<i64: 1, 2000>}, {transform_indices = @transform_6, window_bounds = array<i64: 1, 16, 2000>}]} {
    %c0 = arith.constant 0 : index
    %c0_0 = arith.constant 0 : index
    %c0_1 = arith.constant 0 : index
    %c0_2 = arith.constant 0 : index
    %0 = vector.load %arg1[%c0, %c0_0, %c0_1, %c0_2] : memref<1x3x16x128xbf16, #tpu.memory_space<vmem>>, vector<1x3x16x128xbf16>
    %1 = vector.shape_cast %0 : vector<1x3x16x128xbf16> to vector<3x16x128xbf16>
    %c0_3 = arith.constant 0 : index
    %c0_4 = arith.constant 0 : index
    %2 = vector.load %arg2[%c0_3, %c0_4] : memref<128x128xbf16, #tpu.memory_space<vmem>>, vector<128x128xbf16>
    "tpu.trace_start"() <{level = 10 : i32, message = "ctv,vu->ctu"}> : () -> ()
    %cst = arith.constant dense<0.000000e+00> : vector<3x16x128xf32>
    %3 = tpu.matmul %1, %2, %cst {dimension_numbers = #tpu.dot_dimension_numbers<[2], [0], [0, 1], [1], [0, 0, 0, 1, 1, 1], [], []>} : vector<3x16x128xbf16>, vector<128x128xbf16>, vector<3x16x128xf32> -> vector<3x16x128xf32>
    "tpu.trace_stop"() : () -> ()
    %4 = vector.extract_strided_slice %3 {offsets = [0, 0, 0], sizes = [1, 16, 128], strides = [1, 1, 1]} : vector<3x16x128xf32> to vector<1x16x128xf32>
    %5 = vector.shape_cast %4 : vector<1x16x128xf32> to vector<16x128xf32>
    %6 = vector.shape_cast %5 : vector<16x128xf32> to vector<1x16x128xf32>
    %7 = vector.extract_strided_slice %3 {offsets = [1, 0, 0], sizes = [1, 16, 128], strides = [1, 1, 1]} : vector<3x16x128xf32> to vector<1x16x128xf32>
    %8 = vector.shape_cast %7 : vector<1x16x128xf32> to vector<16x128xf32>
    %9 = vector.shape_cast %8 : vector<16x128xf32> to vector<1x16x128xf32>
    %10 = vector.extract_strided_slice %3 {offsets = [2, 0, 0], sizes = [1, 16, 128], strides = [1, 1, 1]} : vector<3x16x128xf32> to vector<1x16x128xf32>
    %11 = vector.shape_cast %10 : vector<1x16x128xf32> to vector<16x128xf32>
    %12 = vector.shape_cast %11 : vector<16x128xf32> to vector<1x16x128xf32>
    %c0_5 = arith.constant 0 : index
    %c0_6 = arith.constant 0 : index
    %c0_7 = arith.constant 0 : index
    %13 = vector.load %arg3[%c0_5, %c0_6, %c0_7] : memref<64x3x1xf32, #tpu.memory_space<vmem>>, vector<64x3x1xf32>
    %c0_8 = arith.constant 0 : index
    %c0_9 = arith.constant 0 : index
    %c0_10 = arith.constant 0 : index
    %14 = vector.load %arg4[%c0_8, %c0_9, %c0_10] : memref<64x1x1xf32, #tpu.memory_space<vmem>>, vector<64x1x1xf32>
    %15 = vector.extract_strided_slice %13 {offsets = [0, 0, 0], sizes = [8, 3, 1], strides = [1, 1, 1]} : vector<64x3x1xf32> to vector<8x3x1xf32>
    %16 = vector.extract_strided_slice %14 {offsets = [0, 0, 0], sizes = [8, 1, 1], strides = [1, 1, 1]} : vector<64x1x1xf32> to vector<8x1x1xf32>
    %17 = vector.extract_strided_slice %15 {offsets = [0, 0, 0], sizes = [8, 1, 1], strides = [1, 1, 1]} : vector<8x3x1xf32> to vector<8x1x1xf32>
    %18 = vector.broadcast %17 : vector<8x1x1xf32> to vector<8x16x128xf32>
    %19 = vector.broadcast %6 : vector<1x16x128xf32> to vector<8x16x128xf32>
    %20 = arith.mulf %18, %19 : vector<8x16x128xf32>
    %21 = vector.extract_strided_slice %15 {offsets = [0, 1, 0], sizes = [8, 1, 1], strides = [1, 1, 1]} : vector<8x3x1xf32> to vector<8x1x1xf32>
    %22 = vector.broadcast %21 : vector<8x1x1xf32> to vector<8x16x128xf32>
    %23 = vector.broadcast %9 : vector<1x16x128xf32> to vector<8x16x128xf32>
    %24 = arith.mulf %22, %23 : vector<8x16x128xf32>
    %25 = arith.addf %20, %24 : vector<8x16x128xf32>
    %26 = vector.extract_strided_slice %15 {offsets = [0, 2, 0], sizes = [8, 1, 1], strides = [1, 1, 1]} : vector<8x3x1xf32> to vector<8x1x1xf32>
    %27 = vector.broadcast %26 : vector<8x1x1xf32> to vector<8x16x128xf32>
    %28 = vector.broadcast %12 : vector<1x16x128xf32> to vector<8x16x128xf32>
    %29 = arith.mulf %27, %28 : vector<8x16x128xf32>
    %30 = arith.addf %25, %29 : vector<8x16x128xf32>
    %31 = vector.broadcast %16 : vector<8x1x1xf32> to vector<8x16x128xf32>
    %32 = arith.addf %30, %31 : vector<8x16x128xf32>
    %cst_11 = arith.constant 0.000000e+00 : f32
    %33 = vector.broadcast %cst_11 : f32 to vector<8x16x128xf32>
    %34 = arith.maximumf %32, %33 : vector<8x16x128xf32>
    %cst_12 = arith.constant dense<0.000000e+00> : vector<8x16xf32>
    %35 = vector.multi_reduction <add>, %34, %cst_12 [2] : vector<8x16x128xf32> to vector<8x16xf32>
    %36 = vector.extract_strided_slice %13 {offsets = [8, 0, 0], sizes = [8, 3, 1], strides = [1, 1, 1]} : vector<64x3x1xf32> to vector<8x3x1xf32>
    %37 = vector.extract_strided_slice %14 {offsets = [8, 0, 0], sizes = [8, 1, 1], strides = [1, 1, 1]} : vector<64x1x1xf32> to vector<8x1x1xf32>
    %38 = vector.extract_strided_slice %36 {offsets = [0, 0, 0], sizes = [8, 1, 1], strides = [1, 1, 1]} : vector<8x3x1xf32> to vector<8x1x1xf32>
    %39 = vector.broadcast %38 : vector<8x1x1xf32> to vector<8x16x128xf32>
    %40 = vector.broadcast %6 : vector<1x16x128xf32> to vector<8x16x128xf32>
    %41 = arith.mulf %39, %40 : vector<8x16x128xf32>
    %42 = vector.extract_strided_slice %36 {offsets = [0, 1, 0], sizes = [8, 1, 1], strides = [1, 1, 1]} : vector<8x3x1xf32> to vector<8x1x1xf32>
    %43 = vector.broadcast %42 : vector<8x1x1xf32> to vector<8x16x128xf32>
    %44 = vector.broadcast %9 : vector<1x16x128xf32> to vector<8x16x128xf32>
    %45 = arith.mulf %43, %44 : vector<8x16x128xf32>
    %46 = arith.addf %41, %45 : vector<8x16x128xf32>
    %47 = vector.extract_strided_slice %36 {offsets = [0, 2, 0], sizes = [8, 1, 1], strides = [1, 1, 1]} : vector<8x3x1xf32> to vector<8x1x1xf32>
    %48 = vector.broadcast %47 : vector<8x1x1xf32> to vector<8x16x128xf32>
    %49 = vector.broadcast %12 : vector<1x16x128xf32> to vector<8x16x128xf32>
    %50 = arith.mulf %48, %49 : vector<8x16x128xf32>
    %51 = arith.addf %46, %50 : vector<8x16x128xf32>
    %52 = vector.broadcast %37 : vector<8x1x1xf32> to vector<8x16x128xf32>
    %53 = arith.addf %51, %52 : vector<8x16x128xf32>
    %cst_13 = arith.constant 0.000000e+00 : f32
    %54 = vector.broadcast %cst_13 : f32 to vector<8x16x128xf32>
    %55 = arith.maximumf %53, %54 : vector<8x16x128xf32>
    %cst_14 = arith.constant dense<0.000000e+00> : vector<8x16xf32>
    %56 = vector.multi_reduction <add>, %55, %cst_14 [2] : vector<8x16x128xf32> to vector<8x16xf32>
    %57 = vector.extract_strided_slice %13 {offsets = [16, 0, 0], sizes = [8, 3, 1], strides = [1, 1, 1]} : vector<64x3x1xf32> to vector<8x3x1xf32>
    %58 = vector.extract_strided_slice %14 {offsets = [16, 0, 0], sizes = [8, 1, 1], strides = [1, 1, 1]} : vector<64x1x1xf32> to vector<8x1x1xf32>
    %59 = vector.extract_strided_slice %57 {offsets = [0, 0, 0], sizes = [8, 1, 1], strides = [1, 1, 1]} : vector<8x3x1xf32> to vector<8x1x1xf32>
    %60 = vector.broadcast %59 : vector<8x1x1xf32> to vector<8x16x128xf32>
    %61 = vector.broadcast %6 : vector<1x16x128xf32> to vector<8x16x128xf32>
    %62 = arith.mulf %60, %61 : vector<8x16x128xf32>
    %63 = vector.extract_strided_slice %57 {offsets = [0, 1, 0], sizes = [8, 1, 1], strides = [1, 1, 1]} : vector<8x3x1xf32> to vector<8x1x1xf32>
    %64 = vector.broadcast %63 : vector<8x1x1xf32> to vector<8x16x128xf32>
    %65 = vector.broadcast %9 : vector<1x16x128xf32> to vector<8x16x128xf32>
    %66 = arith.mulf %64, %65 : vector<8x16x128xf32>
    %67 = arith.addf %62, %66 : vector<8x16x128xf32>
    %68 = vector.extract_strided_slice %57 {offsets = [0, 2, 0], sizes = [8, 1, 1], strides = [1, 1, 1]} : vector<8x3x1xf32> to vector<8x1x1xf32>
    %69 = vector.broadcast %68 : vector<8x1x1xf32> to vector<8x16x128xf32>
    %70 = vector.broadcast %12 : vector<1x16x128xf32> to vector<8x16x128xf32>
    %71 = arith.mulf %69, %70 : vector<8x16x128xf32>
    %72 = arith.addf %67, %71 : vector<8x16x128xf32>
    %73 = vector.broadcast %58 : vector<8x1x1xf32> to vector<8x16x128xf32>
    %74 = arith.addf %72, %73 : vector<8x16x128xf32>
    %cst_15 = arith.constant 0.000000e+00 : f32
    %75 = vector.broadcast %cst_15 : f32 to vector<8x16x128xf32>
    %76 = arith.maximumf %74, %75 : vector<8x16x128xf32>
    %cst_16 = arith.constant dense<0.000000e+00> : vector<8x16xf32>
    %77 = vector.multi_reduction <add>, %76, %cst_16 [2] : vector<8x16x128xf32> to vector<8x16xf32>
    %78 = vector.extract_strided_slice %13 {offsets = [24, 0, 0], sizes = [8, 3, 1], strides = [1, 1, 1]} : vector<64x3x1xf32> to vector<8x3x1xf32>
    %79 = vector.extract_strided_slice %14 {offsets = [24, 0, 0], sizes = [8, 1, 1], strides = [1, 1, 1]} : vector<64x1x1xf32> to vector<8x1x1xf32>
    %80 = vector.extract_strided_slice %78 {offsets = [0, 0, 0], sizes = [8, 1, 1], strides = [1, 1, 1]} : vector<8x3x1xf32> to vector<8x1x1xf32>
    %81 = vector.broadcast %80 : vector<8x1x1xf32> to vector<8x16x128xf32>
    %82 = vector.broadcast %6 : vector<1x16x128xf32> to vector<8x16x128xf32>
    %83 = arith.mulf %81, %82 : vector<8x16x128xf32>
    %84 = vector.extract_strided_slice %78 {offsets = [0, 1, 0], sizes = [8, 1, 1], strides = [1, 1, 1]} : vector<8x3x1xf32> to vector<8x1x1xf32>
    %85 = vector.broadcast %84 : vector<8x1x1xf32> to vector<8x16x128xf32>
    %86 = vector.broadcast %9 : vector<1x16x128xf32> to vector<8x16x128xf32>
    %87 = arith.mulf %85, %86 : vector<8x16x128xf32>
    %88 = arith.addf %83, %87 : vector<8x16x128xf32>
    %89 = vector.extract_strided_slice %78 {offsets = [0, 2, 0], sizes = [8, 1, 1], strides = [1, 1, 1]} : vector<8x3x1xf32> to vector<8x1x1xf32>
    %90 = vector.broadcast %89 : vector<8x1x1xf32> to vector<8x16x128xf32>
    %91 = vector.broadcast %12 : vector<1x16x128xf32> to vector<8x16x128xf32>
    %92 = arith.mulf %90, %91 : vector<8x16x128xf32>
    %93 = arith.addf %88, %92 : vector<8x16x128xf32>
    %94 = vector.broadcast %79 : vector<8x1x1xf32> to vector<8x16x128xf32>
    %95 = arith.addf %93, %94 : vector<8x16x128xf32>
    %cst_17 = arith.constant 0.000000e+00 : f32
    %96 = vector.broadcast %cst_17 : f32 to vector<8x16x128xf32>
    %97 = arith.maximumf %95, %96 : vector<8x16x128xf32>
    %cst_18 = arith.constant dense<0.000000e+00> : vector<8x16xf32>
    %98 = vector.multi_reduction <add>, %97, %cst_18 [2] : vector<8x16x128xf32> to vector<8x16xf32>
    %99 = vector.extract_strided_slice %13 {offsets = [32, 0, 0], sizes = [8, 3, 1], strides = [1, 1, 1]} : vector<64x3x1xf32> to vector<8x3x1xf32>
    %100 = vector.extract_strided_slice %14 {offsets = [32, 0, 0], sizes = [8, 1, 1], strides = [1, 1, 1]} : vector<64x1x1xf32> to vector<8x1x1xf32>
    %101 = vector.extract_strided_slice %99 {offsets = [0, 0, 0], sizes = [8, 1, 1], strides = [1, 1, 1]} : vector<8x3x1xf32> to vector<8x1x1xf32>
    %102 = vector.broadcast %101 : vector<8x1x1xf32> to vector<8x16x128xf32>
    %103 = vector.broadcast %6 : vector<1x16x128xf32> to vector<8x16x128xf32>
    %104 = arith.mulf %102, %103 : vector<8x16x128xf32>
    %105 = vector.extract_strided_slice %99 {offsets = [0, 1, 0], sizes = [8, 1, 1], strides = [1, 1, 1]} : vector<8x3x1xf32> to vector<8x1x1xf32>
    %106 = vector.broadcast %105 : vector<8x1x1xf32> to vector<8x16x128xf32>
    %107 = vector.broadcast %9 : vector<1x16x128xf32> to vector<8x16x128xf32>
    %108 = arith.mulf %106, %107 : vector<8x16x128xf32>
    %109 = arith.addf %104, %108 : vector<8x16x128xf32>
    %110 = vector.extract_strided_slice %99 {offsets = [0, 2, 0], sizes = [8, 1, 1], strides = [1, 1, 1]} : vector<8x3x1xf32> to vector<8x1x1xf32>
    %111 = vector.broadcast %110 : vector<8x1x1xf32> to vector<8x16x128xf32>
    %112 = vector.broadcast %12 : vector<1x16x128xf32> to vector<8x16x128xf32>
    %113 = arith.mulf %111, %112 : vector<8x16x128xf32>
    %114 = arith.addf %109, %113 : vector<8x16x128xf32>
    %115 = vector.broadcast %100 : vector<8x1x1xf32> to vector<8x16x128xf32>
    %116 = arith.addf %114, %115 : vector<8x16x128xf32>
    %cst_19 = arith.constant 0.000000e+00 : f32
    %117 = vector.broadcast %cst_19 : f32 to vector<8x16x128xf32>
    %118 = arith.maximumf %116, %117 : vector<8x16x128xf32>
    %cst_20 = arith.constant dense<0.000000e+00> : vector<8x16xf32>
    %119 = vector.multi_reduction <add>, %118, %cst_20 [2] : vector<8x16x128xf32> to vector<8x16xf32>
    %120 = vector.extract_strided_slice %13 {offsets = [40, 0, 0], sizes = [8, 3, 1], strides = [1, 1, 1]} : vector<64x3x1xf32> to vector<8x3x1xf32>
    %121 = vector.extract_strided_slice %14 {offsets = [40, 0, 0], sizes = [8, 1, 1], strides = [1, 1, 1]} : vector<64x1x1xf32> to vector<8x1x1xf32>
    %122 = vector.extract_strided_slice %120 {offsets = [0, 0, 0], sizes = [8, 1, 1], strides = [1, 1, 1]} : vector<8x3x1xf32> to vector<8x1x1xf32>
    %123 = vector.broadcast %122 : vector<8x1x1xf32> to vector<8x16x128xf32>
    %124 = vector.broadcast %6 : vector<1x16x128xf32> to vector<8x16x128xf32>
    %125 = arith.mulf %123, %124 : vector<8x16x128xf32>
    %126 = vector.extract_strided_slice %120 {offsets = [0, 1, 0], sizes = [8, 1, 1], strides = [1, 1, 1]} : vector<8x3x1xf32> to vector<8x1x1xf32>
    %127 = vector.broadcast %126 : vector<8x1x1xf32> to vector<8x16x128xf32>
    %128 = vector.broadcast %9 : vector<1x16x128xf32> to vector<8x16x128xf32>
    %129 = arith.mulf %127, %128 : vector<8x16x128xf32>
    %130 = arith.addf %125, %129 : vector<8x16x128xf32>
    %131 = vector.extract_strided_slice %120 {offsets = [0, 2, 0], sizes = [8, 1, 1], strides = [1, 1, 1]} : vector<8x3x1xf32> to vector<8x1x1xf32>
    %132 = vector.broadcast %131 : vector<8x1x1xf32> to vector<8x16x128xf32>
    %133 = vector.broadcast %12 : vector<1x16x128xf32> to vector<8x16x128xf32>
    %134 = arith.mulf %132, %133 : vector<8x16x128xf32>
    %135 = arith.addf %130, %134 : vector<8x16x128xf32>
    %136 = vector.broadcast %121 : vector<8x1x1xf32> to vector<8x16x128xf32>
    %137 = arith.addf %135, %136 : vector<8x16x128xf32>
    %cst_21 = arith.constant 0.000000e+00 : f32
    %138 = vector.broadcast %cst_21 : f32 to vector<8x16x128xf32>
    %139 = arith.maximumf %137, %138 : vector<8x16x128xf32>
    %cst_22 = arith.constant dense<0.000000e+00> : vector<8x16xf32>
    %140 = vector.multi_reduction <add>, %139, %cst_22 [2] : vector<8x16x128xf32> to vector<8x16xf32>
    %141 = vector.extract_strided_slice %13 {offsets = [48, 0, 0], sizes = [8, 3, 1], strides = [1, 1, 1]} : vector<64x3x1xf32> to vector<8x3x1xf32>
    %142 = vector.extract_strided_slice %14 {offsets = [48, 0, 0], sizes = [8, 1, 1], strides = [1, 1, 1]} : vector<64x1x1xf32> to vector<8x1x1xf32>
    %143 = vector.extract_strided_slice %141 {offsets = [0, 0, 0], sizes = [8, 1, 1], strides = [1, 1, 1]} : vector<8x3x1xf32> to vector<8x1x1xf32>
    %144 = vector.broadcast %143 : vector<8x1x1xf32> to vector<8x16x128xf32>
    %145 = vector.broadcast %6 : vector<1x16x128xf32> to vector<8x16x128xf32>
    %146 = arith.mulf %144, %145 : vector<8x16x128xf32>
    %147 = vector.extract_strided_slice %141 {offsets = [0, 1, 0], sizes = [8, 1, 1], strides = [1, 1, 1]} : vector<8x3x1xf32> to vector<8x1x1xf32>
    %148 = vector.broadcast %147 : vector<8x1x1xf32> to vector<8x16x128xf32>
    %149 = vector.broadcast %9 : vector<1x16x128xf32> to vector<8x16x128xf32>
    %150 = arith.mulf %148, %149 : vector<8x16x128xf32>
    %151 = arith.addf %146, %150 : vector<8x16x128xf32>
    %152 = vector.extract_strided_slice %141 {offsets = [0, 2, 0], sizes = [8, 1, 1], strides = [1, 1, 1]} : vector<8x3x1xf32> to vector<8x1x1xf32>
    %153 = vector.broadcast %152 : vector<8x1x1xf32> to vector<8x16x128xf32>
    %154 = vector.broadcast %12 : vector<1x16x128xf32> to vector<8x16x128xf32>
    %155 = arith.mulf %153, %154 : vector<8x16x128xf32>
    %156 = arith.addf %151, %155 : vector<8x16x128xf32>
    %157 = vector.broadcast %142 : vector<8x1x1xf32> to vector<8x16x128xf32>
    %158 = arith.addf %156, %157 : vector<8x16x128xf32>
    %cst_23 = arith.constant 0.000000e+00 : f32
    %159 = vector.broadcast %cst_23 : f32 to vector<8x16x128xf32>
    %160 = arith.maximumf %158, %159 : vector<8x16x128xf32>
    %cst_24 = arith.constant dense<0.000000e+00> : vector<8x16xf32>
    %161 = vector.multi_reduction <add>, %160, %cst_24 [2] : vector<8x16x128xf32> to vector<8x16xf32>
    %162 = vector.extract_strided_slice %13 {offsets = [56, 0, 0], sizes = [8, 3, 1], strides = [1, 1, 1]} : vector<64x3x1xf32> to vector<8x3x1xf32>
    %163 = vector.extract_strided_slice %14 {offsets = [56, 0, 0], sizes = [8, 1, 1], strides = [1, 1, 1]} : vector<64x1x1xf32> to vector<8x1x1xf32>
    %164 = vector.extract_strided_slice %162 {offsets = [0, 0, 0], sizes = [8, 1, 1], strides = [1, 1, 1]} : vector<8x3x1xf32> to vector<8x1x1xf32>
    %165 = vector.broadcast %164 : vector<8x1x1xf32> to vector<8x16x128xf32>
    %166 = vector.broadcast %6 : vector<1x16x128xf32> to vector<8x16x128xf32>
    %167 = arith.mulf %165, %166 : vector<8x16x128xf32>
    %168 = vector.extract_strided_slice %162 {offsets = [0, 1, 0], sizes = [8, 1, 1], strides = [1, 1, 1]} : vector<8x3x1xf32> to vector<8x1x1xf32>
    %169 = vector.broadcast %168 : vector<8x1x1xf32> to vector<8x16x128xf32>
    %170 = vector.broadcast %9 : vector<1x16x128xf32> to vector<8x16x128xf32>
    %171 = arith.mulf %169, %170 : vector<8x16x128xf32>
    %172 = arith.addf %167, %171 : vector<8x16x128xf32>
    %173 = vector.extract_strided_slice %162 {offsets = [0, 2, 0], sizes = [8, 1, 1], strides = [1, 1, 1]} : vector<8x3x1xf32> to vector<8x1x1xf32>
    %174 = vector.broadcast %173 : vector<8x1x1xf32> to vector<8x16x128xf32>
    %175 = vector.broadcast %12 : vector<1x16x128xf32> to vector<8x16x128xf32>
    %176 = arith.mulf %174, %175 : vector<8x16x128xf32>
    %177 = arith.addf %172, %176 : vector<8x16x128xf32>
    %178 = vector.broadcast %163 : vector<8x1x1xf32> to vector<8x16x128xf32>
    %179 = arith.addf %177, %178 : vector<8x16x128xf32>
    %cst_25 = arith.constant 0.000000e+00 : f32
    %180 = vector.broadcast %cst_25 : f32 to vector<8x16x128xf32>
    %181 = arith.maximumf %179, %180 : vector<8x16x128xf32>
    %cst_26 = arith.constant dense<0.000000e+00> : vector<8x16xf32>
    %182 = vector.multi_reduction <add>, %181, %cst_26 [2] : vector<8x16x128xf32> to vector<8x16xf32>
    %183 = tpu.concatenate %35, %56, %77, %98, %119, %140, %161, %182 in 0 : vector<8x16xf32>, vector<8x16xf32>, vector<8x16xf32>, vector<8x16xf32>, vector<8x16xf32>, vector<8x16xf32>, vector<8x16xf32>, vector<8x16xf32> -> vector<64x16xf32>
    %184 = arith.truncf %183 : vector<64x16xf32> to vector<64x16xbf16>
    %c0_27 = arith.constant 0 : index
    %c0_28 = arith.constant 0 : index
    %185 = vector.load %arg5[%c0_27, %c0_28] : memref<64x2000xbf16, #tpu.memory_space<vmem>>, vector<64x2000xbf16>
    %cst_29 = arith.constant dense<0.000000e+00> : vector<16x2000xf32>
    %186 = tpu.matmul %184, %185, %cst_29 {dimension_numbers = #tpu.dot_dimension_numbers<[0], [0], [1], [1], [0, 1, 1, 1], [], []>} : vector<64x16xbf16>, vector<64x2000xbf16>, vector<16x2000xf32> -> vector<16x2000xf32>
    %c0_30 = arith.constant 0 : index
    %c0_31 = arith.constant 0 : index
    %187 = vector.load %arg6[%c0_30, %c0_31] : memref<1x2000xf32, #tpu.memory_space<vmem>>, vector<1x2000xf32>
    %188 = vector.broadcast %187 : vector<1x2000xf32> to vector<16x2000xf32>
    %189 = arith.addf %186, %188 : vector<16x2000xf32>
    %c0_32 = arith.constant 0 : index
    %c0_33 = arith.constant 0 : index
    %c0_34 = arith.constant 0 : index
    %190 = vector.load %arg7[%c0_32, %c0_33, %c0_34] : memref<1x16x2000xf32, #tpu.memory_space<vmem>>, vector<1x16x2000xf32>
    %191 = vector.shape_cast %190 : vector<1x16x2000xf32> to vector<16x2000xf32>
    %192 = vector.shape_cast %189 : vector<16x2000xf32> to vector<1x16x2000xf32>
    tpu.vector_store %arg7[%c0_32, %c0_33, %c0_34], %192 {strides = array<i32>} : memref<1x16x2000xf32, #tpu.memory_space<vmem>>, vector<1x16x2000xf32>,
    return
  }
  func.func @transform_0(%arg0: i32) -> (i32, i32, i32, i32) {
    %c0_i32 = arith.constant 0 : i32
    %c0_i32_0 = arith.constant 0 : i32
    %c0_i32_1 = arith.constant 0 : i32
    %c0_i32_2 = arith.constant 0 : i32
    return %arg0, %c0_i32, %c0_i32_0, %c0_i32_1 : i32, i32, i32, i32
  }
  func.func @transform_1(%arg0: i32) -> (i32, i32) {
    %c0_i32 = arith.constant 0 : i32
    %c0_i32_0 = arith.constant 0 : i32
    %c0_i32_1 = arith.constant 0 : i32
    return %c0_i32, %c0_i32_0 : i32, i32
  }
  func.func @transform_2(%arg0: i32) -> (i32, i32, i32) {
    %c0_i32 = arith.constant 0 : i32
    %c0_i32_0 = arith.constant 0 : i32
    %c0_i32_1 = arith.constant 0 : i32
    %c0_i32_2 = arith.constant 0 : i32
    return %c0_i32, %c0_i32_0, %c0_i32_1 : i32, i32, i32
  }
  func.func @transform_3(%arg0: i32) -> (i32, i32, i32) {
    %c0_i32 = arith.constant 0 : i32
    %c0_i32_0 = arith.constant 0 : i32
    %c0_i32_1 = arith.constant 0 : i32
    %c0_i32_2 = arith.constant 0 : i32
    return %c0_i32, %c0_i32_0, %c0_i32_1 : i32, i32, i32
  }
  func.func @transform_4(%arg0: i32) -> (i32, i32) {
    %c0_i32 = arith.constant 0 : i32
    %c0_i32_0 = arith.constant 0 : i32
    %c0_i32_1 = arith.constant 0 : i32
    return %c0_i32, %c0_i32_0 : i32, i32
  }
  func.func @transform_5(%arg0: i32) -> (i32, i32) {
    %c0_i32 = arith.constant 0 : i32
    %c0_i32_0 = arith.constant 0 : i32
    %c0_i32_1 = arith.constant 0 : i32
    return %c0_i32, %c0_i32_0 : i32, i32
  }
  func.func @transform_6(%arg0: i32) -> (i32, i32, i32) {
    %c0_i32 = arith.constant 0 : i32
    %c0_i32_0 = arith.constant 0 : i32
    %c0_i32_1 = arith.constant 0 : i32
    return %arg0, %c0_i32, %c0_i32_0 : i32, i32, i32
  }
}

</mosaic_0001>

<bundles_post_ra>
// kernel: pose_backbone_wrapper_forward.1
= control target key start
LH: loop header
LB: loop body
LE: loop exit
PB: predicated region body
PF: predicated region fallthrough
CT: control target
= control target key end

     0   :  { %s7647_s0 = inlined_call_operand.vmem [shape: bf16[2,3,16,128], index: 0, kind: input, shape index: {}]   ;;  %s7648_s1 = inlined_call_operand.hbm [shape: bf16[128,128], index: 1, kind: input, shape index: {}]   ;;  %s7649_s2 = inlined_call_operand.vmem [shape: f32[64,3,1], index: 2, kind: input, shape index: {}]   ;;  %s7650_s3 = inlined_call_operand.vmem [shape: f32[64,1,1], index: 3, kind: input, shape index: {}]   ;;  %s7651_s4 = inlined_call_operand.vmem [shape: bf16[64,2000], index: 4, kind: input, shape index: {}]   ;;  %s7652_s5 = inlined_call_operand.vmem [shape: f32[1,2000], index: 5, kind: input, shape index: {}]   ;;  %s7653_s6 = inlined_call_operand.hbm [shape: f32[2,16,2000], index: 6, kind: output, shape index: {}]  }
   0x1   :  { %7748 = sst [smem:[#allocation128_spill]] %s7647_s0 }
   0x2   :  { %7749 = sst [smem:[#allocation129_spill]] %s7648_s1 }
   0x3   :  { %7750 = sst [smem:[#allocation130_spill]] %s7649_s2 }
   0x4   :  { %7751 = sst [smem:[#allocation131_spill]] %s7650_s3 }
   0x5   :  { %7752 = sst [smem:[#allocation132_spill]] %s7651_s4 }
   0x6   :  { %7753 = sst [smem:[#allocation133_spill]] %s7652_s5 }
   0x7   :  { %7754 = sst [smem:[#allocation134_spill]] %s7653_s6 }
   0x8   :  { %11 = vsyncpa [#allocation3], 0 }
   0x9   :  { %12 = vsyncpa [#allocation4], 0 }
   0xa   :  { %14 = vsyncpa [#allocation4 + $0x1], 0  ;;  %s5049_s21 = smov 0   ;;  %s5051_s22 = smov 0  }
   0xb   :  { %s5053_s23 = smov 0   ;;  %s5055_s24 = smov 0  }
   0xc LB: > { %7755 = sst [smem:[#allocation8_spill]] %s4994_s21  ;;  %s5070_s25 = sadd.s32 4294967295, %s5006_s24   ;;  %s5006_s24 = sphi %s5055_s24, %s8103_s24   ;;  %s5002_s23 = sphi %s5053_s23, %s8106_s23   ;;  %s4998_s22 = sphi %s5051_s22, %s8105_s22   ;;  %s4994_s21 = sphi %s5049_s21, %s8104_s21  }
   0xd   : > { %7756 = sst [smem:[#allocation9_spill]] %s4998_s22  ;;  %s3998_s26 = sadd.s32 4294967294, %s5006_s24  }
   0xe   : > { %7757 = sst [smem:[#allocation10_spill]] %s5002_s23  ;;  %s5074_s27 = sadd.s32 1, %s5006_s24  }
   0xf   : > { %7758 = sst [smem:[#allocation11_spill]] %s5006_s24  ;;  %s158_s28 = sadd.s32 1, %s5002_s23 }
  0x10   : > { %7759 = sst [smem:[#allocation12_spill]] %s5070_s25  ;;  %s155_s29 = ssub.s32 %s5006_s24, %s5074_s27 }
  0x11   : > { %7760 = sst [smem:[#allocation13_spill]] %s5074_s27  ;;  %p168_p0 = scmp.ne.s32.totalorder %s5002_s23, %s4998_s22 }
  0x12   : > { %p156_p1 = scmp.eq.s32.totalorder %s155_s29, 0  ;;  %p169_p2 = scmp.eq.s32.totalorder %s5070_s25, 1 }
  0x13   : > { %p174_p3 = scmp.ne.s32.totalorder %s4998_s22, %s4994_s21  ;;  %p175_p4 = scmp.eq.s32.totalorder %s3998_s26, 1 }
  0x14   : > { %s5085_s30 = scalar_select %p156_p1, %s5002_s23, %s158_s28  }
  0x15   : > { %p5087_p5 = por %p169_p2, %p168_p0  ;;  %p5091_p6 = por %p175_p4, %p174_p3 }
  0x16   : > { %7761 = sst [smem:[#allocation14_spill]] %s5085_s30  ;;  %p3999_p7 = scmp.ge.s32.totalorder %s5006_s24, 1 }
  0x17   : > { %s7762_s7 = scalar_select %p5087_p5, 1, 0 }
  0x18   : > { %s7764_s8 = scalar_select %p5091_p6, 1, 0 }
  0x19   : > { %7763 = sst [smem:[#allocation15_spill]] %s7762_s7  ;;  %p182_p8 = scmp.lt.s32.totalorder %s5006_s24, 3 }
  0x1a   : > { %7765 = sst [smem:[#allocation16_spill]] %s7764_s8  ;;  %p4802_p9 = scmp.eq.s32.totalorder %s5070_s25, 0 }
  0x1b   : > { %p183_p10 = pnand %p3999_p7, %p182_p8  ;;  %s7766_s1 = sld [smem:[#allocation129_spill]] }
  0x1c   : > { %s5008_s12 = smov [#allocation2]   ;;  %s5009_s14 = smov 64  }
  0x1d   : > { %p4794_p11 = pneg %p183_p10  ;;  %s195_s13 = sshll.u32 %s5008_s12, 4  ;;  %s196_s13 = int_to_ptr.vmem [resolvable:$true] %s195_s13 }
  0x1e   : > { %s5010_s15 = smov 4   ;;  %231 = sbr.rel (%p183_p10) target bundleno = 1552 (0x610), region = 44 }
  0x1f   : > { %p4795_p12 = pnand %p4802_p9, %p4794_p11 }
  0x21   : > { %s193_s11 = sshll.u32 %s7766_s1, 4  ;;  %s194_s11 = int_to_ptr.hbm [resolvable:$true] %s193_s11 }
  0x22   : > { %4797 = dma.hbm_to_vmem [thread:$0]  (!%p4795_p12), %s194_s11, 1024, %s196_s13, [#allocation3], %s5009_s14, %s5009_s14, %s5010_s15  }
  0x23   : > { %4985 = dma.done.wait (%p4802_p9), [#allocation3], 1024  }
  0x24   : > { %4987 = vsyncadd (%p4802_p9), [#allocation3], 4294966272  ;;  %v5011_v0 = vmov 0   ;;  %v4337_v1 = vld [vmem:[#allocation2 + $0x38] sm:$0xff]  ;;  %p262_p13 = scmp.lt.s32.totalorder %s5070_s25, 1  ;;  %v4336_v2 = vld [vmem:[#allocation2 + $0x30] sm:$0xff] }
  0x25   : > { %4843 = vset.pattern.permute.xlu0 %v5011_v0  ;;  %4844 = vset.pattern.permute.xlu1 %v5011_v0  ;;  %s7767_s3 = sld [smem:[#allocation131_spill]]  ;;  %v4335_v5 = vld [vmem:[#allocation2 + $0x28] sm:$0xff]  ;;  %v4334_v7 = vld [vmem:[#allocation2 + $0x20] sm:$0xff]  ;;  %v4333_v8 = vld [vmem:[#allocation2 + $0x18] sm:$0xff]  ;;  %vm2833_vm0 = vcmask 130112   ;;  %vm2856_vm1 = vcmask 1041409  }
  0x26   : > { %4845 = vset.pattern.permute.xlu2 %v5011_v0  ;;  %356 = vmatpush.bf16.msra.mxu0 %v4337_v1  ;;  %s5115_s20 = scalar_select %p262_p13, %s5070_s25, 1  ;;  %v4332_v12 = vld [vmem:[#allocation2 + $0x10] sm:$0xff]  ;;  %v4331_v17 = vld [vmem:[#allocation2 + $0x8] sm:$0xff]  ;;  %v4330_v26 = vld [vmem:[#allocation2] sm:$0xff]  ;;  %vm2858_vm2 = vcmask 1042434   ;;  %vm2860_vm3 = vcmask 1043459  }
  0x27   : > { %s7768_s2 = sld [smem:[#allocation130_spill]]  ;;  %vm2862_vm4 = vcmask 1044484   ;;  %vm2864_vm5 = vcmask 1045509   ;;  %vm2866_vm6 = vcmask 1046534   ;;  %vm2868_vm7 = vcmask 1047559  }
  0x28   : > { %s4403_s26 = smul.u32 24, %s5115_s20  ;;  %s7769_s0 = sld [smem:[#allocation128_spill]]  ;;  %vm3647_vm8 = vcmask 523264   ;;  %vm3890_vm9 = vcmask 654336  }
  0x2a   : > { %357 = vmatpush.bf16.msra.mxu0 %v4336_v2 }
  0x2b   : > { %v4846_v3 = vld [vmem:[%s7767_s3] ss:$0 sm:$0xff]  ;;  %v4848_v4 = vld [vmem:[%s7767_s3 + $0x2] ss:$0 sm:$0xff]  ;;  %v4847_v6 = vld [vmem:[%s7767_s3 + $0x1] ss:$0 sm:$0xff] }
  0x2c   : > { %701 = vperm.xlu0 %4843, %v4846_v3   ;;  %709 = vperm.xlu1 %4844, %v4848_v4   ;;  %v4849_v9 = vld [vmem:[%s7767_s3 + $0x6] ss:$0 sm:$0xff]  ;;  %v4850_v10 = vld [vmem:[%s7767_s3 + $0x3] ss:$0 sm:$0xff]  ;;  %v4851_v24 = vld [vmem:[%s7767_s3 + $0x9] ss:$0 sm:$0xff] }
  0x2d   : > { %v380_v11 = vld [vmem:[%s7768_s2] sm:$0x7]  ;;  %v381_v13 = vld [vmem:[%s7768_s2 + $0x4] sm:$0x7]  ;;  %v382_v14 = vld [vmem:[%s7768_s2 + $0x8] sm:$0x7] }
  0x2e   : > { %358 = vmatpush.bf16.msra.mxu0 %v4335_v5  ;;  %4404 = vpush %v380_v11  ;;  %v383_v15 = vld [vmem:[%s7768_s2 + $0xc] sm:$0x7]  ;;  %v384_v16 = vld [vmem:[%s7768_s2 + $0x10] sm:$0x7]  ;;  %v385_v18 = vld [vmem:[%s7768_s2 + $0x14] sm:$0x7]  ;;  %s5154_s16 = scalar_lea.vmem %s7769_s0, %s4403_s26 }
  0x2f   : > { %4406 = vpush %v381_v13  ;;  %v556_v19 = vrot.slane %v380_v11, 1  ;;  %v386_v20 = vld [vmem:[%s7768_s2 + $0x18] sm:$0x7]  ;;  %v557_v21 = vrot.slane %v381_v13, 1  ;;  %v387_v22 = vld [vmem:[%s7768_s2 + $0x1c] sm:$0x7] }
  0x30   : > { %4408 = vpush %v382_v14  ;;  %v558_v23 = vrot.slane %v382_v14, 1  ;;  %v559_v25 = vrot.slane %v383_v15, 1  ;;  %v560_v27 = vrot.slane %v384_v16, 1  ;;  %v561_v28 = vrot.slane %v385_v18, 1  ;;  %v4327_v29 = vld [vmem:[%s5154_s16] sm:$0xff]  ;;  %v4328_v50 = vld [vmem:[%s5154_s16 + $0x8] sm:$0xff] }
  0x31   : > { %4410 = vpush %v383_v15  ;;  %v562_v30 = vrot.slane %v386_v20, 1  ;;  %v563_v31 = vrot.slane %v387_v22, 1  ;;  %v620_v32 = vrot.slane %v380_v11, 2  ;;  %v621_v33 = vrot.slane %v381_v13, 2  ;;  %v4852_v36 = vld [vmem:[%s7767_s3 + $0x7] ss:$0 sm:$0xff] }
  0x32   : > { %359 = vmatpush.bf16.msra.mxu0 %v4334_v7  ;;  %4412 = vpush %v384_v16  ;;  %v622_v34 = vrot.slane %v382_v14, 2  ;;  %v623_v35 = vrot.slane %v383_v15, 2  ;;  %v4853_v37 = vld [vmem:[%s7767_s3 + $0xb] ss:$0 sm:$0xff]  ;;  %v624_v38 = vrot.slane %v384_v16, 2  ;;  %v625_v40 = vrot.slane %v385_v18, 2 }
  0x33   : > { %4414 = vpush %v385_v18  ;;  %v4855_v39 = vld [vmem:[%s7767_s3 + $0x4] ss:$0 sm:$0xff]  ;;  %v626_v41 = vrot.slane %v386_v20, 2  ;;  %v627_v42 = vrot.slane %v387_v22, 2  ;;  %v4854_v43 = vld [vmem:[%s7767_s3 + $0xa] ss:$0 sm:$0xff] }
  0x34   : > { %705 = vperm.xlu0 %4843, %v4847_v6   ;;  %713 = vperm.xlu1 %4844, %v4850_v10   ;;  %4416 = vpush %v386_v20  ;;  %v388_v44 = vld [vmem:[%s7768_s2 + $0x20] sm:$0x7]  ;;  %v4856_v45 = vld [vmem:[%s7767_s3 + $0xe] ss:$0 sm:$0xff]  ;;  %v4858_v46 = vld [vmem:[%s7767_s3 + $0x5] ss:$0 sm:$0xff] }
  0x35   : > { %4418 = vpush %v387_v22  ;;  %717 = vperm.xlu2 %4845, %v4855_v39   ;;  %v389_v47 = vld [vmem:[%s7768_s2 + $0x24] sm:$0x7]  ;;  %v390_v48 = vld [vmem:[%s7768_s2 + $0x28] sm:$0x7]  ;;  %v391_v49 = vld [vmem:[%s7768_s2 + $0x2c] sm:$0x7] }
  0x36   : > { %360 = vmatpush.bf16.msra.mxu0 %v4333_v8  ;;  %4420 = vpush %v556_v19  ;;  %v392_v51 = vld [vmem:[%s7768_s2 + $0x30] sm:$0x7]  ;;  %v393_v52 = vld [vmem:[%s7768_s2 + $0x34] sm:$0x7]  ;;  %v844_v53 = vrot.slane %v388_v44, 1  ;;  %v845_v55 = vrot.slane %v389_v47, 1 }
  0x37   : > { %4422 = vpush %v557_v21  ;;  %v394_v54 = vld [vmem:[%s7768_s2 + $0x38] sm:$0x7]  ;;  %v4857_v56 = vld [vmem:[%s7767_s3 + $0xd] ss:$0 sm:$0xff]  ;;  %v395_v57 = vld [vmem:[%s7768_s2 + $0x3c] sm:$0x7] }
  0x38   : > { %4424 = vpush %v558_v23  ;;  %v846_v58 = vrot.slane %v390_v48, 1  ;;  %v4859_v59 = vld [vmem:[%s7767_s3 + $0x8] ss:$0 sm:$0xff]  ;;  %v847_v60 = vrot.slane %v391_v49, 1  ;;  %v848_v61 = vrot.slane %v392_v51, 1  ;;  %v849_v62 = vrot.slane %v393_v52, 1 }
  0x39   : > { %4426 = vpush %v559_v25  ;;  %v850_v63 = vrot.slane %v394_v54, 1  ;;  %v851_v0 = vrot.slane %v395_v57, 1  ;;  %v908_v1 = vrot.slane %v388_v44, 2  ;;  %v909_v2 = vrot.slane %v389_v47, 2  ;;  %v4860_v4 = vld [vmem:[%s7767_s3 + $0xc] ss:$0 sm:$0xff] }
  0x3a   : > { %361 = vmatpush.bf16.msra.mxu0 %v4332_v12  ;;  %4428 = vpush %v560_v27  ;;  %v910_v3 = vrot.slane %v390_v48, 2  ;;  %v911_v5 = vrot.slane %v391_v49, 2  ;;  %v912_v6 = vrot.slane %v392_v51, 2  ;;  %v913_v7 = vrot.slane %v393_v52, 2  ;;  %v4329_v10 = vld [vmem:[%s5154_s16 + $0x10] sm:$0xff] }
  0x3b   : > { %4430 = vpush %v561_v28  ;;  %v914_v8 = vrot.slane %v394_v54, 2  ;;  %v396_v11 = vld [vmem:[%s7768_s2 + $0x40] sm:$0x7]  ;;  %v397_v12 = vld [vmem:[%s7768_s2 + $0x44] sm:$0x7] }
  0x3c   : > { %725 = vperm.xlu0 %4843, %v4849_v9   ;;  %4432 = vpush %v562_v30  ;;  %729 = vperm.xlu1 %4844, %v4852_v36   ;;  %v915_v9 = vrot.slane %v395_v57, 2  ;;  %v4861_v13 = vld [vmem:[%s7767_s3 + $0xf] ss:$0 sm:$0xff]  ;;  %v398_v14 = vld [vmem:[%s7768_s2 + $0x48] sm:$0x7]  ;;  %v1132_v20 = vrot.slane %v396_v11, 1 }
  0x3d   : > { %4434 = vpush %v563_v31  ;;  %721 = vperm.xlu2 %4845, %v4858_v46   ;;  %v399_v15 = vld [vmem:[%s7768_s2 + $0x4c] sm:$0x7]  ;;  %v400_v16 = vld [vmem:[%s7768_s2 + $0x50] sm:$0x7]  ;;  %v402_v18 = vld [vmem:[%s7768_s2 + $0x58] sm:$0x7] }
  0x3e   : > { %362 = vmatpush.bf16.msra.mxu0 %v4331_v17  ;;  %4436 = vpush %v620_v32  ;;  %v401_v17 = vld [vmem:[%s7768_s2 + $0x54] sm:$0x7]  ;;  %v403_v19 = vld [vmem:[%s7768_s2 + $0x5c] sm:$0x7]  ;;  %v1133_v21 = vrot.slane %v397_v12, 1  ;;  %v1134_v22 = vrot.slane %v398_v14, 1 }
  0x3f   : > { %4438 = vpush %v621_v33  ;;  %v1135_v23 = vrot.slane %v399_v15, 1  ;;  %v1137_v25 = vrot.slane %v401_v17, 1  ;;  %v1139_v27 = vrot.slane %v403_v19, 1  ;;  %v1196_v28 = vrot.slane %v396_v11, 2  ;;  %v404_v36 = vld [vmem:[%s7768_s2 + $0x60] sm:$0x7] }
  0x40   : > { %4440 = vpush %v622_v34  ;;  %v1198_v30 = vrot.slane %v398_v14, 2  ;;  %v1199_v31 = vrot.slane %v399_v15, 2  ;;  %v1200_v32 = vrot.slane %v400_v16, 2  ;;  %v1201_v33 = vrot.slane %v401_v17, 2  ;;  %v407_v39 = vld [vmem:[%s7768_s2 + $0x6c] sm:$0x7] }
  0x41   : > { %4442 = vpush %v623_v35  ;;  %v1202_v34 = vrot.slane %v402_v18, 2  ;;  %v1203_v35 = vrot.slane %v403_v19, 2 }
  0x42   : > { %363 = vmatpush.bf16.msra.mxu0 %v4330_v26  ;;  %4444 = vpush %v624_v38  ;;  %v1138_v26 = vrot.slane %v402_v18, 1  ;;  %v406_v38 = vld [vmem:[%s7768_s2 + $0x68] sm:$0x7] }
  0x43   : > { %4446 = vpush %v625_v40  ;;  %v408_v40 = vld [vmem:[%s7768_s2 + $0x70] sm:$0x7]  ;;  %v1422_v46 = vrot.slane %v406_v38, 1 }
  0x44   : > { %993 = vperm.xlu0 %4843, %v4851_v24   ;;  %4448 = vpush %v626_v41  ;;  %997 = vperm.xlu1 %4844, %v4854_v43   ;;  %v1136_v24 = vrot.slane %v400_v16, 1  ;;  %v409_v41 = vld [vmem:[%s7768_s2 + $0x74] sm:$0x7]  ;;  %v410_v43 = vld [vmem:[%s7768_s2 + $0x78] sm:$0x7] }
  0x45   : > { %364 = vmatmul.bf16.vlgmr.msra.gmra.mxu0 %v4327_v29  ;;  %4450 = vpush %v627_v42  ;;  %989 = vperm.xlu2 %4845, %v4859_v59   ;;  %v1197_v29 = vrot.slane %v397_v12, 2  ;;  %v1420_v42 = vrot.slane %v404_v36, 1 }
  0x46   : > { %4452 = vpush %v388_v44 }
  0x47   : > { %4454 = vpush %v389_v47  ;;  %v1423_v47 = vrot.slane %v407_v39, 1 }
  0x48   : > { %4456 = vpush %v390_v48  ;;  %v1424_v48 = vrot.slane %v408_v40, 1 }
  0x49   : > { %4458 = vpush %v391_v49  ;;  %v1425_v49 = vrot.slane %v409_v41, 1 }
  0x4a   : > { %4460 = vpush %v392_v51 }
  0x4b   : > { %4462 = vpush %v393_v52  ;;  %v1484_v52 = vrot.slane %v404_v36, 2 }
  0x4c   : > { %1001 = vperm.xlu0 %4843, %v4853_v37   ;;  %4464 = vpush %v394_v54  ;;  %1009 = vperm.xlu1 %4844, %v4857_v56   ;;  %v405_v37 = vld [vmem:[%s7768_s2 + $0x64] sm:$0x7]  ;;  %v1486_v54 = vrot.slane %v406_v38, 2  ;;  %v1488_v56 = vrot.slane %v408_v40, 2 }
  0x4d   : > { %4466 = vpush %v395_v57  ;;  %1005 = vperm.xlu2 %4845, %v4860_v4   ;;  %v1421_v44 = vrot.slane %v405_v37, 1  ;;  %v1489_v57 = vrot.slane %v409_v41, 2 }
  0x4e   : > { %4468 = vpush %v844_v53  ;;  %v1485_v53 = vrot.slane %v405_v37, 2 }
  0x4f   : > { %4470 = vpush %v845_v55  ;;  %v1487_v55 = vrot.slane %v407_v39, 2 }
  0x50   : > { %4472 = vpush %v846_v58  ;;  %v1490_v58 = vrot.slane %v410_v43, 2 }
  0x51   : > { %4474 = vpush %v847_v60  ;;  %v412_v60 = vld [vmem:[%s7768_s2 + $0x80] sm:$0x7] }
  0x52   : > { %4476 = vpush %v848_v61  ;;  %v413_v61 = vld [vmem:[%s7768_s2 + $0x84] sm:$0x7] }
  0x53   : > { %4478 = vpush %v849_v62  ;;  %v414_v62 = vld [vmem:[%s7768_s2 + $0x88] sm:$0x7]  ;;  %v1709_v4 = vrot.slane %v413_v61, 1 }
  0x54   : > { %1013 = vperm.xlu0 %4843, %v4856_v45   ;;  %4480 = vpush %v850_v63  ;;  %v411_v45 = vld [vmem:[%s7768_s2 + $0x7c] sm:$0x7]  ;;  %v415_v63 = vld [vmem:[%s7768_s2 + $0x8c] sm:$0x7] }
  0x55   : > { %369 = vmatmul.bf16.gmra.mxu0 %v4328_v50  ;;  %4482 = vpush %v851_v0  ;;  %1017 = vperm.xlu2 %4845, %v4861_v13   ;;  %v1426_v50 = vrot.slane %v410_v43, 1  ;;  %v1427_v51 = vrot.slane %v411_v45, 1  ;;  %v1491_v59 = vrot.slane %v411_v45, 2  ;;  %v416_v0 = vld [vmem:[%s7768_s2 + $0x90] sm:$0x7]  ;;  %v1773_v13 = vrot.slane %v413_v61, 2 }
  0x56   : > { %4484 = vpush %v908_v1  ;;  %v417_v1 = vld [vmem:[%s7768_s2 + $0x94] sm:$0x7] }
  0x57   : > { %4486 = vpush %v909_v2  ;;  %v1708_v2 = vrot.slane %v412_v60, 1 }
  0x58   : > { %4488 = vpush %v910_v3  ;;  %v418_v3 = vld [vmem:[%s7768_s2 + $0x98] sm:$0x7] }
  0x59   : > { %4490 = vpush %v911_v5  ;;  %v419_v5 = vld [vmem:[%s7768_s2 + $0x9c] sm:$0x7] }
  0x5a   : > { %4492 = vpush %v912_v6  ;;  %v1710_v6 = vrot.slane %v414_v62, 1 }
  0x5b   : > { %4494 = vpush %v913_v7  ;;  %v1711_v7 = vrot.slane %v415_v63, 1 }
  0x5c   : > { %4496 = vpush %v914_v8  ;;  %v1712_v8 = vrot.slane %v416_v0, 1 }
  0x5d   : > { %4498 = vpush %v915_v9  ;;  %v1713_v9 = vrot.slane %v417_v1, 1 }
  0x5e   : > { %4500 = vpush %v396_v11  ;;  %v1715_v11 = vrot.slane %v419_v5, 1 }
  0x5f   : > { %4502 = vpush %v397_v12  ;;  %s5231_s29 = spop %4404  ;;  %v1772_v12 = vrot.slane %v412_v60, 2 }
  0x60   : > { %4504 = vpush %v398_v14  ;;  %s5236_s11 = spop %4406  ;;  %v1774_v14 = vrot.slane %v414_v62, 2 }
  0x61   : > { %4506 = vpush %v399_v15  ;;  %s5241_s13 = spop %4408  ;;  %v1775_v15 = vrot.slane %v415_v63, 2 }
  0x62   : > { %4508 = vpush %v400_v16  ;;  %s5246_s17 = spop %4410  ;;  %v1776_v16 = vrot.slane %v416_v0, 2 }
  0x63   : > { %7770 = sst [smem:[#allocation17_spill]] %s5246_s17  ;;  %4510 = vpush %v401_v17  ;;  %s5248_s18 = spop %4412  ;;  %v1777_v17 = vrot.slane %v417_v1, 2 }
  0x64   : > { %4512 = vpush %v402_v18  ;;  %s5250_s16 = spop %4414  ;;  %v1778_v18 = vrot.slane %v418_v3, 2 }
  0x65   : > { %374 = vmatmul.bf16.gmra.mxu0 %v4329_v10  ;;  %7771 = sst [smem:[#allocation18_spill]] %s5250_s16  ;;  %4514 = vpush %v403_v19  ;;  %s5252_s19 = spop %4416  ;;  %v1714_v10 = vrot.slane %v418_v3, 1  ;;  %v1779_v19 = vrot.slane %v419_v5, 2 }
  0x66   : > { %7772 = sst [smem:[#allocation19_spill]] %s5252_s19  ;;  %4516 = vpush %v1132_v20  ;;  %s5254_s26 = spop %4418  ;;  %v420_v20 = vld [vmem:[%s7768_s2 + $0xa0] sm:$0x7] }
  0x67   : > { %4518 = vpush %v1133_v21  ;;  %s5256_s28 = spop %4420  ;;  %v421_v21 = vld [vmem:[%s7768_s2 + $0xa4] sm:$0x7] }
  0x68   : > { %4520 = vpush %v1134_v22  ;;  %s5258_s9 = spop %4422  ;;  %v422_v22 = vld [vmem:[%s7768_s2 + $0xa8] sm:$0x7] }
  0x69   : > { %4522 = vpush %v1135_v23  ;;  %s5260_s10 = spop %4424  ;;  %v423_v23 = vld [vmem:[%s7768_s2 + $0xac] sm:$0x7] }
  0x6a   : > { %4524 = vpush %v1136_v24  ;;  %s5262_s12 = spop %4426  ;;  %v424_v24 = vld [vmem:[%s7768_s2 + $0xb0] sm:$0x7] }
  0x6b   : > { %4526 = vpush %v1137_v25  ;;  %s5264_s20 = spop %4428  ;;  %v425_v25 = vld [vmem:[%s7768_s2 + $0xb4] sm:$0x7] }
  0x6c   : > { %4528 = vpush %v1138_v26  ;;  %s5266_s14 = spop %4430  ;;  %v1996_v26 = vrot.slane %v420_v20, 1 }
  0x6d   : > { %4530 = vpush %v1139_v27  ;;  %s5268_s15 = spop %4432  ;;  %v426_v27 = vld [vmem:[%s7768_s2 + $0xb8] sm:$0x7] }
  0x6e   : > { %7773 = sst [smem:[#allocation20_spill]] %s5268_s15  ;;  %s5270_s0 = spop %4434  ;;  %4532 = vpush %v1196_v28  ;;  %v1997_v28 = vrot.slane %v421_v21, 1 }
  0x6f   : > { %s5272_s1 = spop %4436  ;;  %4534 = vpush %v1197_v29  ;;  %v427_v29 = vld [vmem:[%s7768_s2 + $0xbc] sm:$0x7] }
  0x70   : > { %s5274_s30 = spop %4438  ;;  %4536 = vpush %v1198_v30  ;;  %v1998_v30 = vrot.slane %v422_v22, 1 }
  0x71   : > { %s5276_s23 = spop %4440  ;;  %4538 = vpush %v1199_v31  ;;  %v1999_v31 = vrot.slane %v423_v23, 1 }
  0x72   : > { %s5278_s27 = spop %4442  ;;  %4540 = vpush %v1200_v32  ;;  %v2000_v32 = vrot.slane %v424_v24, 1 }
  0x73   : > { %7774 = sst [smem:[#allocation21_spill]] %s5278_s27  ;;  %s5280_s8 = spop %4444  ;;  %4542 = vpush %v1201_v33  ;;  %v2001_v33 = vrot.slane %v425_v25, 1 }
  0x74   : > { %s5282_s21 = spop %4446  ;;  %4544 = vpush %v1202_v34  ;;  %v2002_v34 = vrot.slane %v426_v27, 1 }
  0x75   : > { %7775 = sst [smem:[#allocation22_spill]] %s5282_s21  ;;  %s5284_s24 = spop %4448  ;;  %4546 = vpush %v1203_v35  ;;  %v2003_v35 = vrot.slane %v427_v29, 1 }
  0x76   : > { %7776 = sst [smem:[#allocation23_spill]] %s5284_s24  ;;  %s5289_s25 = spop %4450  ;;  %4548 = vpush %v404_v36  ;;  %v2060_v36 = vrot.slane %v420_v20, 2 }
  0x77   : > { %7777 = sst [smem:[#allocation24_spill]] %s5289_s25  ;;  %s5294_s4 = spop %4452  ;;  %4550 = vpush %v405_v37  ;;  %v2061_v37 = vrot.slane %v421_v21, 2 }
  0x78   : > { %7778 = sst [smem:[#allocation25_spill]] %s5294_s4  ;;  %s5299_s16 = spop %4454  ;;  %4552 = vpush %v406_v38  ;;  %v2062_v38 = vrot.slane %v422_v22, 2 }
  0x79   : > { %7779 = sst [smem:[#allocation26_spill]] %s5299_s16  ;;  %s5304_s7 = spop %4456  ;;  %4554 = vpush %v407_v39  ;;  %v2063_v39 = vrot.slane %v423_v23, 2 }
  0x7a   : > { %7780 = sst [smem:[#allocation27_spill]] %s5304_s7  ;;  %s5309_s22 = spop %4458  ;;  %4556 = vpush %v408_v40  ;;  %v2064_v40 = vrot.slane %v424_v24, 2 }
  0x7b   : > { %7781 = sst [smem:[#allocation28_spill]] %s5309_s22  ;;  %s5314_s21 = spop %4460  ;;  %4558 = vpush %v409_v41  ;;  %v2065_v41 = vrot.slane %v425_v25, 2 }
  0x7c   : > { %7782 = sst [smem:[#allocation29_spill]] %s5314_s21  ;;  %s5319_s16 = spop %4462  ;;  %4560 = vpush %v410_v43  ;;  %v2067_v43 = vrot.slane %v427_v29, 2 }
  0x7d   : > { %7783 = sst [smem:[#allocation30_spill]] %s5319_s16  ;;  %s5324_s22 = spop %4464  ;;  %4562 = vpush %v411_v45  ;;  %v429_v45 = vld [vmem:[%s7768_s2 + $0xc4] sm:$0x7] }
  0x7e   : > { %7784 = sst [smem:[#allocation31_spill]] %s5324_s22  ;;  %s5326_s4 = spop %4466  ;;  %4564 = vpush %v1420_v42  ;;  %v2066_v42 = vrot.slane %v426_v27, 2 }
  0x7f   : > { %7785 = sst [smem:[#allocation32_spill]] %s5326_s4  ;;  %s5328_s3 = spop %4468  ;;  %4566 = vpush %v1421_v44  ;;  %v428_v44 = vld [vmem:[%s7768_s2 + $0xc0] sm:$0x7] }
  0x80   : > { %7786 = sst [smem:[#allocation33_spill]] %s5328_s3  ;;  %s5330_s24 = spop %4470  ;;  %4568 = vpush %v1422_v46  ;;  %v430_v46 = vld [vmem:[%s7768_s2 + $0xc8] sm:$0x7] }
  0x81   : > { %7787 = sst [smem:[#allocation34_spill]] %s5330_s24  ;;  %s5332_s6 = spop %4472  ;;  %4570 = vpush %v1423_v47  ;;  %v431_v47 = vld [vmem:[%s7768_s2 + $0xcc] sm:$0x7] }
  0x82   : > { %7788 = sst [smem:[#allocation35_spill]] %s5332_s6  ;;  %4572 = vpush %v1424_v48  ;;  %s5334_s15 = spop %4474  ;;  %v432_v48 = vld [vmem:[%s7768_s2 + $0xd0] sm:$0x7] }
  0x83   : > { %7789 = sst [smem:[#allocation36_spill]] %s5334_s15  ;;  %4574 = vpush %v1425_v49  ;;  %s5336_s5 = spop %4476  ;;  %v433_v49 = vld [vmem:[%s7768_s2 + $0xd4] sm:$0x7] }
  0x84   : > { %4576 = vpush %v1426_v50  ;;  %7790 = sst [smem:[#allocation37_spill]] %s5336_s5  ;;  %s5338_s4 = spop %4478  ;;  %v2284_v50 = vrot.slane %v428_v44, 1 }
  0x85   : > { %4578 = vpush %v1427_v51  ;;  %7791 = sst [smem:[#allocation38_spill]] %s5338_s4  ;;  %s5340_s22 = spop %4480  ;;  %v434_v51 = vld [vmem:[%s7768_s2 + $0xd8] sm:$0x7] }
  0x86   : > { %4580 = vpush %v1484_v52  ;;  %7792 = sst [smem:[#allocation39_spill]] %s5340_s22  ;;  %s5342_s21 = spop %4482  ;;  %v2285_v52 = vrot.slane %v429_v45, 1 }
  0x87   : > { %4582 = vpush %v1485_v53  ;;  %7793 = sst [smem:[#allocation40_spill]] %s5342_s21  ;;  %s5344_s5 = spop %4484  ;;  %v435_v53 = vld [vmem:[%s7768_s2 + $0xdc] sm:$0x7] }
  0x88   : > { %4584 = vpush %v1486_v54  ;;  %7794 = sst [smem:[#allocation41_spill]] %s5344_s5  ;;  %s5352_s22 = spop %4486  ;;  %v2286_v54 = vrot.slane %v430_v46, 1 }
  0x89   : > { %4586 = vpush %v1487_v55  ;;  %7795 = sst [smem:[#allocation42_spill]] %s5352_s22  ;;  %s5360_s7 = spop %4488  ;;  %v2287_v55 = vrot.slane %v431_v47, 1 }
  0x8a   : > { %4588 = vpush %v1488_v56  ;;  %7796 = sst [smem:[#allocation43_spill]] %s5360_s7  ;;  %s5368_s16 = spop %4490  ;;  %v2288_v56 = vrot.slane %v432_v48, 1 }
  0x8b   : > { %4590 = vpush %v1489_v57  ;;  %7797 = sst [smem:[#allocation44_spill]] %s5368_s16  ;;  %s5376_s24 = spop %4492  ;;  %v2289_v57 = vrot.slane %v433_v49, 1 }
  0x8c   : > { %4592 = vpush %v1490_v58  ;;  %7798 = sst [smem:[#allocation45_spill]] %s5376_s24  ;;  %s5378_s15 = spop %4494  ;;  %v2290_v58 = vrot.slane %v434_v51, 1 }
  0x8d   : > { %4594 = vpush %v1491_v59  ;;  %7799 = sst [smem:[#allocation46_spill]] %s5378_s15  ;;  %s5380_s22 = spop %4496  ;;  %v2291_v59 = vrot.slane %v435_v53, 1 }
  0x8e   : > { %4596 = vpush %v412_v60  ;;  %7800 = sst [smem:[#allocation47_spill]] %s5380_s22  ;;  %s5382_s4 = spop %4498  ;;  %v2348_v60 = vrot.slane %v428_v44, 2 }
  0x8f   : > { %4598 = vpush %v413_v61  ;;  %7801 = sst [smem:[#allocation48_spill]] %s5382_s4  ;;  %s5384_s3 = spop %4500  ;;  %v2349_v61 = vrot.slane %v429_v45, 2 }
  0x90   : > { %4600 = vpush %v414_v62  ;;  %7802 = sst [smem:[#allocation49_spill]] %s5384_s3  ;;  %s5386_s6 = spop %4502  ;;  %v2350_v62 = vrot.slane %v430_v46, 2 }
  0x91   : > { %4602 = vpush %v415_v63  ;;  %7803 = sst [smem:[#allocation50_spill]] %s5386_s6  ;;  %s5388_s21 = spop %4504  ;;  %v2351_v63 = vrot.slane %v431_v47, 2 }
  0x92   : > { %4604 = vpush %v416_v0  ;;  %7804 = sst [smem:[#allocation51_spill]] %s5388_s21  ;;  %s5390_s5 = spop %4506  ;;  %v2352_v0 = vrot.slane %v432_v48, 2 }
  0x93   : > { %4606 = vpush %v417_v1  ;;  %7805 = sst [smem:[#allocation52_spill]] %s5390_s5  ;;  %s5392_s3 = spop %4508  ;;  %v2353_v1 = vrot.slane %v433_v49, 2 }
  0x94   : > { %4608 = vpush %v418_v3  ;;  %7806 = sst [smem:[#allocation53_spill]] %s5392_s3  ;;  %s5400_s21 = spop %4510  ;;  %v2355_v3 = vrot.slane %v435_v53, 2 }
  0x95   : > { %4610 = vpush %v419_v5  ;;  %7807 = sst [smem:[#allocation54_spill]] %s5400_s21  ;;  %s5408_s7 = spop %4512  ;;  %v437_v5 = vld [vmem:[%s7768_s2 + $0xe4] sm:$0x7] }
  0x96   : > { %4612 = vpush %v1708_v2  ;;  %7808 = sst [smem:[#allocation55_spill]] %s5408_s7  ;;  %s5416_s16 = spop %4514  ;;  %v2354_v2 = vrot.slane %v434_v51, 2 }
  0x97   : > { %4614 = vpush %v1709_v4  ;;  %7809 = sst [smem:[#allocation56_spill]] %s5416_s16  ;;  %s5421_s3 = spop %4516  ;;  %v436_v4 = vld [vmem:[%s7768_s2 + $0xe0] sm:$0x7] }
  0x98   : > { %4616 = vpush %v1710_v6  ;;  %7810 = sst [smem:[#allocation57_spill]] %s5421_s3  ;;  %s5426_s4 = spop %4518  ;;  %v438_v6 = vld [vmem:[%s7768_s2 + $0xe8] sm:$0x7] }
  0x99   : > { %4618 = vpush %v1711_v7  ;;  %7811 = sst [smem:[#allocation58_spill]] %s5426_s4  ;;  %s5428_s24 = spop %4520  ;;  %v439_v7 = vld [vmem:[%s7768_s2 + $0xec] sm:$0x7] }
  0x9a   : > { %4620 = vpush %v1712_v8  ;;  %7812 = sst [smem:[#allocation59_spill]] %s5428_s24  ;;  %s5430_s21 = spop %4522  ;;  %v440_v8 = vld [vmem:[%s7768_s2 + $0xf0] sm:$0x7] }
  0x9b   : > { %4622 = vpush %v1713_v9  ;;  %7813 = sst [smem:[#allocation60_spill]] %s5430_s21  ;;  %s5432_s6 = spop %4524  ;;  %v441_v9 = vld [vmem:[%s7768_s2 + $0xf4] sm:$0x7] }
  0x9c   : > { %4624 = vpush %v1714_v10  ;;  %7814 = sst [smem:[#allocation61_spill]] %s5432_s6  ;;  %s5434_s15 = spop %4526  ;;  %v442_v10 = vld [vmem:[%s7768_s2 + $0xf8] sm:$0x7] }
  0x9d   : > { %4626 = vpush %v1715_v11  ;;  %7815 = sst [smem:[#allocation62_spill]] %s5434_s15  ;;  %s5436_s5 = spop %4528  ;;  %v443_v11 = vld [vmem:[%s7768_s2 + $0xfc] sm:$0x7] }
  0x9e   : > { %4628 = vpush %v1772_v12  ;;  %7816 = sst [smem:[#allocation63_spill]] %s5436_s5  ;;  %s5438_s22 = spop %4530  ;;  %v2572_v12 = vrot.slane %v436_v4, 1 }
  0x9f   : > { %4630 = vpush %v1773_v13  ;;  %7817 = sst [smem:[#allocation64_spill]] %s5438_s22  ;;  %s5440_s16 = spop %4532  ;;  %v2573_v13 = vrot.slane %v437_v5, 1 }
  0xa0   : > { %4632 = vpush %v1774_v14  ;;  %7818 = sst [smem:[#allocation65_spill]] %s5440_s16  ;;  %s5442_s7 = spop %4534  ;;  %v2574_v14 = vrot.slane %v438_v6, 1 }
  0xa1   : > { %4634 = vpush %v1775_v15  ;;  %7819 = sst [smem:[#allocation66_spill]] %s5442_s7  ;;  %s5450_s24 = spop %4536  ;;  %v2575_v15 = vrot.slane %v439_v7, 1 }
  0xa2   : > { %4636 = vpush %v1776_v16  ;;  %7820 = sst [smem:[#allocation67_spill]] %s5450_s24  ;;  %s5458_s4 = spop %4538  ;;  %v2576_v16 = vrot.slane %v440_v8, 1 }
  0xa3   : > { %4638 = vpush %v1777_v17  ;;  %7821 = sst [smem:[#allocation68_spill]] %s5458_s4  ;;  %s5466_s3 = spop %4540  ;;  %v2577_v17 = vrot.slane %v441_v9, 1 }
  0xa4   : > { %4640 = vpush %v1778_v18  ;;  %7822 = sst [smem:[#allocation69_spill]] %s5466_s3  ;;  %s5474_s6 = spop %4542  ;;  %v2578_v18 = vrot.slane %v442_v10, 1 }
  0xa5   : > { %4642 = vpush %v1779_v19  ;;  %7823 = sst [smem:[#allocation70_spill]] %s5474_s6  ;;  %s5476_s15 = spop %4544  ;;  %v2579_v19 = vrot.slane %v443_v11, 1 }
  0xa6   : > { %4644 = vpush %v420_v20  ;;  %7824 = sst [smem:[#allocation71_spill]] %s5476_s15  ;;  %s5478_s24 = spop %4546  ;;  %v2636_v20 = vrot.slane %v436_v4, 2 }
  0xa7   : > { %4646 = vpush %v421_v21  ;;  %7825 = sst [smem:[#allocation72_spill]] %s5478_s24  ;;  %s5480_s21 = spop %4548  ;;  %v2637_v21 = vrot.slane %v437_v5, 2 }
  0xa8   : > { %4648 = vpush %v422_v22  ;;  %7826 = sst [smem:[#allocation73_spill]] %s5480_s21  ;;  %s5482_s5 = spop %4550  ;;  %v2638_v22 = vrot.slane %v438_v6, 2 }
  0xa9   : > { %4650 = vpush %v423_v23  ;;  %7827 = sst [smem:[#allocation74_spill]] %s5482_s5  ;;  %s5484_s22 = spop %4552  ;;  %v2639_v23 = vrot.slane %v439_v7, 2 }
  0xaa   : > { %4652 = vpush %v424_v24  ;;  %7828 = sst [smem:[#allocation75_spill]] %s5484_s22  ;;  %s5486_s7 = spop %4554  ;;  %v2640_v24 = vrot.slane %v440_v8, 2 }
  0xab   : > { %4654 = vpush %v425_v25  ;;  %7829 = sst [smem:[#allocation76_spill]] %s5486_s7  ;;  %s5488_s16 = spop %4556  ;;  %v2641_v25 = vrot.slane %v441_v9, 2 }
  0xac   : > { %4656 = vpush %v426_v27  ;;  %7830 = sst [smem:[#allocation77_spill]] %s5488_s16  ;;  %s5496_s22 = spop %4558  ;;  %v2643_v27 = vrot.slane %v443_v11, 2 }
  0xad   : > { %4658 = vpush %v427_v29  ;;  %7831 = sst [smem:[#allocation78_spill]] %s5496_s22  ;;  %s5504_s4 = spop %4560 }
  0xae   : > { %4660 = vpush %v1996_v26  ;;  %7832 = sst [smem:[#allocation79_spill]] %s5504_s4  ;;  %s5512_s22 = spop %4562  ;;  %v2642_v26 = vrot.slane %v442_v10, 2 }
  0xaf   : > { %4662 = vpush %v1997_v28  ;;  %7833 = sst [smem:[#allocation80_spill]] %s5512_s22  ;;  %s5520_s21 = spop %4564 }
  0xb0   : > { %4664 = vpush %v1998_v30  ;;  %7834 = sst [smem:[#allocation81_spill]] %s5520_s21  ;;  %s5522_s5 = spop %4566 }
  0xb1   : > { %4666 = vpush %v1999_v31  ;;  %7835 = sst [smem:[#allocation82_spill]] %s5522_s5  ;;  %s5524_s15 = spop %4568  ;;  %v5566_v31 = vpop.permute.xlu1 %709 }
  0xb2   : > { %4668 = vpush %v2000_v32  ;;  %7836 = sst [smem:[#allocation83_spill]] %s5524_s15  ;;  %s5526_s24 = spop %4570  ;;  %v5574_v32 = vpop.permute.xlu0 %701 }
  0xb3   : > { %4670 = vpush %v2001_v33  ;;  %7837 = sst [smem:[#allocation84_spill]] %s5526_s24  ;;  %s5528_s6 = spop %4572 }
  0xb4   : > { %4672 = vpush %v2002_v34  ;;  %7838 = sst [smem:[#allocation85_spill]] %s5528_s6  ;;  %s5530_s7 = spop %4574  ;;  %v568_v34 = vstv %s5258_s9 }
  0xb5   : > { %4674 = vpush %v2003_v35  ;;  %7839 = sst [smem:[#allocation86_spill]] %s5530_s7  ;;  %s5532_s3 = spop %4576  ;;  %v577_v35 = vstv %s5264_s20 }
  0xb6   : > { %4676 = vpush %v2060_v36  ;;  %7840 = sst [smem:[#allocation87_spill]] %s5532_s3  ;;  %s5534_s16 = spop %4578  ;;  %v510_v36 = vstv %s5231_s29 }
  0xb7   : > { %4678 = vpush %v2061_v37  ;;  %7841 = sst [smem:[#allocation88_spill]] %s5534_s16  ;;  %s5536_s2 = spop %4580  ;;  %v514_v37 = vstv %s5236_s11 }
  0xb8   : > { %4680 = vpush %v2062_v38  ;;  %7842 = sst [smem:[#allocation89_spill]] %s5536_s2  ;;  %s5538_s4 = spop %4582  ;;  %v518_v38 = vstv %s5241_s13 }
  0xb9   : > { %4682 = vpush %v2063_v39  ;;  %7843 = sst [smem:[#allocation90_spill]] %s5538_s4  ;;  %s5540_s22 = spop %4584  ;;  %v565_v39 = vstv %s5256_s28 }
  0xba   : > { %4684 = vpush %v2064_v40  ;;  %7844 = sst [smem:[#allocation91_spill]] %s5540_s22  ;;  %s5544_s3 = spop %4586  ;;  %v522_v40 = vstv %s5246_s17 }
  0xbb   : > { %4686 = vpush %v2065_v41  ;;  %7845 = sst [smem:[#allocation92_spill]] %s5544_s3  ;;  %s5546_s7 = spop %4588  ;;  %v526_v41 = vstv %s5248_s18 }
  0xbc   : > { %4688 = vpush %v2066_v42  ;;  %7846 = sst [smem:[#allocation93_spill]] %s5546_s7  ;;  %s5548_s16 = spop %4590  ;;  %v7726_v42 = vstv %s5252_s19 }
  0xbd   : > { %4690 = vpush %v2067_v43  ;;  %7847 = sst [smem:[#allocation94_spill]] %s5548_s16  ;;  %s5550_s24 = spop %4592  ;;  %v538_v43 = vstv %s5254_s26 }
  0xbe   : > { %4692 = vpush %v428_v44  ;;  %7848 = sst [smem:[#allocation95_spill]] %s5550_s24  ;;  %s5554_s6 = spop %4594  ;;  %v571_v44 = vstv %s5260_s10 }
  0xbf   : > { %4694 = vpush %v429_v45  ;;  %7849 = sst [smem:[#allocation96_spill]] %s5554_s6  ;;  %s5556_s2 = spop %4596  ;;  %v574_v45 = vstv %s5262_s12 }
  0xc0   : > { %4696 = vpush %v430_v46  ;;  %7850 = sst [smem:[#allocation97_spill]] %s5556_s2  ;;  %s5558_s22 = spop %4598  ;;  %v5594_v46 = vpop.permute.xlu1 %713 }
  0xc1   : > { %4698 = vpush %v431_v47  ;;  %7851 = sst [smem:[#allocation98_spill]] %s5558_s22  ;;  %s5560_s3 = spop %4600 }
  0xc2   : > { %4700 = vpush %v432_v48  ;;  %v5542_v28 = vpop.f32.mrf.mxu0  ;;  %7852 = sst [smem:[#allocation99_spill]] %s5560_s3  ;;  %s5564_s16 = spop %4602 }
  0xc3   : > { %4702 = vpush %v433_v49  ;;  %7853 = sst [smem:[#allocation100_spill]] %s5564_s16  ;;  %s5568_s24 = spop %4604  ;;  %v580_v49 = vstv %s5266_s14 }
  0xc4   : > { %4704 = vpush %v434_v51  ;;  %7854 = sst [smem:[#allocation101_spill]] %s5568_s24  ;;  %s5570_s6 = spop %4606  ;;  %v629_v51 = vstv %s5272_s1 }
  0xc5   : > { %4706 = vpush %v435_v53  ;;  %7855 = sst [smem:[#allocation102_spill]] %s5570_s6  ;;  %s5572_s2 = spop %4608  ;;  %v632_v53 = vstv %s5274_s30 }
  0xc6   : > { %4708 = vpush %v2284_v50  ;;  %7856 = sst [smem:[#allocation103_spill]] %s5572_s2  ;;  %s5580_s3 = spop %4610  ;;  %v586_v50 = vstv %s5270_s0 }
  0xc7   : > { %4710 = vpush %v2285_v52  ;;  %7857 = sst [smem:[#allocation104_spill]] %s5580_s3  ;;  %s5590_s6 = spop %4612 }
  0xc8   : > { %4712 = vpush %v2286_v54  ;;  %7858 = sst [smem:[#allocation105_spill]] %s5590_s6  ;;  %s5605_s3 = spop %4614  ;;  %v641_v54 = vstv %s5280_s8 }
  0xc9   : > { %4714 = vpush %v2287_v55  ;;  %7859 = sst [smem:[#allocation106_spill]] %s5605_s3  ;;  %v548_v55 = vmul.f32 %v526_v41, %v5542_v28  ;;  %s5621_s2 = spop %4616 }
  0xca   : > { %4716 = vpush %v2288_v56  ;;  %v5552_v29 = vpop.f32.mrf.mxu0  ;;  %v542_v56 = vmul.f32 %v514_v37, %v5542_v28  ;;  %7860 = sst [smem:[#allocation107_spill]] %s5621_s2  ;;  %s5634_s24 = spop %4618 }
  0xcb   : > { %4718 = vpush %v2289_v57  ;;  %v635_v57 = vstv %s5276_s23  ;;  %7861 = sst [smem:[#allocation108_spill]] %s5634_s24  ;;  %s5661_s24 = spop %4620 }
  0xcc   : > { %4720 = vpush %v2290_v58  ;;  %v638_v58 = vstv %s5278_s27  ;;  %s7862_s6 = sld [smem:[#allocation20_spill]]  ;;  %s5673_s3 = spop %4622 }
  0xcd   : > { %4722 = vpush %v2291_v59  ;;  %v650_v59 = vstv %s5289_s25  ;;  %s7863_s2 = sld [smem:[#allocation27_spill]]  ;;  %s5682_s21 = spop %4624 }
  0xce   : > { %4724 = vpush %v2348_v60  ;;  %v540_v60 = vmul.f32 %v510_v36, %v5542_v28  ;;  %s7864_s16 = sld [smem:[#allocation35_spill]] }
  0xcf   : > { %4726 = vpush %v2349_v61  ;;  %7865 = sst [smem:[#allocation109_spill]] %s5661_s24 }
  0xd0   : > { %4728 = vpush %v2350_v62  ;;  %s7866_s22 = sld [smem:[#allocation23_spill]] }
  0xd1   : > { %4730 = vpush %v2351_v63  ;;  %7867 = sst [smem:[#allocation110_spill]] %s5673_s3  ;;  %s5688_s3 = spop %4626 }
  0xd2   : > { %4732 = vpush %v2352_v0  ;;  %v5562_v30 = vpop.f32.mrf.mxu0  ;;  %s7868_s7 = sld [smem:[#allocation43_spill]]  ;;  %s5705_s5 = spop %4628 }
  0xd3   : > { %4734 = vpush %v2353_v1  ;;  %v596_v47 = vmul.f32 %v577_v35, %v5562_v30  ;;  %v590_v48 = vmul.f32 %v568_v34, %v5562_v30  ;;  %v588_v52 = vmul.f32 %v565_v39, %v5562_v30  ;;  %v602_v0 = vmul.f32 %v586_v50, %v5562_v30  ;;  %s7869_s24 = sld [smem:[#allocation18_spill]]  ;;  %s5728_s19 = spop %4630 }
  0xd4   : > { %4736 = vpush %v2354_v2  ;;  %v594_v1 = vmul.f32 %v574_v45, %v5562_v30  ;;  %v5636_v2 = vpop.permute.xlu2 %717  ;;  %s7870_s15 = sld [smem:[#allocation22_spill]]  ;;  %s5733_s27 = spop %4632 }
  0xd5   : > { %4738 = vpush %v2355_v3  ;;  %v612_v62 = vadd.f32 %v596_v47, %v548_v55  ;;  %v606_v63 = vadd.f32 %v590_v48, %v542_v56  ;;  %7871 = sst [smem:[#allocation18_spill]] %s5682_s21 }
  0xd6   : > { %4740 = vpush %v436_v4  ;;  %7872 = sst [smem:[#allocation22_spill]] %s5688_s3 }
  0xd7   : > { %4742 = vpush %v437_v5  ;;  %v604_v5 = vadd.f32 %v588_v52, %v540_v60  ;;  %v7725_v60 = vstv %s7866_s22  ;;  %s7873_s21 = sld [smem:[#allocation25_spill]] }
  0xd8   : > { %4744 = vpush %v438_v6  ;;  %s7874_s4 = sld [smem:[#allocation30_spill]] }
  0xd9   : > { %4746 = vpush %v439_v7  ;;  %v5647_v7 = vpop.permute.xlu0 %705  ;;  %s7875_s3 = sld [smem:[#allocation33_spill]] }
  0xda   : > { %4748 = vpush %v440_v8  ;;  %v5576_v33 = vpop.f32.mrf.mxu0  ;;  %v554_v8 = vmul.f32 %v538_v43, %v5542_v28  ;;  %7876 = sst [smem:[#allocation25_spill]] %s5705_s5 }
  0xdb   : > { %4750 = vpush %v441_v9  ;;  %s7879_s5 = sld [smem:[#allocation41_spill]] }
  0xdc   : > { %4752 = vpush %v442_v10  ;;  %v546_v10 = vmul.f32 %v522_v40, %v5542_v28  ;;  %7881 = sst [smem:[#allocation33_spill]] %s5728_s19 }
  0xdd   : > { %4754 = vpush %v443_v11  ;;  %v592_v11 = vmul.f32 %v571_v44, %v5562_v30  ;;  %s7883_s22 = sld [smem:[#allocation42_spill]] }
  0xde   : > { %4756 = vpush %v2572_v12  ;;  %s7886_s19 = sld [smem:[#allocation28_spill]] }
  0xdf   : > { %4758 = vpush %v2573_v13  ;;  %s7887_s17 = sld [smem:[#allocation36_spill]] }
  0xe0   : > { %4760 = vpush %v2574_v14  ;;  %s7900_s28 = sld [smem:[#allocation47_spill]] }
  0xe1   : > { %4762 = vpush %v2575_v15  ;;  %s7910_s12 = sld [smem:[#allocation26_spill]] }
  0xe2   : > { %4764 = vpush %v2576_v16  ;;  %v5626_v61 = vpop.f32.mrf.mxu0  ;;  %v7727_v16 = vstv %s7862_s6  ;;  %s7878_s6 = sld [smem:[#allocation38_spill]] }
  0xe3   : > { %4766 = vpush %v2577_v17  ;;  %v660_v3 = vmul.f32 %v641_v54, %v5626_v61  ;;  %v654_v4 = vmul.f32 %v632_v53, %v5626_v61  ;;  %v652_v6 = vmul.f32 %v629_v51, %v5626_v61  ;;  %v666_v9 = vmul.f32 %v650_v59, %v5626_v61  ;;  %s7916_s11 = sld [smem:[#allocation23_spill]] }
  0xe4   : > { %4768 = vpush %v2578_v18  ;;  %v658_v15 = vmul.f32 %v638_v58, %v5626_v61  ;;  %v618_v17 = vadd.f32 %v602_v0, %v554_v8  ;;  %v544_v18 = vmul.f32 %v518_v38, %v5542_v28  ;;  %v530_v0 = vstv %s7869_s24  ;;  %s7915_s24 = sld [smem:[#allocation19_spill]] }
  0xe5   : > { %4770 = vpush %v2579_v19  ;;  %v676_v12 = vadd.f32 %v660_v3, %v612_v62  ;;  %v670_v13 = vadd.f32 %v654_v4, %v606_v63  ;;  %v668_v14 = vadd.f32 %v652_v6, %v604_v5  ;;  %v656_v19 = vmul.f32 %v635_v57, %v5626_v61  ;;  %s7922_s30 = sld [smem:[#allocation37_spill]] }
  0xe6   : > { %4772 = vpush %v2636_v20  ;;  %v608_v47 = vadd.f32 %v592_v11, %v544_v18  ;;  %v7712_v62 = vstv %s7868_s7  ;;  %v600_v4 = vmul.f32 %v7727_v16, %v5562_v30  ;;  %v552_v6 = vmul.f32 %v7726_v42, %v5542_v28  ;;  %s7882_s7 = sld [smem:[#allocation26_spill]] }
  0xe7   : > { %4774 = vpush %v2637_v21  ;;  %v740_v20 = vadd.f32 %v5636_v2, %v676_v12  ;;  %v734_v21 = vadd.f32 %v5647_v7, %v670_v13  ;;  %v598_v8 = vmul.f32 %v580_v49, %v5562_v30  ;;  %v944_v12 = vmul.f32 %v7712_v62, %v5626_v61  ;;  %s7925_s0 = sld [smem:[#allocation27_spill]] }
  0xe8   : > { %4776 = vpush %v2638_v22  ;;  %v732_v22 = vadd.f32 %v5574_v32, %v668_v14  ;;  %v672_v63 = vadd.f32 %v656_v19, %v608_v47  ;;  %v664_v13 = vmul.f32 %v7725_v60, %v5626_v61  ;;  %v5717_v14 = vpop.permute.xlu0 %725  ;;  %v798_v19 = vstv %s7873_s21  ;;  %s7911_s21 = sld [smem:[#allocation42_spill]] }
  0xe9   : > { %4778 = vpush %v2639_v23  ;;  %v610_v23 = vadd.f32 %v594_v1, %v546_v10  ;;  %v756_v48 = vmax.f32 %v740_v20, 0.0  ;;  %v750_v52 = vmax.f32 %v734_v21, 0.0  ;;  %v644_v1 = vstv %s7870_s15  ;;  %s7912_s15 = sld [smem:[#allocation20_spill]] }
  0xea   : > { %4780 = vpush %v2640_v24  ;;  %v7722_v24 = vstv %s7863_s2  ;;  %v748_v55 = vmax.f32 %v732_v22, 0.0  ;;  %v662_v18 = vmul.f32 %v644_v1, %v5626_v61  ;;  %s7880_s2 = sld [smem:[#allocation46_spill]]  ;;  %v7718_v20 = vstv %s7874_s4 }
  0xeb   : > { %4782 = vpush %v2641_v25  ;;  %v7723_v25 = vstv %s7864_s16  ;;  %v674_v56 = vadd.f32 %v658_v15, %v610_v23  ;;  %780 = vadd.xlane.f32.xlu0 %v756_v48  ;;  %768 = vadd.xlane.f32.xlu1 %v750_v52  ;;  %v832_v5 = vmul.f32 %v7722_v24, %v5542_v28  ;;  %s7877_s16 = sld [smem:[#allocation34_spill]]  ;;  %v853_v23 = vstv %s7875_s3 }
  0xec   : > { %4784 = vpush %v2642_v26  ;;  %v5680_v26 = vpop.permute.xlu1 %729  ;;  %v880_v3 = vmul.f32 %v7723_v25, %v5562_v30  ;;  %764 = vadd.xlane.f32.xlu2 %v748_v55  ;;  %v736_v15 = vadd.f32 %v5566_v31, %v672_v63  ;;  %v616_v22 = vadd.f32 %v600_v4, %v552_v6  ;;  %v7721_v47 = vstv %s7878_s6  ;;  %7884 = sst [smem:[#allocation34_spill]] %s5733_s27  ;;  %s5741_s27 = spop %4634 }
  0xed   : > { %4786 = vpush %v2643_v27  ;;  %v682_v27 = vadd.f32 %v666_v9, %v618_v17  ;;  %v5707_v9 = vpop.permute.xlu2 %721  ;;  %v738_v11 = vadd.f32 %v5594_v46, %v674_v56  ;;  %v550_v17 = vmul.f32 %v530_v0, %v5542_v28  ;;  %v917_v62 = vstv %s7879_s5  ;;  %7885 = sst [smem:[#allocation41_spill]] %s5741_s27  ;;  %s5758_s25 = spop %4636 }
  0xee   : > { %v896_v21 = vadd.f32 %v880_v3, %v832_v5  ;;  %v680_v63 = vadd.f32 %v664_v13, %v616_v22  ;;  %v752_v4 = vmax.f32 %v736_v15, 0.0  ;;  %v828_v13 = vmul.f32 %v798_v19, %v5542_v28  ;;  %s7888_s27 = sld [smem:[#allocation37_spill]] }
  0xef   : > { %v746_v10 = vadd.f32 %v5680_v26, %v682_v27  ;;  %v614_v48 = vadd.f32 %v598_v8, %v550_v17  ;;  %v754_v55 = vmax.f32 %v738_v11, 0.0  ;;  %v7729_v8 = vstv %s7882_s7  ;;  %7889 = sst [smem:[#allocation28_spill]] %s5758_s25  ;;  %s5775_s25 = spop %4638 }
  0xf0   : > { %v960_v56 = vadd.f32 %v944_v12, %v896_v21  ;;  %v7720_v3 = vstv %s7880_s2  ;;  %v7728_v17 = vstv %s7883_s22  ;;  %v876_v11 = vmul.f32 %v853_v23, %v5562_v30  ;;  %s7890_s4 = sld [smem:[#allocation44_spill]]  ;;  %v5782_v25 = vpop.permute.xlu0 %993  ;;  %s5784_s7 = spop %4640 }
  0xf1   : > { %v7730_v27 = vstv %s7877_s16  ;;  %v762_v52 = vmax.f32 %v746_v10, 0.0  ;;  %v678_v6 = vadd.f32 %v662_v18, %v614_v48  ;;  %v886_v10 = vmul.f32 %v7721_v47, %v5562_v30  ;;  %7891 = sst [smem:[#allocation44_spill]] %s5775_s25  ;;  %s5791_s25 = spop %4642 }
  0xf2   : > { %v838_v12 = vmul.f32 %v7718_v20, %v5542_v28  ;;  %v878_v15 = vmul.f32 %v7730_v27, %v5562_v30  ;;  %v744_v21 = vadd.f32 %v5717_v14, %v680_v63  ;;  %v950_v22 = vmul.f32 %v7720_v3, %v5626_v61  ;;  %s7892_s6 = sld [smem:[#allocation29_spill]] }
  0xf3   : > { %792 = vadd.xlane.f32.xlu0 %v762_v52  ;;  %776 = vadd.xlane.f32.xlu1 %v754_v55  ;;  %v940_v48 = vmul.f32 %v917_v62, %v5626_v61  ;;  %v742_v52 = vadd.f32 %v5707_v9, %v678_v6  ;;  %v830_v55 = vmul.f32 %v7729_v8, %v5542_v28  ;;  %s7893_s2 = sld [smem:[#allocation45_spill]]  ;;  %v810_v3 = vstv %s7886_s19 }
  0xf4   : > { %v5737_v5 = vpop.permute.xlu1 %997  ;;  %772 = vadd.xlane.f32.xlu2 %v752_v4  ;;  %v942_v4 = vmul.f32 %v7728_v17, %v5626_v61  ;;  %v902_v63 = vadd.f32 %v886_v10, %v838_v12  ;;  %v892_v20 = vadd.f32 %v876_v11, %v828_v13  ;;  %v862_v47 = vstv %s7887_s17  ;;  %7894 = sst [smem:[#allocation29_spill]] %s5784_s7  ;;  %v5787_v11 = vpop.f32.mrf.mxu0  ;;  %s5810_s17 = spop %4644 }
  0xf5   : > { %v1024_v18 = vadd.f32 %v5737_v5, %v960_v56  ;;  %v5777_v56 = vpop.permute.xlu2 %989  ;;  %v7735_v24 = vstv %s7888_s27  ;;  %v894_v6 = vadd.f32 %v878_v15, %v830_v55  ;;  %v760_v42 = vmax.f32 %v744_v21, 0.0  ;;  %7895 = sst [smem:[#allocation45_spill]] %s5791_s25  ;;  %s5827_s29 = spop %4646 }
  0xf6   : > { %v966_v16 = vadd.f32 %v950_v22, %v902_v63  ;;  %v956_v17 = vadd.f32 %v940_v48, %v892_v20  ;;  %v7738_v10 = vstv %s7890_s4  ;;  %v758_v12 = vmax.f32 %v742_v52, 0.0  ;;  %s7896_s7 = sld [smem:[#allocation31_spill]]  ;;  %s5832_s1 = spop %4648 }
  0xf7   : > { %v1040_v60 = vmax.f32 %v1024_v18, 0.0  ;;  %v958_v13 = vadd.f32 %v942_v4, %v894_v6  ;;  %v882_v15 = vmul.f32 %v862_v47, %v5562_v30  ;;  %v589_v20 = vmul.f32 %v565_v39, %v5576_v33  ;;  %s7897_s22 = sld [smem:[#allocation39_spill]] }
  0xf8   : > { %v7736_v8 = vstv %s7892_s6  ;;  %v834_v21 = vmul.f32 %v810_v3, %v5542_v28  ;;  %s7898_s25 = sld [smem:[#allocation40_spill]]  ;;  %v1020_v39 = vadd.f32 %v5777_v56, %v956_v17  ;;  %v946_v48 = vmul.f32 %v7738_v10, %v5626_v61 }
  0xf9   : > { %v7737_v27 = vstv %s7893_s2  ;;  %7899 = sst [smem:[#allocation31_spill]] %s5810_s17  ;;  %v653_v52 = vmul.f32 %v629_v51, %v5787_v11  ;;  %v1022_v55 = vadd.f32 %v5782_v25, %v958_v13  ;;  %v836_v4 = vmul.f32 %v7736_v8, %v5542_v28 }
  0xfa   : > { %s7901_s17 = sld [smem:[#allocation32_spill]]  ;;  %v1036_v8 = vmax.f32 %v1020_v39, 0.0  ;;  %v593_v39 = vmul.f32 %v571_v44, %v5576_v33  ;;  %v657_v44 = vmul.f32 %v635_v57, %v5787_v11 }
  0xfb   : > { %1060 = vadd.xlane.f32.xlu0 %v1040_v60  ;;  %788 = vadd.xlane.f32.xlu1 %v760_v42  ;;  %v884_v60 = vmul.f32 %v7735_v24, %v5562_v30  ;;  %v541_v42 = vmul.f32 %v510_v36, %v5552_v29  ;;  %v948_v36 = vmul.f32 %v7737_v27, %v5626_v61  ;;  %s7902_s27 = sld [smem:[#allocation48_spill]] }
  0xfc   : > { %v5799_v18 = vpop.permute.xlu1 %1009  ;;  %784 = vadd.xlane.f32.xlu2 %v758_v12  ;;  %v822_v63 = vstv %s7896_s7  ;;  %7903 = sst [smem:[#allocation39_spill]] %s5832_s1  ;;  %s5841_s1 = spop %4650 }
  0xfd   : > { %v1030_v22 = vadd.f32 %v5799_v18, %v966_v16  ;;  %v898_v16 = vadd.f32 %v882_v15, %v834_v21  ;;  %v605_v17 = vadd.f32 %v589_v20, %v541_v42  ;;  %v871_v6 = vstv %s7897_s22  ;;  %v5834_v51 = vpop.permute.xlu2 %1005  ;;  %v5837_v20 = vpop.permute.xlu0 %1001  ;;  %7904 = sst [smem:[#allocation40_spill]] %s5841_s1  ;;  %s5858_s1 = spop %4652 }
  0xfe   : > { %v7740_v12 = vstv %s7898_s25  ;;  %v900_v24 = vadd.f32 %v884_v60, %v836_v4  ;;  %v935_v21 = vstv %s7900_s28  ;;  %v1038_v42 = vmax.f32 %v1022_v55, 0.0  ;;  %s5875_s13 = spop %4654  ;;  %s7924_s19 = sld [smem:[#allocation35_spill]] }
  0xff   : > { %v1046_v13 = vmax.f32 %v1030_v22, 0.0  ;;  %v962_v27 = vadd.f32 %v946_v48, %v898_v16  ;;  %v669_v15 = vadd.f32 %v653_v52, %v605_v17  ;;  %v888_v22 = vmul.f32 %v871_v6, %v5562_v30  ;;  %s5877_s10 = spop %4656  ;;  %s7935_s7 = sld [smem:[#allocation30_spill]] }
 0x100   : > { %v964_v10 = vadd.f32 %v948_v36, %v900_v24  ;;  %v7739_v60 = vstv %s7901_s17  ;;  %v840_v48 = vmul.f32 %v822_v63, %v5542_v28  ;;  %v890_v24 = vmul.f32 %v7740_v12, %v5562_v30  ;;  %7905 = sst [smem:[#allocation47_spill]] %s5877_s10  ;;  %s5879_s23 = spop %4658 }
 0x101   : > { %v7741_v4 = vstv %s7902_s27  ;;  %v545_v52 = vmul.f32 %v518_v38, %v5552_v29  ;;  %v733_v55 = vadd.f32 %v5574_v32, %v669_v15  ;;  %v952_v36 = vmul.f32 %v935_v21, %v5626_v61  ;;  %s5900_s10 = spop %4660  ;;  %s7936_s28 = sld [smem:[#allocation46_spill]] }
 0x102   : > { %v1028_v16 = vadd.f32 %v5834_v51, %v964_v10  ;;  %v842_v17 = vmul.f32 %v7739_v60, %v5542_v28  ;;  %v954_v38 = vmul.f32 %v7741_v4, %v5626_v61  ;;  %s5917_s18 = spop %4662 }
 0x103   : > { %1072 = vadd.xlane.f32.xlu0 %v1046_v13  ;;  %1052 = vadd.xlane.f32.xlu1 %v1036_v8  ;;  %v1026_v8 = vadd.f32 %v5837_v20, %v962_v27  ;;  %v904_v27 = vadd.f32 %v888_v22, %v840_v48  ;;  %v609_v32 = vadd.f32 %v593_v39, %v545_v52  ;;  %v749_v10 = vmax.f32 %v733_v55, 0.0  ;;  %s5919_s8 = spop %4664 }
 0x104   : > { %1056 = vadd.xlane.f32.xlu2 %v1038_v42  ;;  %v906_v13 = vadd.f32 %v890_v24, %v842_v17  ;;  %v1044_v60 = vmax.f32 %v1028_v16, 0.0  ;;  %v597_v22 = vmul.f32 %v577_v35, %v5576_v33  ;;  %v599_v39 = vmul.f32 %v580_v49, %v5576_v33  ;;  %s5921_s9 = spop %4666 }
 0x105   : > { %v1042_v57 = vmax.f32 %v1026_v8, 0.0  ;;  %v968_v15 = vadd.f32 %v952_v36, %v904_v27  ;;  %v673_v42 = vadd.f32 %v657_v44, %v609_v32  ;;  %v5881_v4 = vpop.permute.xlu2 %1017  ;;  %v5889_v48 = vpop.permute.xlu0 %1013  ;;  %v549_v24 = vmul.f32 %v526_v41, %v5552_v29  ;;  %s5938_s14 = spop %4668 }
 0x106   : > { %v970_v12 = vadd.f32 %v954_v38, %v906_v13  ;;  %v591_v52 = vmul.f32 %v568_v34, %v5576_v33  ;;  %v551_v8 = vmul.f32 %v530_v0, %v5552_v29  ;;  %v661_v49 = vmul.f32 %v641_v54, %v5787_v11  ;;  %s5955_s26 = spop %4670 }
 0x107   : > { %v1032_v55 = vadd.f32 %v5889_v48, %v968_v15  ;;  %v737_v35 = vadd.f32 %v5566_v31, %v673_v42  ;;  %v543_v34 = vmul.f32 %v514_v37, %v5552_v29  ;;  %v655_v0 = vmul.f32 %v632_v53, %v5787_v11  ;;  %s5957_s5 = spop %4672 }
 0x108   : > { %v1034_v41 = vadd.f32 %v5881_v4, %v970_v12  ;;  %v613_v36 = vadd.f32 %v597_v22, %v549_v24  ;;  %v615_v31 = vadd.f32 %v599_v39, %v551_v8  ;;  %v603_v53 = vmul.f32 %v586_v50, %v5576_v33  ;;  %7913 = sst [smem:[#allocation32_spill]] %s5957_s5  ;;  %s5962_s3 = spop %4674 }
 0x109   : > { %v607_v54 = vadd.f32 %v591_v52, %v543_v34  ;;  %v753_v12 = vmax.f32 %v737_v35, 0.0  ;;  %v877_v38 = vmul.f32 %v853_v23, %v5576_v33  ;;  %v555_v27 = vmul.f32 %v538_v43, %v5552_v29 }
 0x10a   : > { %v677_v44 = vadd.f32 %v661_v49, %v613_v36  ;;  %v1050_v16 = vmax.f32 %v1034_v41, 0.0  ;;  %v595_v32 = vmul.f32 %v574_v45, %v5576_v33  ;;  %v829_v13 = vmul.f32 %v798_v19, %v5552_v29 }
 0x10b   : > { %1064 = vadd.xlane.f32.xlu1 %v1042_v57  ;;  %766 = vadd.xlane.f32.xlu0 %v749_v10  ;;  %v671_v17 = vadd.f32 %v655_v0, %v607_v54  ;;  %v667_v50 = vmul.f32 %v650_v59, %v5787_v11  ;;  %v941_v23 = vmul.f32 %v917_v62, %v5787_v11  ;;  %v7917_v52 = vstv %s7910_s12 }
 0x10c   : > { %1068 = vadd.xlane.f32.xlu2 %v1044_v60  ;;  %v663_v60 = vmul.f32 %v644_v1, %v5787_v11  ;;  %v1048_v1 = vmax.f32 %v1032_v55, 0.0  ;;  %v741_v57 = vadd.f32 %v5636_v2, %v677_v44  ;;  %v547_v45 = vmul.f32 %v522_v40, %v5552_v29 }
 0x10d   : > { %v735_v43 = vadd.f32 %v5647_v7, %v671_v17  ;;  %v659_v19 = vmul.f32 %v638_v58, %v5787_v11  ;;  %v619_v2 = vadd.f32 %v603_v53, %v555_v27  ;;  %v7914_v58 = vstv %s7877_s16  ;;  %s5976_s16 = spop %4676 }
 0x10e   : > { %v679_v37 = vadd.f32 %v663_v60, %v615_v31  ;;  %v611_v59 = vadd.f32 %v595_v32, %v547_v45  ;;  %v757_v62 = vmax.f32 %v741_v57, 0.0  ;;  %v879_v39 = vmul.f32 %v7914_v58, %v5576_v33  ;;  %s5993_s20 = spop %4678 }
 0x10f   : > { %v683_v7 = vadd.f32 %v667_v50, %v619_v2  ;;  %v751_v40 = vmax.f32 %v735_v43, 0.0  ;;  %v883_v24 = vmul.f32 %v862_v47, %v5576_v33  ;;  %v831_v8 = vmul.f32 %v7917_v52, %v5552_v29 }
 0x110   : > { %v743_v10 = vadd.f32 %v5707_v9, %v679_v37  ;;  %v893_v9 = vadd.f32 %v877_v38, %v829_v13  ;;  %v675_v22 = vadd.f32 %v659_v19, %v611_v59  ;;  %v7918_v55 = vstv %s7911_s21  ;;  %s7926_s21 = sld [smem:[#allocation43_spill]] }
 0x111   : > { %v943_v35 = vmul.f32 %v7918_v55, %v5787_v11  ;;  %v7919_v49 = vstv %s7912_s15  ;;  %v747_v41 = vadd.f32 %v5680_v26, %v683_v7  ;;  %v835_v0 = vmul.f32 %v810_v3, %v5552_v29 }
 0x112   : > { %v759_v15 = vmax.f32 %v743_v10, 0.0  ;;  %v957_v42 = vadd.f32 %v941_v23, %v893_v9  ;;  %v601_v60 = vmul.f32 %v7919_v49, %v5576_v33  ;;  %v7920_v47 = vstv %s7890_s4  ;;  %s5995_s4 = spop %4680 }
 0x113   : > { %1076 = vadd.xlane.f32.xlu1 %v1048_v1  ;;  %774 = vadd.xlane.f32.xlu0 %v753_v12  ;;  %v947_v36 = vmul.f32 %v7920_v47, %v5787_v11  ;;  %v739_v31 = vadd.f32 %v5594_v46, %v675_v22  ;;  %v895_v54 = vadd.f32 %v879_v39, %v831_v8  ;;  %v7921_v1 = vstv %s7915_s24  ;;  %s5997_s12 = spop %4682 }
 0x114   : > { %1080 = vadd.xlane.f32.xlu2 %v1050_v16  ;;  %v1021_v34 = vadd.f32 %v5777_v56, %v957_v42  ;;  %v553_v12 = vmul.f32 %v7921_v1, %v5552_v29  ;;  %v7923_v44 = vstv %s7916_s11  ;;  %v899_v26 = vadd.f32 %v883_v24, %v835_v0  ;;  %s6012_s15 = spop %4684 }
 0x115   : > { %v665_v37 = vmul.f32 %v7923_v44, %v5787_v11  ;;  %v959_v56 = vadd.f32 %v943_v35, %v895_v54  ;;  %v763_v16 = vmax.f32 %v747_v41, 0.0  ;;  %v755_v53 = vmax.f32 %v739_v31, 0.0  ;;  %s6031_s22 = spop %4686 }
 0x116   : > { %v617_v3 = vadd.f32 %v601_v60, %v553_v12  ;;  %v1037_v46 = vmax.f32 %v1021_v34, 0.0  ;;  %v963_v17 = vadd.f32 %v947_v36, %v899_v26  ;;  %v7927_v27 = vstv %s7922_s30 }
 0x117   : > { %v885_v32 = vmul.f32 %v7927_v27, %v5576_v33  ;;  %v889_v13 = vmul.f32 %v871_v6, %v5576_v33  ;;  %v1023_v57 = vadd.f32 %v5782_v25, %v959_v56  ;;  %v7928_v10 = vstv %s7892_s6  ;;  %s7933_s6 = sld [smem:[#allocation38_spill]] }
 0x118   : > { %v681_v38 = vadd.f32 %v665_v37, %v617_v3  ;;  %v837_v50 = vmul.f32 %v7928_v10, %v5552_v29  ;;  %v7929_v23 = vstv %s7924_s19  ;;  %v1027_v45 = vadd.f32 %v5837_v20, %v963_v17 }
 0x119   : > { %v881_v43 = vmul.f32 %v7929_v23, %v5576_v33  ;;  %v7930_v19 = vstv %s7893_s2  ;;  %v841_v9 = vmul.f32 %v822_v63, %v5552_v29  ;;  %v953_v6 = vmul.f32 %v935_v21, %v5787_v11  ;;  %s6033_s2 = spop %4688 }
 0x11a   : > { %v949_v2 = vmul.f32 %v7930_v19, %v5787_v11  ;;  %v745_v25 = vadd.f32 %v5717_v14, %v681_v38  ;;  %v7931_v59 = vstv %s7925_s0  ;;  %v901_v20 = vadd.f32 %v885_v32, %v837_v50  ;;  %7934 = sst [smem:[#allocation48_spill]] %s6033_s2  ;;  %s6035_s24 = spop %4690 }
 0x11b   : > { %782 = vadd.xlane.f32.xlu1 %v757_v62  ;;  %786 = vadd.xlane.f32.xlu0 %v759_v15  ;;  %v833_v62 = vmul.f32 %v7931_v59, %v5552_v29  ;;  %v7932_v15 = vstv %s7926_s21  ;;  %v905_v42 = vadd.f32 %v889_v13, %v841_v9  ;;  %v1039_v63 = vmax.f32 %v1023_v57, 0.0  ;;  %7937 = sst [smem:[#allocation24_spill]] %s6035_s24  ;;  %s6043_s11 = spop %4692 }
 0x11c   : > { %770 = vadd.xlane.f32.xlu2 %v751_v40  ;;  %v945_v7 = vmul.f32 %v7932_v15, %v5787_v11  ;;  %v1043_v21 = vmax.f32 %v1027_v45, 0.0  ;;  %v965_v14 = vadd.f32 %v949_v2, %v901_v20  ;;  %v761_v58 = vmax.f32 %v745_v25, 0.0  ;;  %7940 = sst [smem:[#allocation17_spill]] %s6043_s11 }
 0x11d   : > { %v897_v40 = vadd.f32 %v881_v43, %v833_v62  ;;  %v969_v22 = vadd.f32 %v953_v6, %v905_v42  ;;  %v7938_v24 = vstv %s7898_s25  ;;  %v7939_v8 = vstv %s7933_s6  ;;  %s6060_s25 = spop %4694 }
 0x11e   : > { %v891_v52 = vmul.f32 %v7938_v24, %v5576_v33  ;;  %v887_v55 = vmul.f32 %v7939_v8, %v5576_v33  ;;  %v1029_v35 = vadd.f32 %v5834_v51, %v965_v14  ;;  %v7941_v60 = vstv %s7901_s17  ;;  %7945 = sst [smem:[#allocation21_spill]] %s6060_s25  ;;  %s6062_s30 = spop %4696 }
 0x11f   : > { %v961_v39 = vadd.f32 %v945_v7, %v897_v40  ;;  %v1033_v49 = vadd.f32 %v5889_v48, %v969_v22  ;;  %v843_v41 = vmul.f32 %v7941_v60, %v5552_v29  ;;  %v7942_v34 = vstv %s7902_s27  ;;  %7946 = sst [smem:[#allocation36_spill]] %s6062_s30  ;;  %s6064_s27 = spop %4698 }
 0x120   : > { %v955_v0 = vmul.f32 %v7942_v34, %v5787_v11  ;;  %v7943_v36 = vstv %s7935_s7  ;;  %v7944_v54 = vstv %s7936_s28  ;;  %v1045_v48 = vmax.f32 %v1029_v35, 0.0  ;;  %7947 = sst [smem:[#allocation26_spill]] %s6064_s27  ;;  %s6066_s17 = spop %4700 }
 0x121   : > { %v1025_v47 = vadd.f32 %v5737_v5, %v961_v39  ;;  %v839_v31 = vmul.f32 %v7943_v36, %v5552_v29  ;;  %v951_v1 = vmul.f32 %v7944_v54, %v5787_v11  ;;  %v907_v12 = vadd.f32 %v891_v52, %v843_v41  ;;  %7948 = sst [smem:[#allocation42_spill]] %s6066_s17  ;;  %s6070_s19 = spop %4702 }
 0x122   : > { %v1049_v44 = vmax.f32 %v1033_v49, 0.0  ;;  %7949 = sst [smem:[#allocation20_spill]] %s6070_s19  ;;  %s6072_s0 = spop %4704 }
 0x123   : > { %794 = vadd.xlane.f32.xlu1 %v763_v16  ;;  %1054 = vadd.xlane.f32.xlu0 %v1037_v46  ;;  %v903_v51 = vadd.f32 %v887_v55, %v839_v31  ;;  %v971_v37 = vadd.f32 %v955_v0, %v907_v12  ;;  %v1041_v26 = vmax.f32 %v1025_v47, 0.0  ;;  %7950 = sst [smem:[#allocation19_spill]] %s6072_s0  ;;  %s6074_s21 = spop %4706 }
 0x124   : > { %778 = vadd.xlane.f32.xlu2 %v755_v53  ;;  %s6076_s6 = spop %4708  ;;  %s7955_s25 = sld [smem:[#allocation131_spill]]  ;;  %v2266_v39 = vstv %s6074_s21 }
 0x125   : > { %v967_v56 = vadd.f32 %v951_v1, %v903_v51  ;;  %v1035_v5 = vadd.f32 %v5881_v4, %v971_v37  ;;  %7951 = sst [smem:[#allocation23_spill]] %s6076_s6  ;;  %s6078_s7 = spop %4710  ;;  %v2282_v8 = vmul.f32 %v2266_v39, %v5542_v28  ;;  %v2283_v55 = vmul.f32 %v2266_v39, %v5552_v29 }
 0x126   : > { %7952 = sst [smem:[#allocation37_spill]] %s6078_s7  ;;  %s6080_s28 = spop %4712 }
 0x127   : > { %v1031_v3 = vadd.f32 %v5799_v18, %v967_v56  ;;  %v1051_v16 = vmax.f32 %v1035_v5, 0.0  ;;  %7953 = sst [smem:[#allocation35_spill]] %s6080_s28  ;;  %s6082_s17 = spop %4714 }
 0x128   : > { %7954 = sst [smem:[#allocation27_spill]] %s6082_s17  ;;  %s6087_s19 = spop %4716 }
 0x129   : > { %v1047_v46 = vmax.f32 %v1031_v3, 0.0  ;;  %7956 = sst [smem:[#allocation43_spill]] %s6087_s19  ;;  %s6089_s0 = spop %4718 }
 0x12a   : > { %v4862_v18 = vld [vmem:[%s7955_s25 + $0x10] ss:$0 sm:$0xff]  ;;  %7957 = sst [smem:[#allocation38_spill]] %s6089_s0  ;;  %s6091_s11 = spop %4720  ;;  %v4863_v4 = vld [vmem:[%s7955_s25 + $0x13] ss:$0 sm:$0xff] }
 0x12b   : > { %1058 = vadd.xlane.f32.xlu1 %v1039_v63  ;;  %1066 = vadd.xlane.f32.xlu0 %v1043_v21  ;;  %7958 = sst [smem:[#allocation30_spill]] %s6091_s11  ;;  %s6093_s2 = spop %4722  ;;  %v4864_v17 = vld [vmem:[%s7955_s25 + $0x11] ss:$0 sm:$0xff]  ;;  %v4865_v53 = vld [vmem:[%s7955_s25 + $0x12] ss:$0 sm:$0xff] }
 0x12c   : > { %790 = vadd.xlane.f32.xlu2 %v761_v58  ;;  %s6098_s28 = spop %4724  ;;  %v4866_v38 = vld [vmem:[%s7955_s25 + $0x15] ss:$0 sm:$0xff]  ;;  %v4867_v27 = vld [vmem:[%s7955_s25 + $0x14] ss:$0 sm:$0xff]  ;;  %v4868_v32 = vld [vmem:[%s7955_s25 + $0x16] ss:$0 sm:$0xff]  ;;  %v2314_v24 = vstv %s6093_s2 }
 0x12d   : > { %s6100_s17 = spop %4726  ;;  %v4869_v50 = vld [vmem:[%s7955_s25 + $0x17] ss:$0 sm:$0xff]  ;;  %v2330_v35 = vmul.f32 %v2314_v24, %v5562_v30  ;;  %v2331_v49 = vmul.f32 %v2314_v24, %v5576_v33  ;;  %s7976_s2 = sld [smem:[#allocation58_spill]] }
 0x12e   : > { %7959 = sst [smem:[#allocation46_spill]] %s6100_s17  ;;  %s6108_s11 = spop %4728 }
 0x12f   : > { %7960 = sst [smem:[#allocation111_spill]] %s6108_s11  ;;  %s6110_s7 = spop %4730  ;;  %v2346_v34 = vadd.f32 %v2330_v35, %v2282_v8  ;;  %v2347_v0 = vadd.f32 %v2331_v49, %v2283_v55 }
 0x130   : > { %7961 = sst [smem:[#allocation112_spill]] %s6110_s7  ;;  %s6115_s6 = spop %4732 }
 0x131   : > { %7962 = sst [smem:[#allocation113_spill]] %s6115_s6  ;;  %s6117_s17 = spop %4734 }
 0x132   : > { %7963 = sst [smem:[#allocation114_spill]] %s6117_s17  ;;  %s6125_s7 = spop %4736 }
 0x133   : > { %1070 = vadd.xlane.f32.xlu1 %v1045_v48  ;;  %1078 = vadd.xlane.f32.xlu0 %v1049_v44  ;;  %7964 = sst [smem:[#allocation115_spill]] %s6125_s7  ;;  %s6127_s11 = spop %4738  ;;  %v1144_v49 = vstv %s7976_s2 }
 0x134   : > { %1062 = vadd.xlane.f32.xlu2 %v1041_v26  ;;  %s6129_s24 = spop %4740  ;;  %v2378_v52 = vstv %s6127_s11  ;;  %s7977_s11 = sld [smem:[#allocation50_spill]] }
 0x135   : > { %s6135_s5 = spop %4742  ;;  %v2394_v60 = vmul.f32 %v2378_v52, %v5626_v61  ;;  %v2395_v37 = vmul.f32 %v2378_v52, %v5787_v11  ;;  %s7978_s21 = sld [smem:[#allocation49_spill]] }
 0x136   : > { %7965 = sst [smem:[#allocation116_spill]] %s6135_s5  ;;  %s6142_s19 = spop %4744 }
 0x137   : > { %7966 = sst [smem:[#allocation117_spill]] %s6142_s19  ;;  %s6144_s0 = spop %4746  ;;  %v6207_v54 = vadd.f32 %v2394_v60, %v2346_v34  ;;  %v6220_v5 = vadd.f32 %v2395_v37, %v2347_v0 }
 0x138   : > { %7967 = sst [smem:[#allocation118_spill]] %s6144_s0  ;;  %s6146_s7 = spop %4748 }
 0x139   : > { %7968 = sst [smem:[#allocation119_spill]] %s6146_s7  ;;  %s6152_s17 = spop %4750 }
 0x13a   : > { %7970 = sst [smem:[#allocation121_spill]] %s6152_s17  ;;  %s4753_s6 = spop %4752  ;;  %v1090_v34 = vstv %s7977_s11 }
 0x13b   : > { %1082 = vadd.xlane.f32.xlu1 %v1051_v16  ;;  %s6156_s5 = spop %4754  ;;  %v2550_v62 = vstv %s4753_s6  ;;  %s7982_s2 = sld [smem:[#allocation59_spill]] }
 0x13c   : > { %1074 = vadd.xlane.f32.xlu2 %v1047_v46  ;;  %s6158_s30 = spop %4756  ;;  %v2568_v20 = vmul.f32 %v2550_v62, %v5542_v28  ;;  %v2569_v42 = vmul.f32 %v2550_v62, %v5552_v29  ;;  %v2554_v47 = vstv %s6156_s5  ;;  %s7979_s5 = sld [smem:[#allocation66_spill]] }
 0x13d   : > { %s6160_s27 = spop %4758  ;;  %v2570_v12 = vmul.f32 %v2554_v47, %v5542_v28  ;;  %v2571_v51 = vmul.f32 %v2554_v47, %v5552_v29  ;;  %v1086_v47 = vstv %s7978_s21  ;;  %s7983_s11 = sld [smem:[#allocation60_spill]] }
 0x13e   : > { %7971 = sst [smem:[#allocation122_spill]] %s6160_s27  ;;  %s6168_s7 = spop %4760 }
 0x13f   : > { %7972 = sst [smem:[#allocation123_spill]] %s6168_s7  ;;  %s6170_s0 = spop %4762 }
 0x140   : > { %7973 = sst [smem:[#allocation124_spill]] %s6170_s0  ;;  %s6172_s17 = spop %4764 }
 0x141   : > { %7974 = sst [smem:[#allocation125_spill]] %s6172_s17  ;;  %s6174_s19 = spop %4766 }
 0x142   : > { %7975 = sst [smem:[#allocation126_spill]] %s6174_s19  ;;  %s4769_s27 = spop %4768 }
 0x143   : > { %v2599_v15 = vstv %s4769_s27  ;;  %s4771_s6 = spop %4770  ;;  %s7980_s27 = sld [smem:[#allocation57_spill]] }
 0x144   : > { %v2616_v40 = vmul.f32 %v2599_v15, %v5562_v30  ;;  %v2617_v63 = vmul.f32 %v2599_v15, %v5576_v33  ;;  %v2602_v36 = vstv %s4771_s6  ;;  %s7981_s6 = sld [smem:[#allocation65_spill]] }
 0x145   : > { %v2618_v48 = vmul.f32 %v2602_v36, %v5562_v30  ;;  %v2619_v44 = vmul.f32 %v2602_v36, %v5576_v33  ;;  %v1208_v36 = vstv %s7979_s5  ;;  %s7984_s21 = sld [smem:[#allocation51_spill]] }
 0x146   : > { %v6190_v22 = vadd.f32 %v2616_v40, %v2568_v20  ;;  %v6192_v58 = vadd.f32 %v2617_v63, %v2569_v42  ;;  %s7985_s5 = sld [smem:[#allocation67_spill]] }
 0x147   : > { %1277 = vperm.xlu0 %4843, %v4862_v18   ;;  %v6216_v26 = vadd.f32 %v2618_v48, %v2570_v12  ;;  %v6218_v56 = vadd.f32 %v2619_v44, %v2571_v51  ;;  %s7988_s19 = sld [smem:[#allocation61_spill]] }
 0x148   : > { %s7989_s17 = sld [smem:[#allocation53_spill]] }
 0x149   : > { %v1141_v51 = vstv %s7980_s27  ;;  %s7986_s27 = sld [smem:[#allocation52_spill]] }
 0x14a   : > { %s7990_s0 = sld [smem:[#allocation69_spill]] }
 0x14b   : > { %s8000_s7 = sld [smem:[#allocation82_spill]] }
 0x14f   : > { %1289 = vperm.xlu0 %4843, %v4863_v4  }
 0x154   : > { %1281 = vperm.xlu2 %4845, %v4864_v17   ;;  %1285 = vperm.xlu1 %4844, %v4865_v53   ;;  %v2828_v17 = vlaneseq }
 0x157   : > { %1297 = vperm.xlu0 %4843, %v4866_v38  }
 0x15c   : > { %1293 = vperm.xlu2 %4845, %v4867_v27   ;;  %1301 = vperm.xlu1 %4844, %v4868_v32   ;;  %v6234_v27 = vand.u32 127, %v2828_v17  ;;  %v1166_v17 = vmul.f32 %v1144_v49, %v5562_v30 }
 0x15e   : > { %v6131_v13 = vpop.xlane.xlu0 %780  ;;  %v6133_v57 = vpop.xlane.xlu1 %768 }
 0x15f   : > { %v6137_v10 = vpop.xlane.xlu2 %764 }
 0x164   : > { %1305 = vperm.xlu2 %4845, %v4869_v50   ;;  %v6237_v50 = vadd.s32 4294967288, %v6234_v27 }
 0x166   : > { %v6148_v23 = vpop.xlane.xlu0 %792  ;;  %v6150_v43 = vpop.xlane.xlu1 %776 }
 0x167   : > { %7969 = vst [vmem:[#allocation120_spill] sm:$0xff] %v6148_v23  ;;  %v6154_v45 = vpop.xlane.xlu2 %772 }
 0x16e   : > { %v6162_v19 = vpop.xlane.xlu0 %1060  ;;  %v6164_v2 = vpop.xlane.xlu1 %788 }
 0x16f   : > { %v6166_v9 = vpop.xlane.xlu2 %784  ;;  %v2893_v63 = vperm.slane %v6162_v19, %v6234_v27 }
 0x176   : > { %v6176_v6 = vpop.xlane.xlu0 %1072  ;;  %v6178_v25 = vpop.xlane.xlu1 %1052 }
 0x177   : > { %v1057_v59 = vpop.xlane.xlu2 %1056  ;;  %v2887_v39 = vperm.slane %v6178_v25, %v6234_v27 }
 0x178   : > { %v2890_v15 = vperm.slane %v1057_v59, %v6234_v27 }
 0x17e   : > { %v6180_v7 = vpop.xlane.xlu1 %1064  ;;  %v6188_v14 = vpop.xlane.xlu0 %766 }
 0x17f   : > { %v6186_v21 = vpop.xlane.xlu2 %1068  ;;  %v2896_v25 = vperm.slane %v6180_v7, %v6234_v27  ;;  %v1205_v7 = vstv %s7981_s6  ;;  %s7987_s6 = sld [smem:[#allocation68_spill]] }
 0x180   : > { %v2899_v48 = vperm.slane %v6186_v21, %v6234_v27  ;;  %v1230_v21 = vmul.f32 %v1208_v36, %v5626_v61 }
 0x186   : > { %v6202_v41 = vpop.xlane.xlu1 %1076  ;;  %v6209_v1 = vpop.xlane.xlu0 %774 }
 0x187   : > { %v6205_v31 = vpop.xlane.xlu2 %1080 }
 0x18e   : > { %v6222_v3 = vpop.xlane.xlu1 %782  ;;  %v6226_v46 = vpop.xlane.xlu0 %786 }
 0x18f   : > { %v6224_v16 = vpop.xlane.xlu2 %770 }
 0x196   : > { %v6228_v18 = vpop.xlane.xlu1 %794  ;;  %v1055_v53 = vpop.xlane.xlu0 %1054 }
 0x197   : > { %v6230_v4 = vpop.xlane.xlu2 %778  ;;  %v2888_v20 = vperm.slane %v1055_v53, %v6237_v50  ;;  %v2902_v53 = vperm.slane %v6176_v6, %v6234_v27  ;;  %v1164_v6 = vmul.f32 %v1141_v51, %v5562_v30 }
 0x199   : > { %v2889_v59 = vsel %vm2833_vm0, %v2888_v20, %v2887_v39 }
 0x19e   : > { %v1059_v32 = vpop.xlane.xlu1 %1058  ;;  %v1067_v42 = vpop.xlane.xlu0 %1066 }
 0x19f   : > { %v6232_v38 = vpop.xlane.xlu2 %790  ;;  %v2891_v62 = vperm.slane %v1059_v32, %v6237_v50  ;;  %v2897_v8 = vperm.slane %v1067_v42, %v6237_v50  ;;  %v1165_v42 = vmul.f32 %v1141_v51, %v5576_v33 }
 0x1a1   : > { %v2892_v24 = vsel %vm2833_vm0, %v2891_v62, %v2890_v15  ;;  %v2898_v12 = vsel %vm2833_vm0, %v2897_v8, %v2896_v25  ;;  %v1118_v62 = vmul.f32 %v1090_v34, %v5542_v28  ;;  %v1116_v8 = vmul.f32 %v1086_v47, %v5542_v28 }
 0x1a2   : > { %v2911_v19 = vsel %vm2856_vm1, %v2892_v24, %v2889_v59  ;;  %v1229_v59 = vmul.f32 %v1205_v7, %v5787_v11 }
 0x1a3   : > { %v1182_v24 = vadd.f32 %v1166_v17, %v1118_v62  ;;  %v1180_v25 = vadd.f32 %v1164_v6, %v1116_v8  ;;  %v1214_v6 = vstv %s7987_s6  ;;  %s7999_s6 = sld [smem:[#allocation72_spill]] }
 0x1a6   : > { %v1071_v55 = vpop.xlane.xlu1 %1070  ;;  %v6272_v20 = vpop.xlane.xlu0 %1078 }
 0x1a7   : > { %v1063_v40 = vpop.xlane.xlu2 %1062  ;;  %v2900_v0 = vperm.slane %v1071_v55, %v6237_v50  ;;  %v1228_v55 = vmul.f32 %v1205_v7, %v5626_v61 }
 0x1a8   : > { %v2894_v52 = vperm.slane %v1063_v40, %v6237_v50 }
 0x1a9   : > { %v2901_v15 = vsel %vm2833_vm0, %v2900_v0, %v2899_v48  ;;  %v1167_v0 = vmul.f32 %v1144_v49, %v5576_v33  ;;  %v1244_v48 = vadd.f32 %v1228_v55, %v1180_v25 }
 0x1aa   : > { %v2895_v35 = vsel %vm2833_vm0, %v2894_v52, %v2893_v63  ;;  %v1117_v52 = vmul.f32 %v1086_v47, %v5552_v29  ;;  %v1231_v47 = vmul.f32 %v1208_v36, %v5787_v11  ;;  %v1098_v36 = vstv %s7986_s27  ;;  %s7998_s27 = sld [smem:[#allocation56_spill]] }
 0x1ab   : > { %v2912_v60 = vsel %vm2858_vm2, %v2895_v35, %v2911_v19  ;;  %v1246_v35 = vadd.f32 %v1230_v21, %v1182_v24  ;;  %v1150_v21 = vstv %s7983_s11  ;;  %s7995_s11 = sld [smem:[#allocation55_spill]] }
 0x1ac   : > { %v2913_v44 = vsel %vm2860_vm3, %v2898_v12, %v2912_v60  ;;  %v1181_v19 = vadd.f32 %v1165_v42, %v1117_v52  ;;  %v1094_v42 = vstv %s7984_s21  ;;  %v1170_v8 = vmul.f32 %v1150_v21, %v5562_v30  ;;  %s7996_s21 = sld [smem:[#allocation71_spill]] }
 0x1ad   : > { %v2914_v63 = vsel %vm2862_vm4, %v2901_v15, %v2913_v44  ;;  %v1119_v44 = vmul.f32 %v1090_v34, %v5552_v29  ;;  %v1120_v55 = vmul.f32 %v1094_v42, %v5542_v28 }
 0x1ae   : > { %v1245_v51 = vadd.f32 %v1229_v59, %v1181_v19 }
 0x1af   : > { %v1075_v37 = vpop.xlane.xlu2 %1074  ;;  %v1183_v62 = vadd.f32 %v1167_v0, %v1119_v44  ;;  %v1153_v0 = vstv %s7988_s19  ;;  %v1217_v44 = vstv %s7990_s0  ;;  %s7993_s19 = sld [smem:[#allocation63_spill]] }
 0x1b0   : > { %v2903_v32 = vperm.slane %v1075_v37, %v6237_v50  ;;  %s7994_s0 = sld [smem:[#allocation70_spill]] }
 0x1b1   : > { %v1247_v34 = vadd.f32 %v1231_v47, %v1183_v62 }
 0x1b2   : > { %v2904_v40 = vsel %vm2833_vm0, %v2903_v32, %v2902_v53  ;;  %v1147_v32 = vstv %s7982_s2  ;;  %s7991_s2 = sld [smem:[#allocation62_spill]] }
 0x1b3   : > { %v6280_v39 = vsel %vm2864_vm5, %v2904_v40, %v2914_v63  ;;  %v1211_v40 = vstv %s7985_s5  ;;  %v6293_v63 = vpop.xlane.xlu1 %1082  ;;  %v1168_v24 = vmul.f32 %v1147_v32, %v5562_v30  ;;  %v1169_v52 = vmul.f32 %v1147_v32, %v5576_v33  ;;  %s7997_s5 = sld [smem:[#allocation64_spill]] }
 0x1b4   : > { %v1232_v19 = vmul.f32 %v1211_v40, %v5626_v61  ;;  %v1233_v25 = vmul.f32 %v1211_v40, %v5787_v11 }
 0x1b7   : > { %v1282_v60 = vpop.permute.xlu2 %1281 }
 0x1b8   : > { %v1310_v12 = vadd.f32 %v1282_v60, %v1246_v35  ;;  %v1311_v59 = vadd.f32 %v1282_v60, %v1247_v34  ;;  %v1121_v35 = vmul.f32 %v1094_v42, %v5552_v29  ;;  %v1236_v42 = vmul.f32 %v1217_v44, %v5626_v61 }
 0x1b9   : > { %v1278_v37 = vpop.permute.xlu0 %1277 }
 0x1ba   : > { %v1326_v17 = vmax.f32 %v1310_v12, 0.0  ;;  %v1309_v7 = vadd.f32 %v1278_v37, %v1245_v51  ;;  %v1308_v53 = vadd.f32 %v1278_v37, %v1244_v48  ;;  %v1122_v12 = vmul.f32 %v1098_v36, %v5542_v28 }
 0x1bb   : > { %v1234_v51 = vmul.f32 %v1214_v6, %v5626_v61  ;;  %v1102_v48 = vstv %s7989_s17  ;;  %v1184_v37 = vadd.f32 %v1168_v24, %v1120_v55  ;;  %v1185_v47 = vadd.f32 %v1169_v52, %v1121_v35  ;;  %s7992_s17 = sld [smem:[#allocation54_spill]] }
 0x1bc   : > { %1344 = vadd.xlane.f32.xlu2 %v1326_v17  ;;  %v1325_v15 = vmax.f32 %v1309_v7, 0.0  ;;  %v1324_v49 = vmax.f32 %v1308_v53, 0.0  ;;  %v1186_v60 = vadd.f32 %v1170_v8, %v1122_v12  ;;  %v1327_v17 = vmax.f32 %v1311_v59, 0.0 }
 0x1bd   : > { %v1172_v7 = vmul.f32 %v1153_v0, %v5562_v30  ;;  %v1171_v53 = vmul.f32 %v1150_v21, %v5576_v33  ;;  %v1248_v62 = vadd.f32 %v1232_v19, %v1184_v37  ;;  %v1123_v24 = vmul.f32 %v1098_v36, %v5552_v29 }
 0x1be   : > { %1342 = vadd.xlane.f32.xlu1 %v1325_v15  ;;  %1340 = vadd.xlane.f32.xlu0 %v1324_v49  ;;  %v1249_v15 = vadd.f32 %v1233_v25, %v1185_v47  ;;  %v1124_v49 = vmul.f32 %v1102_v48, %v5542_v28  ;;  %v1250_v40 = vadd.f32 %v1234_v51, %v1186_v60  ;;  %v1156_v37 = vstv %s7991_s2  ;;  %s8004_s2 = sld [smem:[#allocation83_spill]] }
 0x1bf   : > { %v1235_v52 = vmul.f32 %v1214_v6, %v5787_v11  ;;  %v1173_v21 = vmul.f32 %v1153_v0, %v5576_v33  ;;  %v1187_v19 = vadd.f32 %v1171_v53, %v1123_v24  ;;  %v1125_v51 = vmul.f32 %v1102_v48, %v5552_v29  ;;  %v1294_v36 = vpop.permute.xlu2 %1293 }
 0x1c0   : > { %v1188_v35 = vadd.f32 %v1172_v7, %v1124_v49  ;;  %v1237_v47 = vmul.f32 %v1217_v44, %v5787_v11  ;;  %v1159_v0 = vstv %s7993_s19  ;;  %v1175_v48 = vmul.f32 %v1156_v37, %v5576_v33  ;;  %s8006_s19 = sld [smem:[#allocation75_spill]] }
 0x1c1   : > { %v1290_v32 = vpop.permute.xlu0 %1289  ;;  %v1106_v6 = vstv %s7992_s17  ;;  %v1223_v44 = vstv %s7996_s21  ;;  %s8005_s17 = sld [smem:[#allocation73_spill]] }
 0x1c2   : > { %v1314_v55 = vadd.f32 %v1290_v32, %v1250_v40  ;;  %v1252_v60 = vadd.f32 %v1236_v42, %v1188_v35  ;;  %v1174_v40 = vmul.f32 %v1156_v37, %v5562_v30  ;;  %v1126_v42 = vmul.f32 %v1106_v6, %v5542_v28  ;;  %s8010_s21 = sld [smem:[#allocation85_spill]] }
 0x1c4   : > { %v1330_v7 = vmax.f32 %v1314_v55, 0.0  ;;  %v1316_v53 = vadd.f32 %v1294_v36, %v1252_v60  ;;  %v1190_v55 = vadd.f32 %v1174_v40, %v1126_v42 }
 0x1c6   : > { %v1286_v34 = vpop.permute.xlu1 %1285  ;;  %1346 = vadd.xlane.f32.xlu0 %v1327_v17  ;;  %v1251_v17 = vadd.f32 %v1235_v52, %v1187_v19  ;;  %v1127_v52 = vmul.f32 %v1106_v6, %v5552_v29  ;;  %v1332_v19 = vmax.f32 %v1316_v53, 0.0  ;;  %v1177_v53 = vmul.f32 %v1159_v0, %v5576_v33 }
 0x1c7   : > { %v1312_v59 = vadd.f32 %v1286_v34, %v1248_v62  ;;  %v1313_v8 = vadd.f32 %v1286_v34, %v1249_v15  ;;  %v1220_v62 = vstv %s7994_s0  ;;  %v1189_v15 = vadd.f32 %v1173_v21, %v1125_v51  ;;  %s8007_s0 = sld [smem:[#allocation89_spill]] }
 0x1c8   : > { %v1315_v49 = vadd.f32 %v1290_v32, %v1251_v17  ;;  %v1110_v34 = vstv %s7995_s11  ;;  %v1176_v21 = vmul.f32 %v1159_v0, %v5562_v30  ;;  %v1191_v35 = vadd.f32 %v1175_v48, %v1127_v52  ;;  %s8008_s11 = sld [smem:[#allocation91_spill]] }
 0x1c9   : > { %v1329_v25 = vmax.f32 %v1313_v8, 0.0  ;;  %v1328_v12 = vmax.f32 %v1312_v59, 0.0  ;;  %v1253_v24 = vadd.f32 %v1237_v47, %v1189_v15  ;;  %v1238_v59 = vmul.f32 %v1220_v62, %v5626_v61  ;;  %v1298_v37 = vpop.permute.xlu0 %1297 }
 0x1ca   : > { %v1239_v8 = vmul.f32 %v1220_v62, %v5787_v11  ;;  %v1128_v51 = vmul.f32 %v1110_v34, %v5542_v28  ;;  %v1240_v47 = vmul.f32 %v1223_v44, %v5626_v61  ;;  %v1114_v17 = vstv %s7998_s27  ;;  %s8002_s27 = sld [smem:[#allocation90_spill]] }
 0x1cb   : > { %1350 = vadd.xlane.f32.xlu2 %v1329_v25  ;;  %1348 = vadd.xlane.f32.xlu1 %v1328_v12  ;;  %v1317_v32 = vadd.f32 %v1294_v36, %v1253_v24  ;;  %v1331_v25 = vmax.f32 %v1315_v49, 0.0  ;;  %v1162_v12 = vstv %s7997_s5  ;;  %v1254_v6 = vadd.f32 %v1238_v59, %v1190_v55  ;;  %s8001_s5 = sld [smem:[#allocation74_spill]] }
 0x1cc   : > { %v1255_v60 = vadd.f32 %v1239_v8, %v1191_v35  ;;  %v1226_v62 = vstv %s7999_s6  ;;  %v1192_v15 = vadd.f32 %v1176_v21, %v1128_v51  ;;  %v1130_v42 = vmul.f32 %v1114_v17, %v5542_v28  ;;  %v1306_v51 = vpop.permute.xlu2 %1305  ;;  %s8003_s6 = sld [smem:[#allocation81_spill]] }
 0x1cd   : > { %v1333_v36 = vmax.f32 %v1317_v32, 0.0  ;;  %v1318_v40 = vadd.f32 %v1298_v37, %v1254_v6  ;;  %v1242_v52 = vmul.f32 %v1226_v62, %v5626_v61  ;;  %v1129_v59 = vmul.f32 %v1110_v34, %v5552_v29 }
 0x1ce   : > { %1352 = vadd.xlane.f32.xlu0 %v1330_v7  ;;  %v1178_v7 = vmul.f32 %v1162_v12, %v5562_v30  ;;  %v1319_v48 = vadd.f32 %v1298_v37, %v1255_v60  ;;  %v1302_v49 = vpop.permute.xlu1 %1301  ;;  %v1256_v24 = vadd.f32 %v1240_v47, %v1192_v15  ;;  %v1241_v8 = vmul.f32 %v1223_v44, %v5787_v11 }
 0x1cf   : > { %v1179_v21 = vmul.f32 %v1162_v12, %v5576_v33  ;;  %v1193_v35 = vadd.f32 %v1177_v53, %v1129_v59  ;;  %v1131_v0 = vmul.f32 %v1114_v17, %v5552_v29  ;;  %v1243_v37 = vmul.f32 %v1226_v62, %v5787_v11  ;;  %v4870_v17 = vld [vmem:[%s7955_s25 + $0x1a] ss:$0 sm:$0xff]  ;;  %v4871_v62 = vld [vmem:[%s7955_s25 + $0x19] ss:$0 sm:$0xff]  ;;  %v4877_v59 = vld [vmem:[%s7955_s25 + $0x1e] ss:$0 sm:$0xff] }
 0x1d0   : > { %v1320_v32 = vadd.f32 %v1302_v49, %v1256_v24  ;;  %v1194_v55 = vadd.f32 %v1178_v7, %v1130_v42  ;;  %v4874_v24 = vld [vmem:[%s7955_s25 + $0x1d] ss:$0 sm:$0xff]  ;;  %v4875_v42 = vld [vmem:[%s7955_s25 + $0x1b] ss:$0 sm:$0xff] }
 0x1d1   : > { %v1257_v6 = vadd.f32 %v1241_v8, %v1193_v35  ;;  %v1195_v60 = vadd.f32 %v1179_v21, %v1131_v0 }
 0x1d2   : > { %v1258_v47 = vadd.f32 %v1242_v52, %v1194_v55  ;;  %v1336_v34 = vmax.f32 %v1320_v32, 0.0  ;;  %v4876_v52 = vld [vmem:[%s7955_s25 + $0x1f] ss:$0 sm:$0xff] }
 0x1d3   : > { %1356 = vadd.xlane.f32.xlu2 %v1332_v19  ;;  %1354 = vadd.xlane.f32.xlu1 %v1331_v25  ;;  %v1335_v19 = vmax.f32 %v1319_v48, 0.0  ;;  %v1334_v25 = vmax.f32 %v1318_v40, 0.0  ;;  %v1321_v44 = vadd.f32 %v1302_v49, %v1257_v6  ;;  %v4872_v48 = vld [vmem:[%s7955_s25 + $0x18] ss:$0 sm:$0xff]  ;;  %v4873_v49 = vld [vmem:[%s7955_s25 + $0x1c] ss:$0 sm:$0xff] }
 0x1d4   : > { %v1322_v15 = vadd.f32 %v1306_v51, %v1258_v47 }
 0x1d5   : > { %v1337_v53 = vmax.f32 %v1321_v44, 0.0 }
 0x1d6   : > { %1358 = vadd.xlane.f32.xlu0 %v1333_v36  ;;  %v1259_v36 = vadd.f32 %v1243_v37, %v1195_v60  ;;  %v1338_v7 = vmax.f32 %v1322_v15, 0.0 }
 0x1d8   : > { %v1323_v12 = vadd.f32 %v1306_v51, %v1259_v36 }
 0x1da   : > { %v1339_v40 = vmax.f32 %v1323_v12, 0.0 }
 0x1db   : > { %1362 = vadd.xlane.f32.xlu2 %v1335_v19  ;;  %1360 = vadd.xlane.f32.xlu1 %v1334_v25 }
 0x1de   : > { %1364 = vadd.xlane.f32.xlu0 %v1336_v34 }
 0x1e3   : > { %1368 = vadd.xlane.f32.xlu2 %v1338_v7  ;;  %1366 = vadd.xlane.f32.xlu1 %v1337_v53 }
 0x1e6   : > { %1370 = vadd.xlane.f32.xlu0 %v1339_v40 }
 0x1fa   : > { %1573 = vperm.xlu0 %4843, %v4870_v17  }
 0x1fb   : > { %1569 = vperm.xlu2 %4845, %v4871_v62  }
 0x1fc   : > { %1565 = vperm.xlu1 %4844, %v4872_v48  }
 0x202   : > { %1581 = vperm.xlu0 %4843, %v4873_v49  }
 0x203   : > { %1585 = vperm.xlu2 %4845, %v4874_v24  }
 0x204   : > { %1577 = vperm.xlu1 %4844, %v4875_v42  }
 0x20a   : > { %1593 = vperm.xlu0 %4843, %v4876_v52  }
 0x20c   : > { %1589 = vperm.xlu1 %4844, %v4877_v59  }
 0x22f   : > { %v1345_v19 = vpop.xlane.xlu2 %1344 }
 0x230   : > { %v2938_v0 = vperm.slane %v1345_v19, %v6234_v27 }
 0x231   : > { %v1343_v8 = vpop.xlane.xlu1 %1342  ;;  %v1341_v21 = vpop.xlane.xlu0 %1340 }
 0x232   : > { %v2936_v32 = vperm.slane %v1343_v8, %v6237_v50  ;;  %v2935_v55 = vperm.slane %v1341_v21, %v6234_v27 }
 0x234   : > { %v2937_v35 = vsel %vm2833_vm0, %v2936_v32, %v2935_v55 }
 0x239   : > { %v1347_v25 = vpop.xlane.xlu0 %1346 }
 0x23a   : > { %v2939_v37 = vperm.slane %v1347_v25, %v6237_v50  ;;  %v2906_v25 = vperm.slane %v6272_v20, %v6237_v50  ;;  %v2908_v20 = vperm.slane %v6205_v31, %v6234_v27 }
 0x23c   : > { %v2940_v51 = vsel %vm2833_vm0, %v2939_v37, %v2938_v0  ;;  %v1432_v37 = vstv %s8000_s7  ;;  %s8011_s7 = sld [smem:[#allocation77_spill]] }
 0x23d   : > { %v2959_v47 = vsel %vm2856_vm1, %v2940_v51, %v2937_v35  ;;  %v2905_v51 = vperm.slane %v6202_v41, %v6234_v27 }
 0x23e   : > { %v1351_v6 = vpop.xlane.xlu2 %1350  ;;  %v1349_v60 = vpop.xlane.xlu1 %1348 }
 0x23f   : > { %v2942_v34 = vperm.slane %v1351_v6, %v6237_v50  ;;  %v2941_v15 = vperm.slane %v1349_v60, %v6234_v27  ;;  %v2909_v6 = vperm.slane %v6293_v63, %v6237_v50  ;;  %v1496_v60 = vstv %s8002_s27  ;;  %s8013_s27 = sld [smem:[#allocation84_spill]] }
 0x240   : > { %v1518_v31 = vmul.f32 %v1496_v60, %v5626_v61 }
 0x241   : > { %v2943_v44 = vsel %vm2833_vm0, %v2942_v34, %v2941_v15  ;;  %v1353_v36 = vpop.xlane.xlu0 %1352  ;;  %v2907_v34 = vsel %vm2833_vm0, %v2906_v25, %v2905_v51  ;;  %v1493_v51 = vstv %s8007_s0  ;;  %s8018_s0 = sld [smem:[#allocation92_spill]] }
 0x242   : > { %v2960_v12 = vsel %vm2858_vm2, %v2943_v44, %v2959_v47  ;;  %v2944_v40 = vperm.slane %v1353_v36, %v6234_v27  ;;  %v1378_v47 = vstv %s8001_s5  ;;  %v1454_v36 = vmul.f32 %v1432_v37, %v5562_v30  ;;  %s8012_s5 = sld [smem:[#allocation93_spill]] }
 0x243   : > { %v1406_v63 = vmul.f32 %v1378_v47, %v5542_v28 }
 0x246   : > { %v1357_v7 = vpop.xlane.xlu2 %1356  ;;  %v1355_v53 = vpop.xlane.xlu1 %1354 }
 0x247   : > { %v2945_v17 = vperm.slane %v1355_v53, %v6237_v50  ;;  %v2947_v49 = vperm.slane %v1357_v7, %v6234_v27  ;;  %v2910_v53 = vsel %vm2833_vm0, %v2909_v6, %v2908_v20  ;;  %v1499_v6 = vstv %s8008_s11  ;;  %s8019_s11 = sld [smem:[#allocation88_spill]] }
 0x249   : > { %v2946_v62 = vsel %vm2833_vm0, %v2945_v17, %v2944_v40  ;;  %v1359_v48 = vpop.xlane.xlu0 %1358 }
 0x24a   : > { %v2961_v24 = vsel %vm2860_vm3, %v2946_v62, %v2960_v12  ;;  %v2948_v42 = vperm.slane %v1359_v48, %v6237_v50  ;;  %v2916_v12 = vsel %vm2866_vm6, %v2907_v34, %v6280_v39 }
 0x24c   : > { %v2949_v52 = vsel %vm2833_vm0, %v2948_v42, %v2947_v49  ;;  %v6417_v49 = vsel %vm2868_vm7, %v2910_v53, %v2916_v12  ;;  %v1441_v53 = vstv %s8010_s21  ;;  %s8025_s21 = sld [smem:[#allocation95_spill]] }
 0x24d   : > { %v2962_v59 = vsel %vm2862_vm4, %v2949_v52, %v2961_v24  ;;  %8009 = vst [vmem:[#allocation127_spill] sm:$0xff] %v6417_v49  ;;  %v1470_v24 = vadd.f32 %v1454_v36, %v1406_v63  ;;  %v1517_v63 = vmul.f32 %v1493_v51, %v5787_v11 }
 0x24e   : > { %v1363_v8 = vpop.xlane.xlu2 %1362  ;;  %v1361_v21 = vpop.xlane.xlu1 %1360 }
 0x24f   : > { %v2951_v32 = vperm.slane %v1363_v8, %v6237_v50  ;;  %v2950_v55 = vperm.slane %v1361_v21, %v6234_v27 }
 0x251   : > { %v2952_v35 = vsel %vm2833_vm0, %v2951_v32, %v2950_v55  ;;  %v1365_v19 = vpop.xlane.xlu0 %1364  ;;  %v1429_v55 = vstv %s8003_s6  ;;  %s8014_s6 = sld [smem:[#allocation86_spill]] }
 0x252   : > { %v2963_v0 = vsel %vm2864_vm5, %v2952_v35, %v2962_v59  ;;  %v2953_v41 = vperm.slane %v1365_v19, %v6234_v27  ;;  %v1534_v59 = vadd.f32 %v1518_v31, %v1470_v24  ;;  %v1435_v35 = vstv %s8004_s2  ;;  %s8015_s2 = sld [smem:[#allocation76_spill]] }
 0x253   : > { %v1374_v19 = vstv %s8005_s17  ;;  %v1457_v25 = vmul.f32 %v1435_v35, %v5576_v33  ;;  %v1453_v36 = vmul.f32 %v1429_v55, %v5576_v33  ;;  %v1455_v24 = vmul.f32 %v1432_v37, %v5576_v33  ;;  %s8016_s17 = sld [smem:[#allocation78_spill]] }
 0x254   : > { %v1404_v20 = vmul.f32 %v1374_v19, %v5542_v28 }
 0x256   : > { %v1369_v15 = vpop.xlane.xlu2 %1368  ;;  %v1367_v44 = vpop.xlane.xlu1 %1366 }
 0x257   : > { %v2954_v7 = vperm.slane %v1367_v44, %v6237_v50  ;;  %v2956_v62 = vperm.slane %v1369_v15, %v6234_v27  ;;  %v1521_v15 = vmul.f32 %v1499_v6, %v5787_v11  ;;  %v1452_v44 = vmul.f32 %v1429_v55, %v5562_v30 }
 0x259   : > { %v2955_v40 = vsel %vm2833_vm0, %v2954_v7, %v2953_v41  ;;  %v1371_v17 = vpop.xlane.xlu0 %1370  ;;  %v1405_v41 = vmul.f32 %v1374_v19, %v5552_v29  ;;  %v1516_v7 = vmul.f32 %v1493_v51, %v5626_v61  ;;  %v1468_v31 = vadd.f32 %v1452_v44, %v1404_v20 }
 0x25a   : > { %v2964_v39 = vsel %vm2866_vm6, %v2955_v40, %v2963_v0  ;;  %v2957_v48 = vperm.slane %v1371_v17, %v6237_v50  ;;  %v1382_v0 = vstv %s8006_s19  ;;  %v1390_v40 = vstv %s8011_s7  ;;  %s8017_s19 = sld [smem:[#allocation94_spill]] }
 0x25b   : > { %v1409_v34 = vmul.f32 %v1382_v0, %v5552_v29  ;;  %v1460_v19 = vmul.f32 %v1441_v53, %v5562_v30  ;;  %v1408_v51 = vmul.f32 %v1382_v0, %v5542_v28  ;;  %v1438_v20 = vstv %s8013_s27  ;;  %s8020_s27 = sld [smem:[#allocation80_spill]] }
 0x25c   : > { %v2958_v42 = vsel %vm2833_vm0, %v2957_v48, %v2956_v62  ;;  %v1469_v62 = vadd.f32 %v1453_v36, %v1405_v41  ;;  %v1407_v48 = vmul.f32 %v1378_v47, %v5552_v29  ;;  %v1520_v47 = vmul.f32 %v1499_v6, %v5626_v61  ;;  %s8031_s7 = sld [smem:[#allocation100_spill]] }
 0x25d   : > { %v6421_v52 = vsel %vm2868_vm7, %v2958_v42, %v2964_v39  ;;  %v1473_v12 = vadd.f32 %v1457_v25, %v1409_v34  ;;  %v7742_v39 = vstv %s8012_s5  ;;  %v1456_v42 = vmul.f32 %v1435_v35, %v5562_v30 }
 0x25e   : > { %v6423_v8 = vpop.permute.xlu2 %1569  ;;  %v1533_v55 = vadd.f32 %v1517_v63, %v1469_v62  ;;  %v1519_v25 = vmul.f32 %v1496_v60, %v5787_v11  ;;  %v1412_v35 = vmul.f32 %v1390_v40, %v5542_v28  ;;  %v1524_v36 = vmul.f32 %v7742_v39, %v5626_v61 }
 0x25f   : > { %v1598_v21 = vadd.f32 %v6423_v8, %v1534_v59  ;;  %v1537_v17 = vadd.f32 %v1521_v15, %v1473_v12  ;;  %v1444_v12 = vstv %s8014_s6  ;;  %v1471_v60 = vadd.f32 %v1455_v24, %v1407_v48  ;;  %s8021_s6 = sld [smem:[#allocation96_spill]] }
 0x260   : > { %v1472_v0 = vadd.f32 %v1456_v42, %v1408_v51  ;;  %v1386_v63 = vstv %s8015_s2  ;;  %v1508_v62 = vstv %s8017_s19  ;;  %v1458_v42 = vmul.f32 %v1438_v20, %v5562_v30  ;;  %s8022_s2 = sld [smem:[#allocation87_spill]] }
 0x261   : > { %v1614_v32 = vmax.f32 %v1598_v21, 0.0  ;;  %v1527_v48 = vmul.f32 %v1508_v62, %v5787_v11  ;;  %s8033_s19 = sld [smem:[#allocation105_spill]] }
 0x263   : > { %1632 = vadd.xlane.f32.xlu0 %v1614_v32  ;;  %v1532_v32 = vadd.f32 %v1516_v7, %v1468_v31  ;;  %v1476_v7 = vadd.f32 %v1460_v19, %v1412_v35  ;;  %v1463_v31 = vmul.f32 %v1444_v12, %v5576_v33 }
 0x26c   : > { %v1574_v59 = vpop.permute.xlu0 %1573 }
 0x26d   : > { %v1601_v21 = vadd.f32 %v1574_v59, %v1537_v17  ;;  %v1394_v17 = vstv %s8016_s17  ;;  %s8023_s17 = sld [smem:[#allocation79_spill]] }
 0x26e   : > { %v1566_v37 = vpop.permute.xlu1 %1565  ;;  %v1415_v39 = vmul.f32 %v1394_v17, %v5552_v29 }
 0x26f   : > { %v1596_v34 = vadd.f32 %v1566_v37, %v1532_v32  ;;  %v1597_v15 = vadd.f32 %v1566_v37, %v1533_v55  ;;  %v1617_v44 = vmax.f32 %v1601_v21, 0.0  ;;  %v1535_v32 = vadd.f32 %v1519_v25, %v1471_v60 }
 0x270   : > { %v1536_v21 = vadd.f32 %v1520_v47, %v1472_v0  ;;  %v1540_v55 = vadd.f32 %v1524_v36, %v1476_v7  ;;  %v1502_v37 = vstv %s8018_s0  ;;  %v7743_v25 = vstv %s8019_s11  ;;  %s8034_s0 = sld [smem:[#allocation97_spill]] }
 0x271   : > { %1638 = vadd.xlane.f32.xlu0 %v1617_v44  ;;  %v1613_v41 = vmax.f32 %v1597_v15, 0.0  ;;  %v1612_v6 = vmax.f32 %v1596_v34, 0.0  ;;  %v1599_v19 = vadd.f32 %v6423_v8, %v1535_v32  ;;  %v1459_v34 = vmul.f32 %v1438_v20, %v5576_v33  ;;  %v1586_v8 = vpop.permute.xlu2 %1585 }
 0x272   : > { %v1600_v51 = vadd.f32 %v1574_v59, %v1536_v21  ;;  %v1479_v47 = vadd.f32 %v1463_v31, %v1415_v39  ;;  %v1410_v15 = vmul.f32 %v1386_v63, %v5542_v28  ;;  %v1411_v44 = vmul.f32 %v1386_v63, %v5552_v29 }
 0x273   : > { %1630 = vadd.xlane.f32.xlu1 %v1613_v41  ;;  %1628 = vadd.xlane.f32.xlu2 %v1612_v6  ;;  %v1522_v36 = vmul.f32 %v1502_v37, %v5626_v61  ;;  %v1523_v60 = vmul.f32 %v1502_v37, %v5787_v11  ;;  %v1615_v20 = vmax.f32 %v1599_v19, 0.0  ;;  %v1402_v32 = vstv %s8020_s27  ;;  %s8036_s27 = sld [smem:[#allocation107_spill]] }
 0x274   : > { %v1582_v24 = vpop.permute.xlu0 %1581  ;;  %v1543_v41 = vadd.f32 %v1527_v48, %v1479_v47  ;;  %v1474_v59 = vadd.f32 %v1458_v42, %v1410_v15  ;;  %v1475_v6 = vadd.f32 %v1459_v34, %v1411_v44  ;;  %v1616_v7 = vmax.f32 %v1600_v51, 0.0 }
 0x275   : > { %v1604_v35 = vadd.f32 %v1582_v24, %v1540_v55  ;;  %v1514_v39 = vstv %s8021_s6  ;;  %v1466_v63 = vmul.f32 %v7743_v25, %v5562_v30  ;;  %v1462_v48 = vmul.f32 %v1444_v12, %v5562_v30  ;;  %s8027_s6 = sld [smem:[#allocation106_spill]] }
 0x276   : > { %v1578_v31 = vpop.permute.xlu1 %1577  ;;  %v1607_v21 = vadd.f32 %v1586_v8, %v1543_v41  ;;  %v1538_v55 = vadd.f32 %v1522_v36, %v1474_v59  ;;  %v1539_v37 = vadd.f32 %v1523_v60, %v1475_v6  ;;  %v1461_v42 = vmul.f32 %v1441_v53, %v5576_v33 }
 0x277   : > { %v1620_v0 = vmax.f32 %v1604_v35, 0.0  ;;  %v1418_v35 = vmul.f32 %v1402_v32, %v5542_v28  ;;  %v1530_v34 = vmul.f32 %v1514_v39, %v5626_v61  ;;  %v1414_v47 = vmul.f32 %v1394_v17, %v5542_v28 }
 0x278   : > { %v1602_v19 = vadd.f32 %v1578_v31, %v1538_v55  ;;  %v1603_v51 = vadd.f32 %v1578_v31, %v1539_v37  ;;  %v1526_v15 = vmul.f32 %v1508_v62, %v5626_v61  ;;  %v1413_v44 = vmul.f32 %v1390_v40, %v5552_v29 }
 0x279   : > { %1644 = vadd.xlane.f32.xlu0 %v1620_v0  ;;  %v8024_v12 = vstv %s8012_s5  ;;  %v1482_v60 = vadd.f32 %v1466_v63, %v1418_v35  ;;  %v1623_v53 = vmax.f32 %v1607_v21, 0.0  ;;  %v1478_v0 = vadd.f32 %v1462_v48, %v1414_v47  ;;  %s8032_s5 = sld [smem:[#allocation41_spill]] }
 0x27a   : > { %v1525_v36 = vmul.f32 %v8024_v12, %v5787_v11  ;;  %v1477_v59 = vadd.f32 %v1461_v42, %v1413_v44  ;;  %v1447_v31 = vstv %s8022_s2  ;;  %v1398_v17 = vstv %s8023_s17  ;;  %s8028_s2 = sld [smem:[#allocation98_spill]] }
 0x27b   : > { %1634 = vadd.xlane.f32.xlu2 %v1615_v20  ;;  %1636 = vadd.xlane.f32.xlu1 %v1616_v7  ;;  %v1546_v6 = vadd.f32 %v1530_v34, %v1482_v60  ;;  %v1618_v20 = vmax.f32 %v1602_v19, 0.0  ;;  %v1619_v7 = vmax.f32 %v1603_v51, 0.0  ;;  %v1542_v55 = vadd.f32 %v1526_v15, %v1478_v0  ;;  %s8029_s17 = sld [smem:[#allocation33_spill]] }
 0x27c   : > { %v1594_v41 = vpop.permute.xlu0 %1593  ;;  %v1541_v62 = vadd.f32 %v1525_v36, %v1477_v59  ;;  %v1511_v40 = vstv %s8025_s21  ;;  %v1464_v63 = vmul.f32 %v1447_v31, %v5562_v30  ;;  %v1465_v21 = vmul.f32 %v1447_v31, %v5576_v33  ;;  %s8030_s21 = sld [smem:[#allocation108_spill]] }
 0x27d   : > { %v1610_v37 = vadd.f32 %v1594_v41, %v1546_v6  ;;  %v1606_v25 = vadd.f32 %v1586_v8, %v1542_v55  ;;  %v1416_v48 = vmul.f32 %v1398_v17, %v5542_v28  ;;  %v1417_v42 = vmul.f32 %v1398_v17, %v5552_v29 }
 0x27e   : > { %v1605_v12 = vadd.f32 %v1582_v24, %v1541_v62  ;;  %v1528_v19 = vmul.f32 %v1511_v40, %v5626_v61  ;;  %v1529_v51 = vmul.f32 %v1511_v40, %v5787_v11  ;;  %v1590_v24 = vpop.permute.xlu1 %1589  ;;  %v8026_v60 = vstv %s8019_s11  ;;  %v4882_v40 = vld [vmem:[%s7955_s25 + $0x22] ss:$0 sm:$0xff]  ;;  %s8035_s11 = sld [smem:[#allocation25_spill]] }
 0x27f   : > { %v1626_v35 = vmax.f32 %v1610_v37, 0.0  ;;  %v1480_v34 = vadd.f32 %v1464_v63, %v1416_v48  ;;  %v1481_v47 = vadd.f32 %v1465_v21, %v1417_v42  ;;  %v1622_v15 = vmax.f32 %v1606_v25, 0.0  ;;  %v4878_v37 = vld [vmem:[%s7955_s25 + $0x21] ss:$0 sm:$0xff]  ;;  %v4884_v63 = vld [vmem:[%s7955_s25 + $0x25] ss:$0 sm:$0xff] }
 0x280   : > { %v1621_v8 = vmax.f32 %v1605_v12, 0.0  ;;  %v1419_v6 = vmul.f32 %v1402_v32, %v5552_v29  ;;  %v4879_v32 = vld [vmem:[%s7955_s25 + $0x23] ss:$0 sm:$0xff]  ;;  %v4883_v12 = vld [vmem:[%s7955_s25 + $0x24] ss:$0 sm:$0xff] }
 0x281   : > { %1650 = vadd.xlane.f32.xlu0 %v1623_v53  ;;  %v1544_v44 = vadd.f32 %v1528_v19, %v1480_v34  ;;  %v1545_v36 = vadd.f32 %v1529_v51, %v1481_v47  ;;  %v1467_v53 = vmul.f32 %v8026_v60, %v5576_v33  ;;  %v4885_v21 = vld [vmem:[%s7955_s25 + $0x27] ss:$0 sm:$0xff] }
 0x283   : > { %1640 = vadd.xlane.f32.xlu2 %v1618_v20  ;;  %1642 = vadd.xlane.f32.xlu1 %v1619_v7  ;;  %v1608_v0 = vadd.f32 %v1590_v24, %v1544_v44  ;;  %v1609_v59 = vadd.f32 %v1590_v24, %v1545_v36  ;;  %v1531_v20 = vmul.f32 %v1514_v39, %v5787_v11  ;;  %v4880_v39 = vld [vmem:[%s7955_s25 + $0x20] ss:$0 sm:$0xff] }
 0x284   : > { %v1483_v7 = vadd.f32 %v1467_v53, %v1419_v6 }
 0x285   : > { %v1625_v31 = vmax.f32 %v1609_v59, 0.0  ;;  %v1624_v17 = vmax.f32 %v1608_v0, 0.0 }
 0x286   : > { %v1547_v55 = vadd.f32 %v1531_v20, %v1483_v7 }
 0x288   : > { %v1611_v25 = vadd.f32 %v1594_v41, %v1547_v55  ;;  %v4881_v41 = vld [vmem:[%s7955_s25 + $0x26] ss:$0 sm:$0xff] }
 0x289   : > { %1656 = vadd.xlane.f32.xlu0 %v1626_v35 }
 0x28a   : > { %v1627_v62 = vmax.f32 %v1611_v25, 0.0 }
 0x28b   : > { %1648 = vadd.xlane.f32.xlu1 %v1622_v15  ;;  %1646 = vadd.xlane.f32.xlu2 %v1621_v8 }
 0x293   : > { %1654 = vadd.xlane.f32.xlu1 %v1625_v31  ;;  %1652 = vadd.xlane.f32.xlu2 %v1624_v17 }
 0x29b   : > { %1658 = vadd.xlane.f32.xlu2 %v1627_v62 }
 0x29d   : > { %1857 = vperm.xlu0 %4843, %v4878_v37  }
 0x2a5   : > { %1865 = vperm.xlu0 %4843, %v4879_v32  }
 0x2ac   : > { %1853 = vperm.xlu1 %4844, %v4880_v39  }
 0x2ad   : > { %1877 = vperm.xlu0 %4843, %v4881_v41  }
 0x2b3   : > { %1861 = vperm.xlu2 %4845, %v4882_v40  }
 0x2b4   : > { %1869 = vperm.xlu1 %4844, %v4883_v12  }
 0x2bb   : > { %1873 = vperm.xlu2 %4845, %v4884_v63  }
 0x2bc   : > { %1881 = vperm.xlu1 %4844, %v4885_v21  }
 0x2d6   : > { %v1633_v48 = vpop.xlane.xlu0 %1632 }
 0x2d7   : > { %v2986_v24 = vperm.slane %v1633_v48, %v6234_v27 }
 0x2e4   : > { %v1639_v34 = vpop.xlane.xlu0 %1638 }
 0x2e5   : > { %v2990_v44 = vperm.slane %v1639_v34, %v6237_v50 }
 0x2e6   : > { %v1629_v42 = vpop.xlane.xlu2 %1628  ;;  %v1631_v19 = vpop.xlane.xlu1 %1630 }
 0x2e7   : > { %v2983_v51 = vperm.slane %v1629_v42, %v6234_v27  ;;  %v2984_v35 = vperm.slane %v1631_v19, %v6237_v50 }
 0x2e9   : > { %v2985_v47 = vsel %vm2833_vm0, %v2984_v35, %v2983_v51  ;;  %v1720_v51 = vstv %s8027_s6  ;;  %s8037_s6 = sld [smem:[#allocation99_spill]] }
 0x2ec   : > { %v1645_v59 = vpop.xlane.xlu0 %1644 }
 0x2ed   : > { %v2995_v41 = vperm.slane %v1645_v59, %v6234_v27 }
 0x2ee   : > { %v1635_v15 = vpop.xlane.xlu2 %1634  ;;  %v1637_v8 = vpop.xlane.xlu1 %1636 }
 0x2ef   : > { %v2987_v36 = vperm.slane %v1635_v15, %v6237_v50  ;;  %v2989_v60 = vperm.slane %v1637_v8, %v6234_v27  ;;  %v1784_v15 = vstv %s8029_s17  ;;  %s8039_s17 = sld [smem:[#allocation109_spill]] }
 0x2f0   : > { %v1806_v59 = vmul.f32 %v1784_v15, %v5626_v61 }
 0x2f1   : > { %v2988_v53 = vsel %vm2833_vm0, %v2987_v36, %v2986_v24  ;;  %v2991_v0 = vsel %vm2833_vm0, %v2990_v44, %v2989_v60  ;;  %v1742_v36 = vmul.f32 %v1720_v51, %v5562_v30 }
 0x2f2   : > { %v3007_v6 = vsel %vm2856_vm1, %v2988_v53, %v2985_v47  ;;  %v1666_v47 = vstv %s8028_s2  ;;  %s8038_s2 = sld [smem:[#allocation34_spill]] }
 0x2f3   : > { %v3008_v20 = vsel %vm2858_vm2, %v2991_v0, %v3007_v6  ;;  %v1694_v0 = vmul.f32 %v1666_v47, %v5542_v28 }
 0x2f4   : > { %v1651_v37 = vpop.xlane.xlu0 %1650 }
 0x2f5   : > { %v2999_v40 = vperm.slane %v1651_v37, %v6237_v50  ;;  %v1758_v6 = vadd.f32 %v1742_v36, %v1694_v0  ;;  %v1723_v36 = vstv %s8036_s27  ;;  %s8043_s27 = sld [smem:[#allocation103_spill]] }
 0x2f6   : > { %v1641_v7 = vpop.xlane.xlu2 %1640  ;;  %v1643_v31 = vpop.xlane.xlu1 %1642 }
 0x2f7   : > { %v2992_v17 = vperm.slane %v1641_v7, %v6234_v27  ;;  %v2993_v55 = vperm.slane %v1643_v31, %v6237_v50  ;;  %v1822_v31 = vadd.f32 %v1806_v59, %v1758_v6 }
 0x2f9   : > { %v2994_v25 = vsel %vm2833_vm0, %v2993_v55, %v2992_v17  ;;  %v1674_v17 = vstv %s8031_s7  ;;  %v7744_v55 = vstv %s8032_s5  ;;  %s8050_s7 = sld [smem:[#allocation104_spill]] }
 0x2fa   : > { %v3009_v62 = vsel %vm2860_vm3, %v2994_v25, %v3008_v20  ;;  %v1726_v20 = vstv %s8030_s21  ;;  %s8048_s21 = sld [smem:[#allocation22_spill]] }
 0x2fc   : > { %v1657_v8 = vpop.xlane.xlu0 %1656 }
 0x2fd   : > { %v3004_v25 = vperm.slane %v1657_v8, %v6234_v27 }
 0x2fe   : > { %v1649_v32 = vpop.xlane.xlu1 %1648  ;;  %v1647_v39 = vpop.xlane.xlu2 %1646 }
 0x2ff   : > { %v2998_v12 = vperm.slane %v1649_v32, %v6234_v27  ;;  %v2996_v63 = vperm.slane %v1647_v39, %v6237_v50  ;;  %v1746_v39 = vmul.f32 %v1726_v20, %v5562_v30 }
 0x301   : > { %v3000_v21 = vsel %vm2833_vm0, %v2999_v40, %v2998_v12  ;;  %v2997_v48 = vsel %vm2833_vm0, %v2996_v63, %v2995_v41  ;;  %v1698_v63 = vmul.f32 %v1674_v17, %v5542_v28 }
 0x302   : > { %v3010_v42 = vsel %vm2862_vm4, %v2997_v48, %v3009_v62  ;;  %v1717_v48 = vstv %s8033_s19  ;;  %s8040_s19 = sld [smem:[#allocation101_spill]] }
 0x303   : > { %v3011_v19 = vsel %vm2864_vm5, %v3000_v21, %v3010_v42  ;;  %v1810_v21 = vmul.f32 %v7744_v55, %v5626_v61  ;;  %v1762_v42 = vadd.f32 %v1746_v39, %v1698_v63  ;;  %v1743_v39 = vmul.f32 %v1720_v51, %v5576_v33 }
 0x306   : > { %v1655_v35 = vpop.xlane.xlu1 %1654  ;;  %v1653_v34 = vpop.xlane.xlu2 %1652 }
 0x307   : > { %v3002_v24 = vperm.slane %v1655_v35, %v6237_v50  ;;  %v3001_v44 = vperm.slane %v1653_v34, %v6234_v27  ;;  %v1781_v35 = vstv %s8035_s11  ;;  %v1826_v34 = vadd.f32 %v1810_v21, %v1762_v42  ;;  %s8042_s11 = sld [smem:[#allocation18_spill]] }
 0x308   : > { %v1804_v59 = vmul.f32 %v1781_v35, %v5626_v61  ;;  %v1805_v6 = vmul.f32 %v1781_v35, %v5787_v11  ;;  %v1729_v21 = vstv %s8039_s17  ;;  %s8047_s17 = sld [smem:[#allocation102_spill]] }
 0x309   : > { %v3003_v60 = vsel %vm2833_vm0, %v3002_v24, %v3001_v44  ;;  %v1740_v24 = vmul.f32 %v1717_v48, %v5562_v30  ;;  %v1741_v44 = vmul.f32 %v1717_v48, %v5576_v33  ;;  %v1695_v48 = vmul.f32 %v1666_v47, %v5552_v29 }
 0x30a   : > { %v3012_v53 = vsel %vm2866_vm6, %v3003_v60, %v3011_v19  ;;  %v1662_v19 = vstv %s8034_s0  ;;  %s8041_s0 = sld [smem:[#allocation28_spill]]  ;;  %v1749_v51 = vmul.f32 %v1729_v21, %v5576_v33 }
 0x30b   : > { %v1693_v0 = vmul.f32 %v1662_v19, %v5552_v29 }
 0x30e   : > { %v1659_v7 = vpop.xlane.xlu2 %1658 }
 0x30f   : > { %v3005_v62 = vperm.slane %v1659_v7, %v6237_v50  ;;  %v1858_v37 = vpop.permute.xlu0 %1857 }
 0x310   : > { %v1886_v32 = vadd.f32 %v1858_v37, %v1822_v31  ;;  %v1670_v31 = vstv %s8037_s6  ;;  %s8044_s6 = sld [smem:[#allocation29_spill]] }
 0x311   : > { %v3006_v41 = vsel %vm2833_vm0, %v3005_v62, %v3004_v25  ;;  %v1787_v25 = vstv %s8038_s2  ;;  %v1696_v42 = vmul.f32 %v1670_v31, %v5542_v28  ;;  %s8045_s2 = sld [smem:[#allocation110_spill]] }
 0x312   : > { %v6576_v40 = vsel %vm2868_vm7, %v3006_v41, %v3012_v53  ;;  %v1902_v12 = vmax.f32 %v1886_v32, 0.0  ;;  %v1692_v53 = vmul.f32 %v1662_v19, %v5542_v28  ;;  %v1757_v32 = vadd.f32 %v1741_v44, %v1693_v0 }
 0x313   : > { %v1744_v41 = vmul.f32 %v1723_v36, %v5562_v30  ;;  %v1808_v19 = vmul.f32 %v1787_v25, %v5626_v61  ;;  %v1759_v0 = vadd.f32 %v1743_v39, %v1695_v48  ;;  %v7746_v39 = vstv %s8043_s27 }
 0x314   : > { %1920 = vadd.xlane.f32.xlu1 %v1902_v12  ;;  %v1756_v62 = vadd.f32 %v1740_v24, %v1692_v53  ;;  %v1821_v63 = vadd.f32 %v1805_v6, %v1757_v32  ;;  %v1793_v53 = vstv %s8041_s0  ;;  %v1745_v48 = vmul.f32 %v1723_v36, %v5576_v33  ;;  %s8075_s0 = sld [smem:[#allocation26_spill]] }
 0x315   : > { %v8046_v36 = vstv %s8032_s5  ;;  %s8051_s5 = sld [smem:[#allocation45_spill]] }
 0x316   : > { %v1820_v12 = vadd.f32 %v1804_v59, %v1756_v62  ;;  %v1760_v59 = vadd.f32 %v1744_v41, %v1696_v42  ;;  %v1813_v62 = vmul.f32 %v1793_v53, %v5787_v11  ;;  %v1862_v32 = vpop.permute.xlu2 %1861  ;;  %v7747_v41 = vstv %s8044_s6 }
 0x317   : > { %v6587_v8 = vpop.permute.xlu0 %1865 }
 0x318   : > { %v1890_v60 = vadd.f32 %v6587_v8, %v1826_v34  ;;  %v1807_v34 = vmul.f32 %v1784_v15, %v5787_v11  ;;  %v7745_v15 = vstv %s8042_s11 }
 0x31a   : > { %v1906_v7 = vmax.f32 %v1890_v60, 0.0  ;;  %v1678_v60 = vstv %s8040_s19  ;;  %s8049_s19 = sld [smem:[#allocation44_spill]] }
 0x31c   : > { %1928 = vadd.xlane.f32.xlu1 %v1906_v7  ;;  %v1701_v7 = vmul.f32 %v1678_v60, %v5552_v29 }
 0x31e   : > { %v1854_v35 = vpop.permute.xlu1 %1853 }
 0x31f   : > { %v1884_v24 = vadd.f32 %v1854_v35, %v1820_v12  ;;  %v1885_v44 = vadd.f32 %v1854_v35, %v1821_v63  ;;  %v1823_v12 = vadd.f32 %v1807_v34, %v1759_v0  ;;  %v1824_v63 = vadd.f32 %v1808_v19, %v1760_v59 }
 0x320   : > { %v1765_v35 = vadd.f32 %v1749_v51, %v1701_v7  ;;  %v1697_v34 = vmul.f32 %v1670_v31, %v5552_v29  ;;  %v1752_v19 = vmul.f32 %v7745_v15, %v5562_v30  ;;  %v1809_v51 = vmul.f32 %v1787_v25, %v5787_v11 }
 0x321   : > { %v1900_v6 = vmax.f32 %v1884_v24, 0.0  ;;  %v1901_v47 = vmax.f32 %v1885_v44, 0.0  ;;  %v1887_v42 = vadd.f32 %v1858_v37, %v1823_v12  ;;  %v1888_v24 = vadd.f32 %v1862_v32, %v1824_v63 }
 0x322   : > { %v1747_v44 = vmul.f32 %v1726_v20, %v5576_v33  ;;  %v1829_v55 = vadd.f32 %v1813_v62, %v1765_v35  ;;  %v1699_v59 = vmul.f32 %v1674_v17, %v5552_v29  ;;  %v1811_v37 = vmul.f32 %v8046_v36, %v5787_v11 }
 0x323   : > { %1916 = vadd.xlane.f32.xlu2 %v1900_v6  ;;  %1918 = vadd.xlane.f32.xlu0 %v1901_v47  ;;  %v1761_v20 = vadd.f32 %v1745_v48, %v1697_v34  ;;  %v1704_v31 = vmul.f32 %v7746_v39, %v5542_v28  ;;  %v1816_v47 = vmul.f32 %v7747_v41, %v5626_v61  ;;  %v1904_v62 = vmax.f32 %v1888_v24, 0.0 }
 0x324   : > { %v1763_v7 = vadd.f32 %v1747_v44, %v1699_v59  ;;  %v1903_v25 = vmax.f32 %v1887_v42, 0.0  ;;  %v1732_v63 = vstv %s8045_s2  ;;  %v1682_v48 = vstv %s8047_s17  ;;  %s8079_s2 = sld [smem:[#allocation113_spill]] }
 0x325   : > { %v1768_v17 = vadd.f32 %v1752_v19, %v1704_v31  ;;  %v1825_v35 = vadd.f32 %v1809_v51, %v1761_v20  ;;  %v1738_v34 = vstv %s8048_s21  ;;  %v1796_v15 = vstv %s8049_s19  ;;  %s8080_s17 = sld [smem:[#allocation124_spill]] }
 0x326   : > { %v1870_v0 = vpop.permute.xlu1 %1869  ;;  %v1827_v36 = vadd.f32 %v1811_v37, %v1763_v7  ;;  %v1750_v42 = vmul.f32 %v1732_v63, %v5562_v30  ;;  %v1748_v24 = vmul.f32 %v1729_v21, %v5562_v30  ;;  %v1690_v59 = vstv %s8050_s7  ;;  %s8056_s7 = sld [smem:[#allocation39_spill]] }
 0x327   : > { %v1893_v6 = vadd.f32 %v1870_v0, %v1829_v55  ;;  %v1878_v55 = vpop.permute.xlu0 %1877  ;;  %v1832_v39 = vadd.f32 %v1816_v47, %v1768_v17  ;;  %v1889_v49 = vadd.f32 %v1862_v32, %v1825_v35  ;;  %v1802_v19 = vstv %s8051_s5  ;;  %s8074_s5 = sld [smem:[#allocation27_spill]] }
 0x328   : > { %v1891_v44 = vadd.f32 %v6587_v8, %v1827_v36  ;;  %v1755_v51 = vmul.f32 %v1738_v34, %v5576_v33  ;;  %v1702_v37 = vmul.f32 %v1682_v48, %v5542_v28  ;;  %v1814_v20 = vmul.f32 %v1796_v15, %v5626_v61  ;;  %s8081_s21 = sld [smem:[#allocation118_spill]] }
 0x329   : > { %v1909_v12 = vmax.f32 %v1893_v6, 0.0  ;;  %v1896_v6 = vadd.f32 %v1878_v55, %v1832_v39  ;;  %v1700_v31 = vmul.f32 %v1678_v60, %v5542_v28  ;;  %v1812_v47 = vmul.f32 %v1793_v53, %v5626_v61  ;;  %v1874_v39 = vpop.permute.xlu2 %1873 }
 0x32a   : > { %v1707_v32 = vmul.f32 %v1690_v59, %v5552_v29  ;;  %v1819_v8 = vmul.f32 %v1802_v19, %v5787_v11  ;;  %v1766_v7 = vadd.f32 %v1750_v42, %v1702_v37  ;;  %v1751_v53 = vmul.f32 %v1732_v63, %v5576_v33 }
 0x32b   : > { %1924 = vadd.xlane.f32.xlu0 %v1904_v62  ;;  %1922 = vadd.xlane.f32.xlu2 %v1903_v25  ;;  %v1764_v21 = vadd.f32 %v1748_v24, %v1700_v31  ;;  %v1905_v62 = vmax.f32 %v1889_v49, 0.0  ;;  %v1907_v25 = vmax.f32 %v1891_v44, 0.0  ;;  %v1912_v17 = vmax.f32 %v1896_v6, 0.0 }
 0x32c   : > { %1934 = vadd.xlane.f32.xlu1 %v1909_v12  ;;  %v1771_v12 = vadd.f32 %v1755_v51, %v1707_v32  ;;  %v1830_v35 = vadd.f32 %v1814_v20, %v1766_v7  ;;  %v8052_v42 = vstv %s8042_s11  ;;  %v1703_v51 = vmul.f32 %v1682_v48, %v5552_v29  ;;  %s8076_s11 = sld [smem:[#allocation112_spill]] }
 0x32d   : > { %v1828_v36 = vadd.f32 %v1812_v47, %v1764_v21  ;;  %v1753_v24 = vmul.f32 %v8052_v42, %v5576_v33  ;;  %v1815_v6 = vmul.f32 %v1796_v15, %v5787_v11  ;;  %v8053_v37 = vstv %s8043_s27  ;;  %s8077_s27 = sld [smem:[#allocation43_spill]] }
 0x32e   : > { %v1882_v41 = vpop.permute.xlu1 %1881  ;;  %v1835_v60 = vadd.f32 %v1819_v8, %v1771_v12  ;;  %v1894_v23 = vadd.f32 %v1874_v39, %v1830_v35  ;;  %v1705_v20 = vmul.f32 %v8053_v37, %v5552_v29  ;;  %v8054_v31 = vstv %s8044_s6  ;;  %v4897_v37 = vld [vmem:[%s7955_s25 + $0x3b] ss:$0 sm:$0xff]  ;;  %s8078_s6 = sld [smem:[#allocation42_spill]] }
 0x32f   : > { %v1892_v49 = vadd.f32 %v1870_v0, %v1828_v36  ;;  %v1817_v47 = vmul.f32 %v8054_v31, %v5787_v11  ;;  %v1767_v32 = vadd.f32 %v1751_v53, %v1703_v51  ;;  %v1754_v15 = vmul.f32 %v1738_v34, %v5562_v30  ;;  %v4888_v34 = vld [vmem:[%s7955_s25 + $0x2e] ss:$0 sm:$0xff]  ;;  %v4895_v51 = vld [vmem:[%s7955_s25 + $0x30] ss:$0 sm:$0xff]  ;;  %v4899_v31 = vld [vmem:[%s7955_s25 + $0x38] ss:$0 sm:$0xff] }
 0x330   : > { %v1899_v44 = vadd.f32 %v1882_v41, %v1835_v60  ;;  %v1769_v8 = vadd.f32 %v1753_v24, %v1705_v20  ;;  %v1910_v63 = vmax.f32 %v1894_v23, 0.0  ;;  %v1706_v12 = vmul.f32 %v1690_v59, %v5542_v28  ;;  %v4890_v59 = vld [vmem:[%s7955_s25 + $0x29] ss:$0 sm:$0xff]  ;;  %v4892_v24 = vld [vmem:[%s7955_s25 + $0x2d] ss:$0 sm:$0xff] }
 0x331   : > { %v1908_v7 = vmax.f32 %v1892_v49, 0.0  ;;  %v4893_v49 = vld [vmem:[%s7955_s25 + $0x2c] ss:$0 sm:$0xff]  ;;  %v4898_v20 = vld [vmem:[%s7955_s25 + $0x39] ss:$0 sm:$0xff] }
 0x332   : > { %v1915_v21 = vmax.f32 %v1899_v44, 0.0  ;;  %v1770_v35 = vadd.f32 %v1754_v15, %v1706_v12  ;;  %v4894_v44 = vld [vmem:[%s7955_s25 + $0x32] ss:$0 sm:$0xff] }
 0x333   : > { %1926 = vadd.xlane.f32.xlu2 %v1905_v62  ;;  %1930 = vadd.xlane.f32.xlu0 %v1907_v25  ;;  %v1831_v62 = vadd.f32 %v1815_v6, %v1767_v32  ;;  %v1833_v25 = vadd.f32 %v1817_v47, %v1769_v8  ;;  %v4896_v6 = vld [vmem:[%s7955_s25 + $0x2f] ss:$0 sm:$0xff]  ;;  %v4900_v47 = vld [vmem:[%s7955_s25 + $0x35] ss:$0 sm:$0xff]  ;;  %v4901_v32 = vld [vmem:[%s7955_s25 + $0x33] ss:$0 sm:$0xff] }
 0x334   : > { %1940 = vadd.xlane.f32.xlu1 %v1912_v17  ;;  %v1818_v17 = vmul.f32 %v1802_v19, %v5626_v61  ;;  %v4891_v19 = vld [vmem:[%s7955_s25 + $0x31] ss:$0 sm:$0xff]  ;;  %v4902_v8 = vld [vmem:[%s7955_s25 + $0x3a] ss:$0 sm:$0xff] }
 0x335   : > { %v1895_v0 = vadd.f32 %v1874_v39, %v1831_v62  ;;  %v1897_v48 = vadd.f32 %v1878_v55, %v1833_v25  ;;  %v4886_v39 = vld [vmem:[%s7955_s25 + $0x2a] ss:$0 sm:$0xff]  ;;  %v4887_v55 = vld [vmem:[%s7955_s25 + $0x28] ss:$0 sm:$0xff]  ;;  %v4906_v62 = vld [vmem:[%s7955_s25 + $0x36] ss:$0 sm:$0xff] }
 0x336   : > { %v1834_v53 = vadd.f32 %v1818_v17, %v1770_v35  ;;  %v4907_v25 = vld [vmem:[%s7955_s25 + $0x3d] ss:$0 sm:$0xff] }
 0x337   : > { %v1911_v36 = vmax.f32 %v1895_v0, 0.0  ;;  %v1913_v60 = vmax.f32 %v1897_v48, 0.0  ;;  %v4908_v0 = vld [vmem:[%s7955_s25 + $0x3f] ss:$0 sm:$0xff] }
 0x338   : > { %v1898_v23 = vadd.f32 %v1882_v41, %v1834_v53  ;;  %v4889_v41 = vld [vmem:[%s7955_s25 + $0x2b] ss:$0 sm:$0xff] }
 0x33a   : > { %v1914_v42 = vmax.f32 %v1898_v23, 0.0 }
 0x33b   : > { %1932 = vadd.xlane.f32.xlu2 %v1908_v7  ;;  %1936 = vadd.xlane.f32.xlu0 %v1910_v63  ;;  %v4903_v7 = vld [vmem:[%s7955_s25 + $0x3e] ss:$0 sm:$0xff]  ;;  %v4904_v63 = vld [vmem:[%s7955_s25 + $0x3c] ss:$0 sm:$0xff] }
 0x33c   : > { %1946 = vadd.xlane.f32.xlu1 %v1915_v21  ;;  %v4905_v21 = vld [vmem:[%s7955_s25 + $0x34] ss:$0 sm:$0xff] }
 0x343   : > { %1938 = vadd.xlane.f32.xlu2 %v1911_v36  ;;  %1942 = vadd.xlane.f32.xlu0 %v1913_v60  ;;  %v4909_v36 = vld [vmem:[%s7955_s25 + $0x37] ss:$0 sm:$0xff]  ;;  %s8055_s25 = sld [smem:[#allocation31_spill]] }
 0x34b   : > { %1944 = vadd.xlane.f32.xlu2 %v1914_v42 }
 0x355   : > { %2149 = vperm.xlu1 %4844, %v4886_v39  }
 0x357   : > { %2141 = vperm.xlu0 %4843, %v4887_v55  }
 0x35d   : > { %2165 = vperm.xlu1 %4844, %v4888_v34  }
 0x35f   : > { %2153 = vperm.xlu0 %4843, %v4889_v41  }
 0x363   : > { %2145 = vperm.xlu2 %4845, %v4890_v59  }
 0x365   : > { %2433 = vperm.xlu1 %4844, %v4891_v19  }
 0x367   : > { %2161 = vperm.xlu0 %4843, %v4892_v24  }
 0x36b   : > { %2157 = vperm.xlu2 %4845, %v4893_v49  }
 0x36d   : > { %2437 = vperm.xlu1 %4844, %v4894_v44  }
 0x36f   : > { %2429 = vperm.xlu0 %4843, %v4895_v51  }
 0x373   : > { %2169 = vperm.xlu2 %4845, %v4896_v6  }
 0x375   : > { %2729 = vperm.xlu1 %4844, %v4897_v37  }
 0x377   : > { %2721 = vperm.xlu0 %4843, %v4898_v20  }
 0x37b   : > { %2717 = vperm.xlu2 %4845, %v4899_v31  }
 0x37d   : > { %2449 = vperm.xlu1 %4844, %v4900_v47  }
 0x37f   : > { %2441 = vperm.xlu0 %4843, %v4901_v32  }
 0x383   : > { %2725 = vperm.xlu2 %4845, %v4902_v8  }
 0x385   : > { %2741 = vperm.xlu1 %4844, %v4903_v7  }
 0x387   : > { %2733 = vperm.xlu0 %4843, %v4904_v63   ;;  %v1921_v48 = vpop.xlane.xlu1 %1920 }
 0x388   : > { %v3034_v42 = vperm.slane %v1921_v48, %v6234_v27 }
 0x38b   : > { %2445 = vperm.xlu2 %4845, %v4905_v21  }
 0x38f   : > { %2453 = vperm.xlu0 %4843, %v4906_v62   ;;  %v1929_v55 = vpop.xlane.xlu1 %1928 }
 0x390   : > { %v3040_v24 = vperm.slane %v1929_v55, %v6234_v27 }
 0x393   : > { %2737 = vperm.xlu2 %4845, %v4907_v25  }
 0x396   : > { %v1917_v15 = vpop.xlane.xlu2 %1916  ;;  %v1919_v12 = vpop.xlane.xlu0 %1918 }
 0x397   : > { %v3031_v17 = vperm.slane %v1917_v15, %v6234_v27  ;;  %v3032_v35 = vperm.slane %v1919_v12, %v6237_v50  ;;  %2745 = vperm.xlu0 %4843, %v4908_v0  }
 0x399   : > { %v3033_v60 = vsel %vm2833_vm0, %v3032_v35, %v3031_v17 }
 0x39b   : > { %2457 = vperm.xlu2 %4845, %v4909_v36  }
 0x39e   : > { %v1923_v53 = vpop.xlane.xlu2 %1922  ;;  %v1925_v23 = vpop.xlane.xlu0 %1924 }
 0x39f   : > { %v3035_v39 = vperm.slane %v1923_v53, %v6237_v50  ;;  %v3037_v49 = vperm.slane %v1925_v23, %v6234_v27  ;;  %v1935_v6 = vpop.xlane.xlu1 %1934  ;;  %v3208_v53 = vpack.c.bf16 %v6576_v40, %v6421_v52 }
 0x3a0   : > { %v3044_v7 = vperm.slane %v1935_v6, %v6237_v50  ;;  %v2069_v6 = vstv %s5976_s16  ;;  %s8067_s16 = sld [smem:[#allocation122_spill]] }
 0x3a1   : > { %v3036_v34 = vsel %vm2833_vm0, %v3035_v39, %v3034_v42  ;;  %v2008_v39 = vstv %s5917_s18  ;;  %s8061_s18 = sld [smem:[#allocation48_spill]] }
 0x3a2   : > { %v3055_v41 = vsel %vm2856_vm1, %v3036_v34, %v3033_v60  ;;  %v1954_v34 = vstv %s5827_s29  ;;  %s8057_s29 = sld [smem:[#allocation40_spill]] }
 0x3a6   : > { %v1927_v59 = vpop.xlane.xlu2 %1926  ;;  %v1931_v19 = vpop.xlane.xlu0 %1930 }
 0x3a7   : > { %v3038_v44 = vperm.slane %v1927_v59, %v6237_v50  ;;  %v3041_v51 = vperm.slane %v1931_v19, %v6237_v50  ;;  %v1941_v62 = vpop.xlane.xlu1 %1940  ;;  %v2005_v19 = vstv %s5900_s10  ;;  %s8060_s10 = sld [smem:[#allocation47_spill]] }
 0x3a8   : > { %v3049_v15 = vperm.slane %v1941_v62, %v6234_v27 }
 0x3a9   : > { %v3039_v37 = vsel %vm2833_vm0, %v3038_v44, %v3037_v49  ;;  %v3042_v20 = vsel %vm2833_vm0, %v3041_v51, %v3040_v24  ;;  %v2030_v44 = vmul.f32 %v2008_v39, %v5562_v30  ;;  %v1950_v51 = vstv %s8055_s25  ;;  %s8082_s25 = sld [smem:[#allocation125_spill]] }
 0x3aa   : > { %v3056_v31 = vsel %vm2858_vm2, %v3039_v37, %v3055_v41  ;;  %v2072_v41 = vstv %s5993_s20  ;;  %v1981_v62 = vmul.f32 %v1950_v51, %v5552_v29  ;;  %s8068_s20 = sld [smem:[#allocation116_spill]] }
 0x3ab   : > { %v3057_v47 = vsel %vm2860_vm3, %v3042_v20, %v3056_v31  ;;  %v1982_v20 = vmul.f32 %v1954_v34, %v5542_v28  ;;  %v2094_v31 = vmul.f32 %v2072_v41, %v5626_v61 }
 0x3ae   : > { %v1933_v32 = vpop.xlane.xlu2 %1932  ;;  %v1937_v8 = vpop.xlane.xlu0 %1936 }
 0x3af   : > { %v3043_v63 = vperm.slane %v1933_v32, %v6234_v27  ;;  %v3046_v12 = vperm.slane %v1937_v8, %v6234_v27  ;;  %v1947_v55 = vpop.xlane.xlu1 %1946  ;;  %v2028_v32 = vmul.f32 %v2005_v19, %v5562_v30  ;;  %v2029_v8 = vmul.f32 %v2005_v19, %v5576_v33 }
 0x3b0   : > { %v3053_v24 = vperm.slane %v1947_v55, %v6237_v50  ;;  %v2031_v19 = vmul.f32 %v2008_v39, %v5576_v33 }
 0x3b1   : > { %v3045_v21 = vsel %vm2833_vm0, %v3044_v7, %v3043_v63  ;;  %v2011_v7 = vstv %s5919_s8  ;;  %v2046_v63 = vadd.f32 %v2030_v44, %v1982_v20  ;;  %s8062_s8 = sld [smem:[#allocation23_spill]] }
 0x3b2   : > { %v3058_v25 = vsel %vm2862_vm4, %v3045_v21, %v3057_v47  ;;  %v1980_v21 = vmul.f32 %v1950_v51, %v5542_v28  ;;  %v1983_v51 = vmul.f32 %v1954_v34, %v5552_v29 }
 0x3b4   : > { %v2047_v34 = vadd.f32 %v2031_v19, %v1983_v51 }
 0x3b6   : > { %v1939_v0 = vpop.xlane.xlu2 %1938  ;;  %v1943_v48 = vpop.xlane.xlu0 %1942 }
 0x3b7   : > { %v3047_v17 = vperm.slane %v1939_v0, %v6237_v50  ;;  %v3050_v35 = vperm.slane %v1943_v48, %v6237_v50  ;;  %v2093_v0 = vmul.f32 %v2069_v6, %v5787_v11  ;;  %v2110_v48 = vadd.f32 %v2094_v31, %v2046_v63 }
 0x3b9   : > { %v3048_v36 = vsel %vm2833_vm0, %v3047_v17, %v3046_v12  ;;  %v3051_v60 = vsel %vm2833_vm0, %v3050_v35, %v3049_v15  ;;  %v2033_v15 = vmul.f32 %v2011_v7, %v5576_v33  ;;  %v1958_v12 = vstv %s8056_s7  ;;  %s8083_s7 = sld [smem:[#allocation119_spill]] }
 0x3ba   : > { %v3059_v23 = vsel %vm2864_vm5, %v3048_v36, %v3058_v25  ;;  %v2092_v25 = vmul.f32 %v2069_v6, %v5626_v61  ;;  %v2075_v17 = vstv %s5995_s4  ;;  %v2044_v36 = vadd.f32 %v2028_v32, %v1980_v21 }
 0x3bb   : > { %v3060_v42 = vsel %vm2866_vm6, %v3051_v60, %v3059_v23  ;;  %v2045_v60 = vadd.f32 %v2029_v8, %v1981_v62  ;;  %v2017_v23 = vstv %s5938_s14  ;;  %v1985_v55 = vmul.f32 %v1958_v12, %v5552_v29  ;;  %s8064_s14 = sld [smem:[#allocation37_spill]] }
 0x3bc   : > { %v2095_v32 = vmul.f32 %v2072_v41, %v5787_v11  ;;  %v2096_v8 = vmul.f32 %v2075_v17, %v5626_v61  ;;  %v2081_v62 = vstv %s6012_s15  ;;  %v2036_v41 = vmul.f32 %v2017_v23, %v5562_v30  ;;  %s8070_s15 = sld [smem:[#allocation117_spill]] }
 0x3bd   : > { %v2109_v44 = vadd.f32 %v2093_v0, %v2045_v60  ;;  %v2049_v20 = vadd.f32 %v2033_v15, %v1985_v55  ;;  %v2014_v15 = vstv %s5921_s9  ;;  %v2078_v55 = vstv %s5997_s12  ;;  %s6852_s9 = spop %4772  ;;  %s8069_s12 = sld [smem:[#allocation123_spill]] }
 0x3be   : > { %v1945_v59 = vpop.xlane.xlu2 %1944  ;;  %v2111_v60 = vadd.f32 %v2095_v32, %v2047_v34  ;;  %v2035_v51 = vmul.f32 %v2014_v15, %v5576_v33  ;;  %s4775_s4 = spop %4774 }
 0x3bf   : > { %v3052_v49 = vperm.slane %v1945_v59, %v6234_v27  ;;  %v2097_v59 = vmul.f32 %v2075_v17, %v5787_v11 }
 0x3c1   : > { %v3054_v37 = vsel %vm2833_vm0, %v3053_v24, %v3052_v49  ;;  %v2032_v24 = vmul.f32 %v2011_v7, %v5562_v30  ;;  %v2108_v49 = vadd.f32 %v2092_v25, %v2044_v36  ;;  %v1966_v7 = vstv %s5858_s1  ;;  %s8058_s1 = sld [smem:[#allocation24_spill]] }
 0x3c2   : > { %v6780_v47 = vsel %vm2868_vm7, %v3054_v37, %v3060_v42  ;;  %v1984_v37 = vmul.f32 %v1958_v12, %v5542_v28  ;;  %v2113_v25 = vadd.f32 %v2097_v59, %v2049_v20  ;;  %v2100_v59 = vmul.f32 %v2081_v62, %v5626_v61 }
 0x3c4   : > { %v2048_v0 = vadd.f32 %v2032_v24, %v1984_v37 }
 0x3c6   : > { %v2146_v35 = vpop.permute.xlu2 %2145  ;;  %v2112_v17 = vadd.f32 %v2096_v8, %v2048_v0 }
 0x3c7   : > { %v2174_v42 = vadd.f32 %v2146_v35, %v2110_v48  ;;  %v2150_v63 = vpop.permute.xlu1 %2149  ;;  %v2175_v19 = vadd.f32 %v2146_v35, %v2111_v60  ;;  %v2020_v35 = vstv %s5955_s26  ;;  %s8065_s26 = sld [smem:[#allocation21_spill]] }
 0x3c8   : > { %v2177_v36 = vadd.f32 %v2150_v63, %v2113_v25  ;;  %v2176_v24 = vadd.f32 %v2150_v63, %v2112_v17 }
 0x3c9   : > { %v2190_v6 = vmax.f32 %v2174_v42, 0.0  ;;  %v2142_v31 = vpop.permute.xlu0 %2141  ;;  %v1962_v42 = vstv %s8057_s29 }
 0x3ca   : > { %v2172_v21 = vadd.f32 %v2142_v31, %v2108_v49  ;;  %v2173_v39 = vadd.f32 %v2142_v31, %v2109_v44  ;;  %v1988_v49 = vmul.f32 %v1966_v7, %v5542_v28  ;;  %v2034_v44 = vmul.f32 %v2014_v15, %v5562_v30 }
 0x3cb   : > { %2208 = vadd.xlane.f32.xlu0 %v2190_v6  ;;  %v2193_v6 = vmax.f32 %v2177_v36, 0.0  ;;  %v1986_v32 = vmul.f32 %v1962_v42, %v5542_v28  ;;  %v1987_v8 = vmul.f32 %v1962_v42, %v5552_v29  ;;  %v2192_v25 = vmax.f32 %v2176_v24, 0.0 }
 0x3cc   : > { %v2189_v48 = vmax.f32 %v2173_v39, 0.0  ;;  %v2188_v12 = vmax.f32 %v2172_v21, 0.0  ;;  %v2052_v37 = vadd.f32 %v2036_v41, %v1988_v49  ;;  %v2098_v21 = vmul.f32 %v2078_v55, %v5626_v61 }
 0x3cd   : > { %v2099_v39 = vmul.f32 %v2078_v55, %v5787_v11  ;;  %v2050_v34 = vadd.f32 %v2034_v44, %v1986_v32  ;;  %v2051_v0 = vadd.f32 %v2035_v51, %v1987_v8  ;;  %v2039_v15 = vmul.f32 %v2020_v35, %v5576_v33 }
 0x3ce   : > { %2206 = vadd.xlane.f32.xlu2 %v2189_v48  ;;  %2204 = vadd.xlane.f32.xlu1 %v2188_v12  ;;  %v2158_v31 = vpop.permute.xlu2 %2157  ;;  %v2116_v63 = vadd.f32 %v2100_v59, %v2052_v37  ;;  %v2191_v48 = vmax.f32 %v2175_v19, 0.0  ;;  %v1970_v36 = vstv %s5875_s13  ;;  %v2084_v41 = vstv %s6031_s22  ;;  %s8059_s13 = sld [smem:[#allocation32_spill]]  ;;  %s6880_s22 = spop %4776 }
 0x3cf   : > { %v2114_v60 = vadd.f32 %v2098_v21, %v2050_v34  ;;  %v2115_v17 = vadd.f32 %v2099_v39, %v2051_v0  ;;  %v1991_v42 = vmul.f32 %v1970_v36, %v5552_v29  ;;  %v2103_v55 = vmul.f32 %v2084_v41, %v5787_v11  ;;  %s4779_s19 = spop %4778 }
 0x3d0   : > { %v2180_v12 = vadd.f32 %v2158_v31, %v2116_v63  ;;  %v2037_v49 = vmul.f32 %v2017_v23, %v5576_v33  ;;  %v2038_v24 = vmul.f32 %v2020_v35, %v5562_v30  ;;  %v2026_v44 = vstv %s5962_s3  ;;  %s8066_s3 = sld [smem:[#allocation46_spill]]  ;;  %s4781_s29 = spop %4780 }
 0x3d1   : > { %v2154_v20 = vpop.permute.xlu0 %2153  ;;  %v1989_v37 = vmul.f32 %v1966_v7, %v5552_v29  ;;  %v2101_v32 = vmul.f32 %v2081_v62, %v5787_v11  ;;  %v1990_v8 = vmul.f32 %v1970_v36, %v5542_v28  ;;  %v2102_v21 = vmul.f32 %v2084_v41, %v5626_v61 }
 0x3d2   : > { %v2178_v59 = vadd.f32 %v2154_v20, %v2114_v60  ;;  %v2179_v19 = vadd.f32 %v2154_v20, %v2115_v17  ;;  %v2196_v51 = vmax.f32 %v2180_v12, 0.0  ;;  %v1978_v63 = vstv %s5879_s23  ;;  %s8063_s23 = sld [smem:[#allocation17_spill]] }
 0x3d3   : > { %2214 = vadd.xlane.f32.xlu0 %v2193_v6  ;;  %v2055_v6 = vadd.f32 %v2039_v15, %v1991_v42  ;;  %v2090_v23 = vstv %s8058_s1  ;;  %v2053_v35 = vadd.f32 %v2037_v49, %v1989_v37  ;;  %v2054_v34 = vadd.f32 %v2038_v24, %v1990_v8  ;;  %s8084_s1 = sld [smem:[#allocation126_spill]] }
 0x3d4   : > { %v2194_v0 = vmax.f32 %v2178_v59, 0.0  ;;  %v2042_v7 = vmul.f32 %v2026_v44, %v5562_v30  ;;  %v1974_v36 = vstv %s8060_s10  ;;  %v2087_v41 = vstv %s8061_s18  ;;  %s6934_s10 = spop %4782  ;;  %s8086_s18 = sld [smem:[#allocation38_spill]] }
 0x3d5   : > { %v2119_v20 = vadd.f32 %v2103_v55, %v2055_v6  ;;  %v2117_v62 = vadd.f32 %v2101_v32, %v2053_v35  ;;  %v2118_v15 = vadd.f32 %v2102_v21, %v2054_v34  ;;  %v1994_v60 = vmul.f32 %v1978_v63, %v5542_v28  ;;  %v2166_v34 = vpop.permute.xlu1 %2165 }
 0x3d6   : > { %2212 = vadd.xlane.f32.xlu2 %v2192_v25  ;;  %2210 = vadd.xlane.f32.xlu1 %v2191_v48  ;;  %v2195_v25 = vmax.f32 %v2179_v19, 0.0  ;;  %v2023_v48 = vstv %s8059_s13  ;;  %v2106_v17 = vmul.f32 %v2090_v23, %v5626_v61  ;;  %v1993_v6 = vmul.f32 %v1974_v36, %v5552_v29  ;;  %v2170_v8 = vpop.permute.xlu2 %2169  ;;  %s8085_s13 = sld [smem:[#allocation121_spill]] }
 0x3d7   : > { %v2181_v42 = vadd.f32 %v2158_v31, %v2117_v62  ;;  %v2040_v55 = vmul.f32 %v2023_v48, %v5562_v30  ;;  %v2041_v49 = vmul.f32 %v2023_v48, %v5576_v33  ;;  %v2058_v19 = vadd.f32 %v2042_v7, %v1994_v60 }
 0x3d8   : > { %v2104_v37 = vmul.f32 %v2087_v41, %v5626_v61  ;;  %v2105_v32 = vmul.f32 %v2087_v41, %v5787_v11  ;;  %v2293_v21 = vstv %s8062_s8  ;;  %v2238_v7 = vstv %s8063_s23  ;;  %s8087_s8 = sld [smem:[#allocation20_spill]] }
 0x3d9   : > { %v2162_v39 = vpop.permute.xlu0 %2161  ;;  %v2122_v31 = vadd.f32 %v2106_v17, %v2058_v19  ;;  %v2317_v48 = vmul.f32 %v2293_v21, %v5576_v33  ;;  %s8088_s23 = sld [smem:[#allocation114_spill]] }
 0x3da   : > { %v2183_v12 = vadd.f32 %v2162_v39, %v2119_v20  ;;  %v2182_v59 = vadd.f32 %v2162_v39, %v2118_v15  ;;  %v2197_v20 = vmax.f32 %v2181_v42, 0.0  ;;  %v2043_v42 = vmul.f32 %v2026_v44, %v5576_v33 }
 0x3db   : > { %2220 = vadd.xlane.f32.xlu0 %v2196_v51  ;;  %v1992_v51 = vmul.f32 %v1974_v36, %v5542_v28  ;;  %v2269_v36 = vmul.f32 %v2238_v7, %v5552_v29 }
 0x3dc   : > { %v2199_v24 = vmax.f32 %v2183_v12, 0.0  ;;  %v2198_v39 = vmax.f32 %v2182_v59, 0.0  ;;  %v2357_v12 = vstv %s6098_s28  ;;  %s8071_s28 = sld [smem:[#allocation35_spill]] }
 0x3dd   : > { %v2056_v35 = vadd.f32 %v2040_v55, %v1992_v51  ;;  %v2381_v41 = vmul.f32 %v2357_v12, %v5787_v11  ;;  %v2316_v55 = vmul.f32 %v2293_v21, %v5562_v30  ;;  %v2333_v19 = vadd.f32 %v2317_v48, %v2269_v36 }
 0x3de   : > { %2218 = vadd.xlane.f32.xlu2 %v2195_v25  ;;  %2216 = vadd.xlane.f32.xlu1 %v2194_v0  ;;  %v2057_v25 = vadd.f32 %v2041_v49, %v1993_v6  ;;  %v2186_v0 = vadd.f32 %v2170_v8, %v2122_v31  ;;  %v2581_v49 = vstv %s6158_s30  ;;  %v2107_v51 = vmul.f32 %v2090_v23, %v5787_v11  ;;  %s8073_s30 = sld [smem:[#allocation111_spill]] }
 0x3df   : > { %v2120_v62 = vadd.f32 %v2104_v37, %v2056_v35  ;;  %v2268_v6 = vmul.f32 %v2238_v7, %v5542_v28  ;;  %v2380_v37 = vmul.f32 %v2357_v12, %v5626_v61  ;;  %v2526_v31 = vstv %s6129_s24  ;;  %s8072_s24 = sld [smem:[#allocation36_spill]] }
 0x3e0   : > { %v2121_v15 = vadd.f32 %v2105_v32, %v2057_v25  ;;  %v2202_v59 = vmax.f32 %v2186_v0, 0.0  ;;  %v2397_v44 = vadd.f32 %v2381_v41, %v2333_v19  ;;  %v2242_v7 = vstv %s8065_s26  ;;  %s8091_s26 = sld [smem:[#allocation115_spill]] }
 0x3e1   : > { %v2184_v60 = vadd.f32 %v2166_v34, %v2120_v62  ;;  %v2430_v32 = vpop.permute.xlu0 %2429  ;;  %v2360_v12 = vstv %s8066_s3  ;;  %v2556_v62 = vmul.f32 %v2526_v31, %v5542_v28  ;;  %v2271_v19 = vmul.f32 %v2242_v7, %v5552_v29  ;;  %s4785_s3 = spop %4784 }
 0x3e2   : > { %v2185_v17 = vadd.f32 %v2166_v34, %v2121_v15  ;;  %v2296_v34 = vstv %s8064_s14  ;;  %v2461_v0 = vadd.f32 %v2430_v32, %v2397_v44  ;;  %s8090_s14 = sld [smem:[#allocation19_spill]] }
 0x3e3   : > { %2226 = vadd.xlane.f32.xlu0 %v2199_v24  ;;  %v1995_v24 = vmul.f32 %v1978_v63, %v5552_v29  ;;  %v2200_v21 = vmax.f32 %v2184_v60, 0.0  ;;  %v2604_v63 = vmul.f32 %v2581_v49, %v5562_v30  ;;  %v2318_v41 = vmul.f32 %v2296_v34, %v5562_v30 }
 0x3e4   : > { %v2201_v35 = vmax.f32 %v2185_v17, 0.0  ;;  %v2319_v60 = vmul.f32 %v2296_v34, %v5576_v33 }
 0x3e5   : > { %v2059_v25 = vadd.f32 %v2043_v42, %v1995_v24  ;;  %v2620_v42 = vadd.f32 %v2604_v63, %v2556_v62  ;;  %v2382_v24 = vmul.f32 %v2360_v12, %v5626_v61  ;;  %v2530_v63 = vstv %s8068_s20 }
 0x3e6   : > { %2222 = vadd.xlane.f32.xlu1 %v2197_v20  ;;  %2224 = vadd.xlane.f32.xlu2 %v2198_v39  ;;  %v2645_v20 = vstv %s6852_s9  ;;  %v2332_v39 = vadd.f32 %v2316_v55, %v2268_v6  ;;  %v2477_v55 = vmax.f32 %v2461_v0, 0.0  ;;  %v2718_v6 = vpop.permute.xlu2 %2717  ;;  %v2648_v0 = vstv %s4775_s4  ;;  %s8089_s9 = sld [smem:[#allocation30_spill]] }
 0x3e7   : > { %v2123_v23 = vadd.f32 %v2107_v51, %v2059_v25  ;;  %v2668_v15 = vmul.f32 %v2645_v20, %v5626_v61  ;;  %v2383_v51 = vmul.f32 %v2360_v12, %v5787_v11  ;;  %v2434_v25 = vpop.permute.xlu1 %2433  ;;  %v2671_v12 = vmul.f32 %v2648_v0, %v5787_v11 }
 0x3e8   : > { %v2396_v48 = vadd.f32 %v2380_v37, %v2332_v39  ;;  %v2584_v37 = vstv %s8067_s16  ;;  %s4787_s16 = spop %4786 }
 0x3e9   : > { %v2187_v36 = vadd.f32 %v2170_v8, %v2123_v23  ;;  %v2684_v8 = vadd.f32 %v2668_v15, %v2620_v42  ;;  %v2607_v34 = vmul.f32 %v2584_v37, %v5576_v33 }
 0x3ea   : > { %v2460_v17 = vadd.f32 %v2430_v32, %v2396_v48 }
 0x3eb   : > { %2232 = vadd.xlane.f32.xlu0 %v2202_v59  ;;  %v2270_v59 = vmul.f32 %v2242_v7, %v5542_v28  ;;  %v2203_v44 = vmax.f32 %v2187_v36, 0.0  ;;  %v2748_v39 = vadd.f32 %v2718_v6, %v2684_v8  ;;  %v2559_v7 = vmul.f32 %v2530_v63, %v5552_v29 }
 0x3ec   : > { %v2476_v32 = vmax.f32 %v2460_v17, 0.0  ;;  %v2605_v36 = vmul.f32 %v2581_v49, %v5576_v33  ;;  %v2534_v8 = vstv %s8070_s15 }
 0x3ed   : > { %v2764_v17 = vmax.f32 %v2748_v39, 0.0  ;;  %v2623_v42 = vadd.f32 %v2607_v34, %v2559_v7 }
 0x3ee   : > { %2228 = vadd.xlane.f32.xlu1 %v2200_v21  ;;  %2230 = vadd.xlane.f32.xlu2 %v2201_v35  ;;  %v2334_v21 = vadd.f32 %v2318_v41, %v2270_v59  ;;  %v2335_v35 = vadd.f32 %v2319_v60, %v2271_v19  ;;  %v2606_v41 = vmul.f32 %v2584_v37, %v5562_v30  ;;  %v2587_v60 = vstv %s8069_s12  ;;  %s8094_s12 = sld [smem:[#allocation132_spill]] }
 0x3ef   : > { %v2669_v59 = vmul.f32 %v2645_v20, %v5787_v11  ;;  %v2558_v19 = vmul.f32 %v2530_v63, %v5542_v28  ;;  %v2687_v49 = vadd.f32 %v2671_v12, %v2623_v42  ;;  %v2246_v63 = vstv %s8072_s24 }
 0x3f0   : > { %v2398_v23 = vadd.f32 %v2382_v24, %v2334_v21  ;;  %v2399_v48 = vadd.f32 %v2383_v51, %v2335_v35  ;;  %v2670_v24 = vmul.f32 %v2648_v0, %v5626_v61  ;;  %v2722_v51 = vpop.permute.xlu0 %2721  ;;  %v2363_v0 = vstv %s8073_s30 }
 0x3f1   : > { %v2751_v39 = vadd.f32 %v2722_v51, %v2687_v49  ;;  %v2273_v42 = vmul.f32 %v2246_v63, %v5552_v29 }
 0x3f2   : > { %v2462_v62 = vadd.f32 %v2434_v25, %v2398_v23  ;;  %v2463_v15 = vadd.f32 %v2434_v25, %v2399_v48  ;;  %v2299_v25 = vstv %s8071_s28  ;;  %v2560_v23 = vmul.f32 %v2534_v8, %v5542_v28 }
 0x3f3   : > { %2494 = vadd.xlane.f32.xlu0 %v2477_v55  ;;  %v2557_v55 = vmul.f32 %v2526_v31, %v5552_v29  ;;  %v2608_v31 = vmul.f32 %v2587_v60, %v5562_v30  ;;  %v2320_v12 = vmul.f32 %v2299_v25, %v5562_v30 }
 0x3f4   : > { %v2478_v37 = vmax.f32 %v2462_v62, 0.0  ;;  %v2479_v21 = vmax.f32 %v2463_v15, 0.0  ;;  %v2321_v62 = vmul.f32 %v2299_v25, %v5576_v33 }
 0x3f5   : > { %v2621_v35 = vadd.f32 %v2605_v36, %v2557_v55  ;;  %v2624_v36 = vadd.f32 %v2608_v31, %v2560_v23  ;;  %v2384_v55 = vmul.f32 %v2363_v0, %v5626_v61  ;;  %v2250_v31 = vstv %s8075_s0 }
 0x3f6   : > { %2234 = vadd.xlane.f32.xlu1 %v2203_v44  ;;  %2492 = vadd.xlane.f32.xlu2 %v2476_v32  ;;  %v2651_v44 = vstv %s6880_s22  ;;  %v2622_v32 = vadd.f32 %v2606_v41, %v2558_v19  ;;  %v2767_v41 = vmax.f32 %v2751_v39, 0.0  ;;  %v2726_v19 = vpop.permute.xlu2 %2725  ;;  %v2366_v39 = vstv %s8076_s11 }
 0x3f7   : > { %v2685_v20 = vadd.f32 %v2669_v59, %v2621_v35  ;;  %v2672_v48 = vmul.f32 %v2651_v44, %v5626_v61  ;;  %v2385_v59 = vmul.f32 %v2363_v0, %v5787_v11  ;;  %v2438_v35 = vpop.permute.xlu1 %2437  ;;  %v2387_v0 = vmul.f32 %v2366_v39, %v5787_v11 }
 0x3f8   : > { %v2686_v34 = vadd.f32 %v2670_v24, %v2622_v32  ;;  %v2302_v24 = vstv %s8074_s5 }
 0x3f9   : > { %v2749_v7 = vadd.f32 %v2718_v6, %v2685_v20  ;;  %v2688_v6 = vadd.f32 %v2672_v48, %v2624_v36  ;;  %v2323_v25 = vmul.f32 %v2302_v24, %v5576_v33 }
 0x3fa   : > { %v2750_v15 = vadd.f32 %v2722_v51, %v2686_v34 }
 0x3fb   : > { %2780 = vadd.xlane.f32.xlu0 %v2764_v17  ;;  %v2272_v17 = vmul.f32 %v2246_v63, %v5542_v28  ;;  %v2765_v49 = vmax.f32 %v2749_v7, 0.0  ;;  %v2752_v32 = vadd.f32 %v2726_v19, %v2688_v6  ;;  %v2275_v63 = vmul.f32 %v2250_v31, %v5552_v29 }
 0x3fc   : > { %v2766_v51 = vmax.f32 %v2750_v15, 0.0  ;;  %v2609_v7 = vmul.f32 %v2587_v60, %v5576_v33  ;;  %v2254_v6 = vstv %s8078_s6 }
 0x3fd   : > { %v2768_v15 = vmax.f32 %v2752_v32, 0.0  ;;  %v2339_v36 = vadd.f32 %v2323_v25, %v2275_v63 }
 0x3fe   : > { %2496 = vadd.xlane.f32.xlu1 %v2478_v37  ;;  %2498 = vadd.xlane.f32.xlu2 %v2479_v21  ;;  %v2336_v37 = vadd.f32 %v2320_v12, %v2272_v17  ;;  %v2337_v21 = vadd.f32 %v2321_v62, %v2273_v42  ;;  %v2322_v12 = vmul.f32 %v2302_v24, %v5562_v30  ;;  %v2305_v62 = vstv %s8077_s27 }
 0x3ff   : > { %v2673_v17 = vmul.f32 %v2651_v44, %v5787_v11  ;;  %v2274_v42 = vmul.f32 %v2250_v31, %v5542_v28  ;;  %v2538_v31 = vstv %s8081_s21 }
 0x400   : > { %v2400_v20 = vadd.f32 %v2384_v55, %v2336_v37  ;;  %v2401_v34 = vadd.f32 %v2385_v59, %v2337_v21  ;;  %v2386_v55 = vmul.f32 %v2366_v39, %v5626_v61  ;;  %v2442_v59 = vpop.permute.xlu0 %2441  ;;  %v2403_v37 = vadd.f32 %v2387_v0, %v2339_v36 }
 0x401   : > { %v2654_v39 = vstv %s4779_s19  ;;  %v2563_v36 = vmul.f32 %v2538_v31, %v5552_v29 }
 0x402   : > { %v2464_v23 = vadd.f32 %v2438_v35, %v2400_v20  ;;  %v2465_v48 = vadd.f32 %v2438_v35, %v2401_v34  ;;  %v2590_v35 = vstv %s8080_s17  ;;  %v2467_v32 = vadd.f32 %v2442_v59, %v2403_v37 }
 0x403   : > { %2786 = vadd.xlane.f32.xlu0 %v2767_v41  ;;  %v2561_v41 = vmul.f32 %v2534_v8, %v5552_v29  ;;  %v2324_v8 = vmul.f32 %v2305_v62, %v5562_v30  ;;  %v2276_v20 = vmul.f32 %v2254_v6, %v5542_v28  ;;  %v2610_v0 = vmul.f32 %v2590_v35, %v5562_v30 }
 0x404   : > { %v2480_v60 = vmax.f32 %v2464_v23, 0.0  ;;  %v2481_v24 = vmax.f32 %v2465_v48, 0.0  ;;  %v2611_v23 = vmul.f32 %v2590_v35, %v5576_v33 }
 0x405   : > { %v2625_v21 = vadd.f32 %v2609_v7, %v2561_v41  ;;  %v2340_v7 = vadd.f32 %v2324_v8, %v2276_v20  ;;  %v2674_v41 = vmul.f32 %v2654_v39, %v5626_v61  ;;  %v2542_v8 = vstv %s8083_s7 }
 0x406   : > { %2782 = vadd.xlane.f32.xlu1 %v2765_v49  ;;  %2784 = vadd.xlane.f32.xlu2 %v2766_v51  ;;  %v2369_v49 = vstv %s8079_s2  ;;  %v2338_v51 = vadd.f32 %v2322_v12, %v2274_v42  ;;  %v2483_v12 = vmax.f32 %v2467_v32, 0.0  ;;  %v2446_v42 = vpop.permute.xlu2 %2445  ;;  %v2657_v32 = vstv %s4781_s29 }
 0x407   : > { %v2689_v44 = vadd.f32 %v2673_v17, %v2625_v21  ;;  %v2388_v34 = vmul.f32 %v2369_v49, %v5626_v61  ;;  %v2675_v17 = vmul.f32 %v2654_v39, %v5787_v11  ;;  %v2730_v21 = vpop.permute.xlu1 %2729  ;;  %v2677_v39 = vmul.f32 %v2657_v32, %v5787_v11 }
 0x408   : > { %v2402_v25 = vadd.f32 %v2386_v55, %v2338_v51  ;;  %v2593_v55 = vstv %s8082_s25  ;;  %s8095_s25 = sld [smem:[#allocation9_spill]] }
 0x409   : > { %v2753_v63 = vadd.f32 %v2726_v19, %v2689_v44  ;;  %v2404_v19 = vadd.f32 %v2388_v34, %v2340_v7  ;;  %v2613_v35 = vmul.f32 %v2593_v55, %v5576_v33 }
 0x40a   : > { %v2466_v48 = vadd.f32 %v2442_v59, %v2402_v25 }
 0x40b   : > { %2788 = vadd.xlane.f32.xlu0 %v2768_v15  ;;  %v2562_v15 = vmul.f32 %v2538_v31, %v5542_v28  ;;  %v2769_v37 = vmax.f32 %v2753_v63, 0.0  ;;  %v2468_v51 = vadd.f32 %v2446_v42, %v2404_v19  ;;  %v2565_v31 = vmul.f32 %v2542_v8, %v5552_v29 }
 0x40c   : > { %v2482_v59 = vmax.f32 %v2466_v48, 0.0  ;;  %v2325_v63 = vmul.f32 %v2305_v62, %v5576_v33  ;;  %v2546_v19 = vstv %s8085_s13  ;;  %s8096_s13 = sld [smem:[#allocation133_spill]] }
 0x40d   : > { %v2484_v48 = vmax.f32 %v2468_v51, 0.0  ;;  %v2629_v7 = vadd.f32 %v2613_v35, %v2565_v31 }
 0x40e   : > { %2500 = vadd.xlane.f32.xlu1 %v2480_v60  ;;  %2502 = vadd.xlane.f32.xlu2 %v2481_v24  ;;  %v2626_v60 = vadd.f32 %v2610_v0, %v2562_v15  ;;  %v2627_v24 = vadd.f32 %v2611_v23, %v2563_v36  ;;  %v2612_v0 = vmul.f32 %v2593_v55, %v5562_v30  ;;  %v2596_v23 = vstv %s8084_s1  ;;  %s259_s7 = sand.u32 1, %s8095_s25  }
 0x40f   : > { %v2389_v15 = vmul.f32 %v2369_v49, %v5787_v11  ;;  %v2564_v36 = vmul.f32 %v2542_v8, %v5542_v28  ;;  %v2693_v62 = vadd.f32 %v2677_v39, %v2629_v7  ;;  %v2258_v8 = vstv %s8087_s8  ;;  %s4004_s8 = sshll.u32 %s259_s7, 8  ;;  %s3909_s28 = scalar_lea.sflag [#allocation4], %s259_s7 }
 0x410   : > { %v2690_v44 = vadd.f32 %v2674_v41, %v2626_v60  ;;  %v2691_v25 = vadd.f32 %v2675_v17, %v2627_v24  ;;  %v2676_v41 = vmul.f32 %v2657_v32, %v5626_v61  ;;  %v2734_v17 = vpop.permute.xlu0 %2733  ;;  %v2372_v32 = vstv %s8088_s23  ;;  %s7563_s23 = scalar_lea.vmem [#allocation5], %s4004_s8 }
 0x411   : > { %v2757_v51 = vadd.f32 %v2734_v17, %v2693_v62  ;;  %v2279_v7 = vmul.f32 %v2258_v8, %v5552_v29  ;;  %s3921_s15 = sshll.u32 %s7563_s23, 4  ;;  %s3922_s15 = int_to_ptr.vmem [resolvable:$true] %s3921_s15 }
 0x412   : > { %v2754_v20 = vadd.f32 %v2730_v21, %v2690_v44  ;;  %v2755_v34 = vadd.f32 %v2730_v21, %v2691_v25  ;;  %v2308_v21 = vstv %s8086_s18  ;;  %v2566_v44 = vmul.f32 %v2546_v19, %v5542_v28 }
 0x413   : > { %2506 = vadd.xlane.f32.xlu0 %v2483_v12  ;;  %v2277_v12 = vmul.f32 %v2254_v6, %v5552_v29  ;;  %v2614_v6 = vmul.f32 %v2596_v23, %v5562_v30  ;;  %v2326_v39 = vmul.f32 %v2308_v21, %v5562_v30 }
 0x414   : > { %v2770_v55 = vmax.f32 %v2754_v20, 0.0  ;;  %v2771_v60 = vmax.f32 %v2755_v34, 0.0  ;;  %v2327_v20 = vmul.f32 %v2308_v21, %v5576_v33 }
 0x415   : > { %v2341_v24 = vadd.f32 %v2325_v63, %v2277_v12  ;;  %v2630_v63 = vadd.f32 %v2614_v6, %v2566_v44  ;;  %v2390_v12 = vmul.f32 %v2372_v32, %v5626_v61  ;;  %v2262_v6 = vstv %s8090_s14 }
 0x416   : > { %2790 = vadd.xlane.f32.xlu1 %v2769_v37  ;;  %2504 = vadd.xlane.f32.xlu2 %v2482_v59  ;;  %v2660_v37 = vstv %s6934_s10  ;;  %v2628_v59 = vadd.f32 %v2612_v0, %v2564_v36  ;;  %v2773_v0 = vmax.f32 %v2757_v51, 0.0  ;;  %v2738_v36 = vpop.permute.xlu2 %2737  ;;  %v2375_v51 = vstv %s8091_s26 }
 0x417   : > { %v2405_v49 = vadd.f32 %v2389_v15, %v2341_v24  ;;  %v2678_v25 = vmul.f32 %v2660_v37, %v5626_v61  ;;  %v2391_v15 = vmul.f32 %v2372_v32, %v5787_v11  ;;  %v2450_v24 = vpop.permute.xlu1 %2449  ;;  %v2393_v32 = vmul.f32 %v2375_v51, %v5787_v11 }
 0x418   : > { %v2692_v35 = vadd.f32 %v2676_v41, %v2628_v59  ;;  %v2311_v41 = vstv %s8089_s9  ;;  %s8097_s9 = sld [smem:[#allocation12_spill]] }
 0x419   : > { %v2469_v31 = vadd.f32 %v2446_v42, %v2405_v49  ;;  %v2694_v42 = vadd.f32 %v2678_v25, %v2630_v63  ;;  %v2329_v21 = vmul.f32 %v2311_v41, %v5576_v33  ;;  %v2567_v63 = vmul.f32 %v2546_v19, %v5552_v29 }
 0x41a   : > { %v2756_v34 = vadd.f32 %v2734_v17, %v2692_v35 }
 0x41b   : > { %2508 = vadd.xlane.f32.xlu0 %v2484_v48  ;;  %v2278_v48 = vmul.f32 %v2258_v8, %v5542_v28  ;;  %v2485_v62 = vmax.f32 %v2469_v31, 0.0  ;;  %v2758_v59 = vadd.f32 %v2738_v36, %v2694_v42  ;;  %v2281_v8 = vmul.f32 %v2262_v6, %v5552_v29 }
 0x41c   : > { %v2772_v17 = vmax.f32 %v2756_v34, 0.0  ;;  %v2615_v31 = vmul.f32 %v2596_v23, %v5576_v33  ;;  %v2663_v29 = vstv %s4785_s3 }
 0x41d   : > { %v2345_v34 = vadd.f32 %v2329_v21, %v2281_v8 }
 0x41e   : > { %2792 = vadd.xlane.f32.xlu1 %v2770_v55  ;;  %2794 = vadd.xlane.f32.xlu2 %v2771_v60  ;;  %v2342_v55 = vadd.f32 %v2326_v39, %v2278_v48  ;;  %v2343_v60 = vadd.f32 %v2327_v20, %v2279_v7  ;;  %v2328_v39 = vmul.f32 %v2311_v41, %v5562_v30  ;;  %v2774_v20 = vmax.f32 %v2758_v59, 0.0  ;;  %s4402_s14 = sshll.u32 %s8097_s9, 8 }
 0x41f   : > { %v2280_v48 = vmul.f32 %v2262_v6, %v5542_v28  ;;  %v2392_v7 = vmul.f32 %v2375_v51, %v5626_v61  ;;  %v2680_v28 = vmul.f32 %v2663_v29, %v5626_v61  ;;  %v2742_v6 = vpop.permute.xlu1 %2741 }
 0x420   : > { %v2406_v49 = vadd.f32 %v2390_v12, %v2342_v55  ;;  %v2407_v35 = vadd.f32 %v2391_v15, %v2343_v60  ;;  %v2454_v12 = vpop.permute.xlu0 %2453  ;;  %v2409_v15 = vadd.f32 %v2393_v32, %v2345_v34  ;;  %v2631_v55 = vadd.f32 %v2615_v31, %v2567_v63 }
 0x421   : > { %v2344_v33 = vadd.f32 %v2328_v39, %v2280_v48 }
 0x422   : > { %v2470_v44 = vadd.f32 %v2450_v24, %v2406_v49  ;;  %v2471_v25 = vadd.f32 %v2450_v24, %v2407_v35  ;;  %v2473_v23 = vadd.f32 %v2454_v12, %v2409_v15  ;;  %v2458_v24 = vpop.permute.xlu2 %2457  ;;  %v2666_v49 = vstv %s4787_s16  ;;  %s8098_s16 = sld [smem:[#allocation134_spill]] }
 0x423   : > { %2798 = vadd.xlane.f32.xlu0 %v2773_v0  ;;  %v2679_v0 = vmul.f32 %v2660_v37, %v5787_v11  ;;  %v2408_v41 = vadd.f32 %v2392_v7, %v2344_v33  ;;  %v2474_v51 = vadd.f32 %v2458_v24, %v6207_v54  ;;  %v2696_v35 = vadd.f32 %v2680_v28, %v6190_v22 }
 0x424   : > { %v2486_v42 = vmax.f32 %v2470_v44, 0.0  ;;  %v2489_v60 = vmax.f32 %v2473_v23, 0.0  ;;  %v2683_v32 = vmul.f32 %v2666_v49, %v5787_v11  ;;  %v2682_v39 = vmul.f32 %v2666_v49, %v5626_v61 }
 0x425   : > { %v2695_v30 = vadd.f32 %v2679_v0, %v2631_v55  ;;  %v2472_v37 = vadd.f32 %v2454_v12, %v2408_v41  ;;  %v2760_v44 = vadd.f32 %v2742_v6, %v2696_v35  ;;  %v2490_v31 = vmax.f32 %v2474_v51, 0.0 }
 0x426   : > { %2510 = vadd.xlane.f32.xlu1 %v2485_v62  ;;  %2796 = vadd.xlane.f32.xlu2 %v2772_v17  ;;  %v2487_v62 = vmax.f32 %v2471_v25, 0.0  ;;  %v2681_v17 = vmul.f32 %v2663_v29, %v5787_v11  ;;  %v2698_v22 = vadd.f32 %v2682_v39, %v6216_v26  ;;  %v2475_v0 = vadd.f32 %v2458_v24, %v6220_v5 }
 0x427   : > { %v2759_v19 = vadd.f32 %v2738_v36, %v2695_v30  ;;  %v2488_v21 = vmax.f32 %v2472_v37, 0.0  ;;  %v2776_v34 = vmax.f32 %v2760_v44, 0.0 }
 0x428   : > { %v2697_v8 = vadd.f32 %v2681_v17, %v6192_v58  ;;  %v2746_v36 = vpop.permute.xlu0 %2745  ;;  %s3920_s20 = scalar_lea.hbm %s8098_s16, %s4402_s14  ;;  %s4960_s11 = scalar_lea.hbm %s8098_s16, 512 }
 0x429   : > { %v2775_v59 = vmax.f32 %v2759_v19, 0.0  ;;  %v2762_v48 = vadd.f32 %v2746_v36, %v2698_v22  ;;  %v2832_v22 = vperm.slane %v6188_v14, %v6237_v50  ;;  %v2841_v14 = vperm.slane %v6150_v43, %v6234_v27  ;;  %s3923_s22 = sshll.u32 %s3920_s20, 4  ;;  %s3924_s22 = int_to_ptr.hbm [resolvable:$true] %s3923_s22 }
 0x42a   : > { %v2761_v25 = vadd.f32 %v2742_v6, %v2697_v8  ;;  %v2844_v43 = vperm.slane %v6131_v13, %v6234_v27  ;;  %v2848_v13 = vperm.slane %v6226_v46, %v6237_v50  ;;  %s4954_s24 = sshra.s32 %s3924_s22, 4  ;;  %s4955_s24 = int_to_ptr.hbm [resolvable:$true] %s4954_s24 }
 0x42b   : > { %2800 = vadd.xlane.f32.xlu0 %v2774_v20  ;;  %v2699_v20 = vadd.f32 %v2683_v32, %v6218_v56  ;;  %v2491_v56 = vmax.f32 %v2475_v0, 0.0  ;;  %s4956_s30 = scalar_lea.hbm %s4955_s24, 256  ;;  %p4961_p3 = scmp.lt.s32.totalorder %s4955_s24, %s8098_s16 }
 0x42c   : > { %v2777_v54 = vmax.f32 %v2761_v25, 0.0  ;;  %p4957_p0 = scmp.ne.s32.totalorder %s4955_s24, %s4956_s30  ;;  %p4962_p4 = scmp.lt.s32.totalorder %s4960_s11, %s4956_s30 }
 0x42d   : > { %v2763_v63 = vadd.f32 %v2746_v36, %v2699_v20 }
 0x42e   : > { %2512 = vadd.xlane.f32.xlu1 %v2486_v42  ;;  %2514 = vadd.xlane.f32.xlu2 %v2487_v62  ;;  %v2778_v42 = vmax.f32 %v2762_v48, 0.0  ;;  %p4958_p1 = pnand %p4957_p0, %p5087_p5  ;;  %p4963_p7 = por %p4962_p4, %p4961_p3 }
 0x42f   : > { %v2779_v11 = vmax.f32 %v2763_v63, 0.0  ;;  %v2835_v63 = vperm.slane %v6133_v57, %v6234_v27  ;;  %v2839_v57 = vperm.slane %v6209_v1, %v6237_v50  ;;  %v2845_v1 = vperm.slane %v6222_v3, %v6237_v50 }
 0x430   : > { %v2850_v3 = vperm.slane %v6164_v2, %v6234_v27  ;;  %p4959_p2 = pneg %p4958_p1 }
 0x432   : > { %p4964_p8 = pnand %p4963_p7, %p4959_p2 }
 0x433   : > { %2518 = vadd.xlane.f32.xlu0 %v2489_v60 }
 0x436   : > { %2802 = vadd.xlane.f32.xlu1 %v2775_v59  ;;  %2516 = vadd.xlane.f32.xlu2 %v2488_v21 }
 0x43b   : > { %2520 = vadd.xlane.f32.xlu0 %v2490_v31 }
 0x43e   : > { %2804 = vadd.xlane.f32.xlu1 %v2776_v34  ;;  %2806 = vadd.xlane.f32.xlu2 %v2777_v54  ;;  %v2209_v58 = vpop.xlane.xlu0 %2208  ;;  %v2836_v34 = vperm.slane %v6224_v16, %v6237_v50 }
 0x43f   : > { %v3082_v5 = vperm.slane %v2209_v58, %v6234_v27  ;;  %v2830_v58 = vperm.slane %v6137_v10, %v6234_v27 }
 0x441   : > { %v2207_v7 = vpop.xlane.xlu2 %2206  ;;  %v2205_v12 = vpop.xlane.xlu1 %2204 }
 0x442   : > { %v3080_v15 = vperm.slane %v2207_v7, %v6237_v50  ;;  %v3079_v61 = vperm.slane %v2205_v12, %v6234_v27  ;;  %v2842_v7 = vperm.slane %v6230_v4, %v6237_v50 }
 0x443   : > { %2810 = vadd.xlane.f32.xlu0 %v2779_v11  ;;  %v2837_v11 = vsel %vm2833_vm0, %v2836_v34, %v2835_v63 }
 0x444   : > { %v3081_v62 = vsel %vm2833_vm0, %v3080_v15, %v3079_v61  ;;  %v2834_v15 = vsel %vm2833_vm0, %v2832_v22, %v2830_v58  ;;  %v2838_v61 = vperm.slane %v6154_v45, %v6234_v27  ;;  %v2843_v4 = vsel %vm2833_vm0, %v2842_v7, %v2841_v14 }
 0x445   : > { %v2851_v45 = vperm.slane %v6232_v38, %v6237_v50 }
 0x446   : > { %2522 = vadd.xlane.f32.xlu1 %v2491_v56  ;;  %2808 = vadd.xlane.f32.xlu2 %v2778_v42  ;;  %v2215_v26 = vpop.xlane.xlu0 %2214  ;;  %v2857_v56 = vsel %vm2856_vm1, %v2837_v11, %v2834_v15 }
 0x447   : > { %v3086_v23 = vperm.slane %v2215_v26, %v6237_v50 }
 0x449   : > { %v2213_v55 = vpop.xlane.xlu2 %2212  ;;  %v2211_v33 = vpop.xlane.xlu1 %2210 }
 0x44a   : > { %v3085_v30 = vperm.slane %v2213_v55, %v6234_v27  ;;  %v3083_v41 = vperm.slane %v2211_v33, %v6237_v50 }
 0x44c   : > { %v3087_v29 = vsel %vm2833_vm0, %v3086_v23, %v3085_v30  ;;  %v3084_v19 = vsel %vm2833_vm0, %v3083_v41, %v3082_v5 }
 0x44d   : > { %v3103_v37 = vsel %vm2856_vm1, %v3084_v19, %v3081_v62  ;;  %v2840_v62 = vsel %vm2833_vm0, %v2839_v57, %v2838_v61 }
 0x44e   : > { %v2221_v60 = vpop.xlane.xlu0 %2220  ;;  %v3104_v28 = vsel %vm2858_vm2, %v3087_v29, %v3103_v37  ;;  %v2859_v26 = vsel %vm2858_vm2, %v2840_v62, %v2857_v56  ;;  %v2846_v29 = vsel %vm2833_vm0, %v2845_v1, %v2844_v43 }
 0x44f   : > { %v3091_v36 = vperm.slane %v2221_v60, %v6234_v27  ;;  %v2861_v55 = vsel %vm2860_vm3, %v2843_v4, %v2859_v26 }
 0x451   : > { %v2219_v17 = vpop.xlane.xlu2 %2218  ;;  %v2217_v24 = vpop.xlane.xlu1 %2216 }
 0x452   : > { %v3089_v59 = vperm.slane %v2219_v17, %v6237_v50  ;;  %v3088_v21 = vperm.slane %v2217_v24, %v6234_v27  ;;  %v2863_v17 = vsel %vm2862_vm4, %v2846_v29, %v2861_v55 }
 0x454   : > { %v3090_v6 = vsel %vm2833_vm0, %v3089_v59, %v3088_v21  ;;  %v2852_v59 = vsel %vm2833_vm0, %v2851_v45, %v2850_v3 }
 0x455   : > { %v3105_v51 = vsel %vm2860_vm3, %v3090_v6, %v3104_v28  ;;  %v2847_v28 = vperm.slane %v6166_v9, %v6234_v27 }
 0x456   : > { %v2227_v49 = vpop.xlane.xlu0 %2226 }
 0x457   : > { %v3095_v19 = vperm.slane %v2227_v49, %v6237_v50  ;;  %v2849_v6 = vsel %vm2833_vm0, %v2848_v13, %v2847_v28  ;;  %v2854_v49 = vperm.slane %v6228_v18, %v6237_v50 }
 0x458   : > { %v2865_v9 = vsel %vm2864_vm5, %v2849_v6, %v2863_v17 }
 0x459   : > { %v2223_v35 = vpop.xlane.xlu1 %2222  ;;  %v2225_v8 = vpop.xlane.xlu2 %2224 }
 0x45a   : > { %v3092_v32 = vperm.slane %v2223_v35, %v6237_v50  ;;  %v3094_v23 = vperm.slane %v2225_v8, %v6234_v27  ;;  %v8092_v8 = vld [vmem:[#allocation120_spill] sm:$0xff] }
 0x45c   : > { %v3093_v44 = vsel %vm2833_vm0, %v3092_v32, %v3091_v36  ;;  %v3096_v46 = vsel %vm2833_vm0, %v3095_v19, %v3094_v23  ;;  %v2853_v36 = vperm.slane %v8092_v8, %v6234_v27  ;;  %v2867_v32 = vsel %vm2866_vm6, %v2852_v59, %v2865_v9 }
 0x45d   : > { %v3106_v25 = vsel %vm2862_vm4, %v3093_v44, %v3105_v51 }
 0x45e   : > { %v2233_v31 = vpop.xlane.xlu0 %2232  ;;  %v3107_v44 = vsel %vm2864_vm5, %v3096_v46, %v3106_v25  ;;  %v2855_v58 = vsel %vm2833_vm0, %v2854_v49, %v2853_v36  ;;  %v4394_v49 = vld [vmem:[%s8094_s12 + $0x1bc] sm:$0xf0]  ;;  %v4386_v36 = vld [vmem:[%s8094_s12 + $0x184] sm:$0xf] }
 0x45f   : > { %v3100_v51 = vperm.slane %v2233_v31, %v6234_v27  ;;  %v2869_v7 = vsel %vm2868_vm7, %v2855_v58, %v2867_v32  ;;  %v4246_v32 = vld [vmem:[%s8094_s12 + $0x1c0] sm:$0xf0]  ;;  %v4180_v58 = vld [vmem:[%s8094_s12 + $0x100] sm:$0xf] }
 0x461   : > { %v2229_v39 = vpop.xlane.xlu1 %2228  ;;  %v2231_v20 = vpop.xlane.xlu2 %2230 }
 0x462   : > { %v3097_v37 = vperm.slane %v2229_v39, %v6234_v27  ;;  %v3098_v38 = vperm.slane %v2231_v20, %v6237_v50 }
 0x464   : > { %v3099_v35 = vsel %vm2833_vm0, %v3098_v38, %v3097_v37 }
 0x465   : > { %v3108_v22 = vsel %vm2866_vm6, %v3099_v35, %v3107_v44  ;;  %v4252_v44 = vld [vmem:[%s8094_s12 + $0x188] sm:$0xf] }
 0x466   : > { %v2495_v54 = vpop.xlane.xlu0 %2494 }
 0x467   : > { %v3128_v12 = vperm.slane %v2495_v54, %v6237_v50 }
 0x469   : > { %v2235_v0 = vpop.xlane.xlu1 %2234  ;;  %v2493_v48 = vpop.xlane.xlu2 %2492 }
 0x46a   : > { %v3127_v16 = vperm.slane %v2493_v48, %v6234_v27  ;;  %v3101_v2 = vperm.slane %v2235_v0, %v6237_v50 }
 0x46c   : > { %v3129_v10 = vsel %vm2833_vm0, %v3128_v12, %v3127_v16  ;;  %v3102_v39 = vsel %vm2833_vm0, %v3101_v2, %v3100_v51  ;;  %v8093_v16 = vld [vmem:[#allocation127_spill] sm:$0xff]  ;;  %v4244_v51 = vld [vmem:[%s8094_s12 + $0x180] sm:$0xf] }
 0x46d   : > { %v3109_v0 = vsel %vm2868_vm7, %v3102_v39, %v3108_v22  ;;  %v3207_v57 = vpack.c.bf16 %v8093_v16, %v2869_v7  ;;  %v4245_v8 = vor.u32 %v4394_v49, %v4244_v51  ;;  %v4182_v7 = vld [vmem:[%s8094_s12 + $0x140] sm:$0xf0]  ;;  %v4379_v16 = vld [vmem:[%s8094_s12 + $0x144] sm:$0xf0] }
 0x46e   : > { %v2781_v42 = vpop.xlane.xlu0 %2780  ;;  %v3209_v14 = vpack.c.bf16 %v3109_v0, %v6780_v47  ;;  %v4378_v0 = vld [vmem:[%s8094_s12 + $0x13c] sm:$0xf0] }
 0x46f   : > { %v3175_v31 = vperm.slane %v2781_v42, %v6234_v27  ;;  %3655 = vmatpush.bf16.msra.mxu1 %v4245_v8 }
 0x471   : > { %v2497_v33 = vpop.xlane.xlu1 %2496  ;;  %v2499_v5 = vpop.xlane.xlu2 %2498 }
 0x472   : > { %v3130_v30 = vperm.slane %v2497_v33, %v6234_v27  ;;  %v3131_v41 = vperm.slane %v2499_v5, %v6237_v50 }
 0x474   : > { %v3132_v60 = vsel %vm2833_vm0, %v3131_v41, %v3130_v30 }
 0x475   : > { %v3151_v24 = vsel %vm2856_vm1, %v3132_v60, %v3129_v10 }
 0x476   : > { %v2787_v21 = vpop.xlane.xlu0 %2786 }
 0x477   : > { %v3179_v54 = vperm.slane %v2787_v21, %v6237_v50 }
 0x479   : > { %v2783_v20 = vpop.xlane.xlu1 %2782  ;;  %v2785_v34 = vpop.xlane.xlu2 %2784 }
 0x47a   : > { %v3176_v18 = vperm.slane %v2783_v20, %v6237_v50  ;;  %v3178_v63 = vperm.slane %v2785_v34, %v6234_v27  ;;  %v4249_v34 = vor.u32 %v4386_v36, %v4246_v32 }
 0x47c   : > { %v3177_v25 = vsel %vm2833_vm0, %v3176_v18, %v3175_v31  ;;  %v3180_v48 = vsel %vm2833_vm0, %v3179_v54, %v3178_v63  ;;  %v4395_v31 = vld [vmem:[%s8094_s12 + $0x1c4] sm:$0xf0]  ;;  %v4292_v54 = vld [vmem:[%s8094_s12 + $0x1b0] sm:$0xf]  ;;  %3669 = vmatpush.bf16.msra.mxu2 %v4249_v34 }
 0x47d   : > { %v3199_v11 = vsel %vm2856_vm1, %v3180_v48, %v3177_v25  ;;  %v4400_v18 = vld [vmem:[%s8094_s12 + $0x1ec] sm:$0xf0]  ;;  %v4253_v63 = vor.u32 %v4395_v31, %v4252_v44  ;;  %v4370_v25 = vld [vmem:[%s8094_s12 + $0x104] sm:$0xf] }
 0x47e   : > { %v2789_v12 = vpop.xlane.xlu0 %2788  ;;  %v4293_v22 = vor.u32 %v4400_v18, %v4292_v54 }
 0x47f   : > { %v3181_v43 = vperm.slane %v2789_v12, %v6234_v27  ;;  %v4188_v12 = vld [vmem:[%s8094_s12 + $0x108] sm:$0xf]  ;;  %3683 = vmatpush.bf16.msra.mxu3 %v4253_v63 }
 0x480   : > { %3311 = vxpose.xlu1.c.b16.start [1/4] (short) (narrow) %v3207_v57, 16  ;;  %3823 = vmatpush.bf16.msrb.mxu0 %v4293_v22 }
 0x481   : > { %v2501_v15 = vpop.xlane.xlu1 %2500  ;;  %v2503_v10 = vpop.xlane.xlu2 %2502 }
 0x482   : > { %v3133_v61 = vperm.slane %v2501_v15, %v6234_v27  ;;  %v3134_v56 = vperm.slane %v2503_v10, %v6237_v50  ;;  %v4189_v15 = vor.u32 %v4379_v16, %v4188_v12  ;;  %v4228_v10 = vld [vmem:[%s8094_s12 + $0x130] sm:$0xf] }
 0x483   : > { %v4260_v12 = vld [vmem:[%s8094_s12 + $0x190] sm:$0xf] }
 0x484   : > { %v3135_v4 = vsel %vm2833_vm0, %v3134_v56, %v3133_v61  ;;  %v4384_v61 = vld [vmem:[%s8094_s12 + $0x16c] sm:$0xf0]  ;;  %v4116_v56 = vld [vmem:[%s8094_s12 + $0x80] sm:$0xf]  ;;  %3684 = vmatpush.bf16.msra.mxu3 %v4189_v15  ;;  %v4254_v15 = vld [vmem:[%s8094_s12 + $0x1c8] sm:$0xf0] }
 0x485   : > { %v3152_v42 = vsel %vm2858_vm2, %v3135_v4, %v3151_v24 }
 0x486   : > { %v2507_v62 = vpop.xlane.xlu0 %2506 }
 0x487   : > { %v3137_v55 = vperm.slane %v2507_v62, %v6237_v50  ;;  %v4362_v62 = vld [vmem:[%s8094_s12 + $0xbc] sm:$0xf0] }
 0x489   : > { %v2791_v1 = vpop.xlane.xlu1 %2790  ;;  %v2505_v26 = vpop.xlane.xlu2 %2504 }
 0x48a   : > { %v3182_v47 = vperm.slane %v2791_v1, %v6237_v50  ;;  %v3136_v33 = vperm.slane %v2505_v26, %v6234_v27  ;;  %v4354_v1 = vld [vmem:[%s8094_s12 + $0x84] sm:$0xf] }
 0x48b   : > { %v4118_v26 = vld [vmem:[%s8094_s12 + $0xc0] sm:$0xf0] }
 0x48c   : > { %v3183_v5 = vsel %vm2833_vm0, %v3182_v47, %v3181_v43  ;;  %v3138_v45 = vsel %vm2833_vm0, %v3137_v55, %v3136_v33  ;;  %v4117_v43 = vor.u32 %v4362_v62, %v4116_v56  ;;  %v4124_v55 = vld [vmem:[%s8094_s12 + $0x88] sm:$0xf]  ;;  %v4164_v33 = vld [vmem:[%s8094_s12 + $0xb0] sm:$0xf] }
 0x48d   : > { %v3200_v23 = vsel %vm2858_vm2, %v3183_v5, %v3199_v11  ;;  %v3153_v30 = vsel %vm2860_vm3, %v3138_v45, %v3152_v42  ;;  %v4181_v11 = vor.u32 %v4378_v0, %v4180_v58  ;;  %v4229_v42 = vor.u32 %v4384_v61, %v4228_v10  ;;  %v4363_v47 = vld [vmem:[%s8094_s12 + $0xc4] sm:$0xf0]  ;;  %v4368_v45 = vld [vmem:[%s8094_s12 + $0xec] sm:$0xf0] }
 0x48e   : > { %v2509_v41 = vpop.xlane.xlu0 %2508  ;;  %v4121_v5 = vor.u32 %v4354_v1, %v4118_v26  ;;  %v4196_v56 = vld [vmem:[%s8094_s12 + $0x110] sm:$0xf]  ;;  %v4198_v1 = vld [vmem:[%s8094_s12 + $0x150] sm:$0xf0]  ;;  %v4371_v26 = vld [vmem:[%s8094_s12 + $0x10c] sm:$0xf] }
 0x48f   : > { %v3139_v2 = vperm.slane %v2509_v41, %v6234_v27  ;;  %3656 = vmatpush.bf16.msra.mxu1 %v4181_v11  ;;  %3824 = vmatpush.bf16.msrb.mxu0 %v4229_v42  ;;  %v4372_v42 = vld [vmem:[%s8094_s12 + $0x114] sm:$0xf] }
 0x490   : > { %3312 = vxpose.xlu1.c.b16.cont [2/4] (short) (narrow) %v3208_v53, 16 }
 0x491   : > { %v2793_v3 = vpop.xlane.xlu1 %2792  ;;  %v2795_v29 = vpop.xlane.xlu2 %2794 }
 0x492   : > { %v3184_v13 = vperm.slane %v2793_v3, %v6234_v27  ;;  %v3185_v19 = vperm.slane %v2795_v29, %v6237_v50  ;;  %v4125_v29 = vor.u32 %v4363_v47, %v4124_v55  ;;  %v4201_v55 = vor.u32 %v4372_v42, %v4198_v1  ;;  %v4390_v1 = vld [vmem:[%s8094_s12 + $0x1a4] sm:$0xf] }
 0x493   : > { %3657 = vmatpush.bf16.msra.mxu1 %v4117_v43  ;;  %v4190_v43 = vld [vmem:[%s8094_s12 + $0x148] sm:$0xf0] }
 0x494   : > { %v3186_v37 = vsel %vm2833_vm0, %v3185_v19, %v3184_v13  ;;  %v4165_v13 = vor.u32 %v4368_v45, %v4164_v33  ;;  %v4338_v19 = vld [vmem:[%s8094_s12 + $0x4] sm:$0xf]  ;;  %3685 = vmatpush.bf16.msra.mxu3 %v4125_v29  ;;  %v4193_v47 = vor.u32 %v4371_v26, %v4190_v43  ;;  %v4132_v33 = vld [vmem:[%s8094_s12 + $0x90] sm:$0xf]  ;;  %v4356_v45 = vld [vmem:[%s8094_s12 + $0x94] sm:$0xf] }
 0x495   : > { %v3201_v38 = vsel %vm2860_vm3, %v3186_v37, %v3200_v23  ;;  %v4052_v23 = vld [vmem:[%s8094_s12] sm:$0xf]  ;;  %v4054_v37 = vld [vmem:[%s8094_s12 + $0x40] sm:$0xf0] }
 0x496   : > { %v2799_v60 = vpop.xlane.xlu0 %2798  ;;  %3825 = vmatpush.bf16.msrb.mxu0 %v4165_v13  ;;  %v4278_v26 = vld [vmem:[%s8094_s12 + $0x1e0] sm:$0xf0] }
 0x497   : > { %v3188_v24 = vperm.slane %v2799_v60, %v6237_v50 }
 0x499   : > { %v2511_v28 = vpop.xlane.xlu1 %2510  ;;  %v2797_v17 = vpop.xlane.xlu2 %2796 }
 0x49a   : > { %v3140_v52 = vperm.slane %v2511_v28, %v6237_v50  ;;  %v3187_v40 = vperm.slane %v2797_v17, %v6234_v27 }
 0x49c   : > { %v3141_v53 = vsel %vm2833_vm0, %v3140_v52, %v3139_v2  ;;  %v3189_v59 = vsel %vm2833_vm0, %v3188_v24, %v3187_v40  ;;  %v4347_v24 = vld [vmem:[%s8094_s12 + $0x44] sm:$0xf0]  ;;  %v4100_v52 = vld [vmem:[%s8094_s12 + $0x30] sm:$0xf] }
 0x49d   : > { %v3154_v46 = vsel %vm2862_vm4, %v3141_v53, %v3153_v30  ;;  %v7100_v21 = vsel %vm2862_vm4, %v3189_v59, %v3201_v38  ;;  %v4346_v30 = vld [vmem:[%s8094_s12 + $0x3c] sm:$0xf0]  ;;  %v4060_v38 = vld [vmem:[%s8094_s12 + $0x8] sm:$0xf]  ;;  %v4352_v40 = vld [vmem:[%s8094_s12 + $0x6c] sm:$0xf0] }
 0x49e   : > { %v7102_v6 = vpop.xlane.xlu0 %2800  ;;  %v4053_v53 = vor.u32 %v4346_v30, %v4052_v23  ;;  %v4061_v51 = vor.u32 %v4347_v24, %v4060_v38  ;;  %v4134_v23 = vld [vmem:[%s8094_s12 + $0xd0] sm:$0xf0]  ;;  %v4355_v30 = vld [vmem:[%s8094_s12 + $0x8c] sm:$0xf] }
 0x49f   : > { %v3190_v60 = vperm.slane %v7102_v6, %v6234_v27  ;;  %v4057_v6 = vor.u32 %v4338_v19, %v4054_v37  ;;  %v4137_v29 = vor.u32 %v4356_v45, %v4134_v23  ;;  %v4068_v19 = vld [vmem:[%s8094_s12 + $0x10] sm:$0xf]  ;;  %v4340_v38 = vld [vmem:[%s8094_s12 + $0x14] sm:$0xf]  ;;  %v4375_v45 = vld [vmem:[%s8094_s12 + $0x12c] sm:$0xf] }
 0x4a0   : > { %3313 = vxpose.xlu1.c.b16.cont [3/4] (short) (narrow) %v3209_v14, 16  ;;  %v4185_v14 = vor.u32 %v4370_v25, %v4182_v7  ;;  %3658 = vmatpush.bf16.msra.mxu1 %v4053_v53  ;;  %v4348_v37 = vld [vmem:[%s8094_s12 + $0x4c] sm:$0xf0]  ;;  %v4270_v53 = vld [vmem:[%s8094_s12 + $0x1d8] sm:$0xf0] }
 0x4a1   : > { %v2513_v9 = vpop.xlane.xlu1 %2512  ;;  %v2515_v35 = vpop.xlane.xlu2 %2514  ;;  %3686 = vmatpush.bf16.msra.mxu3 %v4061_v51  ;;  %v4397_v51 = vld [vmem:[%s8094_s12 + $0x1d4] sm:$0xf0]  ;;  %v4222_v23 = vld [vmem:[%s8094_s12 + $0x168] sm:$0xf0] }
 0x4a2   : > { %v3142_v39 = vperm.slane %v2513_v9, %v6234_v27  ;;  %v3143_v20 = vperm.slane %v2515_v35, %v6237_v50  ;;  %3670 = vmatpush.bf16.msra.mxu2 %v4185_v14  ;;  %v4101_v35 = vor.u32 %v4352_v40, %v4100_v52  ;;  %v4387_v14 = vld [vmem:[%s8094_s12 + $0x18c] sm:$0xf]  ;;  %v4389_v40 = vld [vmem:[%s8094_s12 + $0x19c] sm:$0xf] }
 0x4a3   : > { %v4257_v61 = vor.u32 %v4387_v14, %v4254_v15  ;;  %v4349_v14 = vld [vmem:[%s8094_s12 + $0x54] sm:$0xf0] }
 0x4a4   : > { %v3144_v48 = vsel %vm2833_vm0, %v3143_v20, %v3142_v39  ;;  %3826 = vmatpush.bf16.msrb.mxu0 %v4101_v35  ;;  %v4373_v35 = vld [vmem:[%s8094_s12 + $0x11c] sm:$0xf] }
 0x4a5   : > { %v3155_v57 = vsel %vm2864_vm5, %v3144_v48, %v3154_v46  ;;  %3697 = vmatpush.bf16.msrb.mxu1 %v4257_v61  ;;  %v4284_v61 = vld [vmem:[%s8094_s12 + $0x1a8] sm:$0xf] }
 0x4a6   : > { %v2519_v4 = vpop.xlane.xlu0 %2518  ;;  %3671 = vmatpush.bf16.msra.mxu2 %v4121_v5  ;;  %v4364_v5 = vld [vmem:[%s8094_s12 + $0xcc] sm:$0xf0] }
 0x4a7   : > { %v3146_v28 = vperm.slane %v2519_v4, %v6237_v50  ;;  %v4380_v4 = vld [vmem:[%s8094_s12 + $0x14c] sm:$0xf0] }
 0x4a8   : > { %v4197_v62 = vor.u32 %v4380_v4, %v4196_v56  ;;  %v4399_v56 = vld [vmem:[%s8094_s12 + $0x1e4] sm:$0xf0]  ;;  %v4391_v4 = vld [vmem:[%s8094_s12 + $0x1ac] sm:$0xf] }
 0x4a9   : > { %v2803_v41 = vpop.xlane.xlu1 %2802  ;;  %v2517_v3 = vpop.xlane.xlu2 %2516  ;;  %3698 = vmatpush.bf16.msrb.mxu1 %v4193_v47  ;;  %v4285_v43 = vor.u32 %v4399_v56, %v4284_v61  ;;  %v4281_v47 = vor.u32 %v4390_v1, %v4278_v26  ;;  %v4108_v56 = vld [vmem:[%s8094_s12 + $0x38] sm:$0xf]  ;;  %v4344_v1 = vld [vmem:[%s8094_s12 + $0x34] sm:$0xf] }
 0x4aa   : > { %v3191_v17 = vperm.slane %v2803_v41, %v6237_v50  ;;  %v3145_v2 = vperm.slane %v2517_v3, %v6234_v27  ;;  %3672 = vmatpush.bf16.msra.mxu2 %v4057_v6  ;;  %v4126_v41 = vld [vmem:[%s8094_s12 + $0xc8] sm:$0xf0]  ;;  %v4133_v3 = vor.u32 %v4364_v5, %v4132_v33  ;;  %v4268_v6 = vld [vmem:[%s8094_s12 + $0x198] sm:$0xf]  ;;  %v4220_v33 = vld [vmem:[%s8094_s12 + $0x128] sm:$0xf] }
 0x4ab   : > { %v4129_v13 = vor.u32 %v4355_v30, %v4126_v41  ;;  %v4383_v5 = vld [vmem:[%s8094_s12 + $0x164] sm:$0xf0]  ;;  %v4374_v30 = vld [vmem:[%s8094_s12 + $0x124] sm:$0xf]  ;;  %v4102_v26 = vld [vmem:[%s8094_s12 + $0x70] sm:$0xf0] }
 0x4ac   : > { %v3192_v59 = vsel %vm2833_vm0, %v3191_v17, %v3190_v60  ;;  %v3147_v46 = vsel %vm2833_vm0, %v3146_v28, %v3145_v2  ;;  %v4070_v60 = vld [vmem:[%s8094_s12 + $0x50] sm:$0xf0]  ;;  %v4339_v28 = vld [vmem:[%s8094_s12 + $0xc] sm:$0xf]  ;;  %v4069_v2 = vor.u32 %v4348_v37, %v4068_v19  ;;  %v4214_v41 = vld [vmem:[%s8094_s12 + $0x160] sm:$0xf0] }
 0x4ad   : > { %v3203_v49 = vsel %vm2864_vm5, %v3192_v59, %v7100_v21  ;;  %v3156_v9 = vsel %vm2866_vm6, %v3147_v46, %v3155_v57  ;;  %v4262_v57 = vld [vmem:[%s8094_s12 + $0x1d0] sm:$0xf0]  ;;  %v4062_v17 = vld [vmem:[%s8094_s12 + $0x48] sm:$0xf0]  ;;  %3699 = vmatpush.bf16.msrb.mxu1 %v4129_v13  ;;  %v4073_v24 = vor.u32 %v4340_v38, %v4070_v60  ;;  %v4276_v59 = vld [vmem:[%s8094_s12 + $0x1a0] sm:$0xf]  ;;  %v4217_v13 = vor.u32 %v4374_v30, %v4214_v41 }
 0x4ae   : > { %v2521_v8 = vpop.xlane.xlu0 %2520  ;;  %v4065_v52 = vor.u32 %v4339_v28, %v4062_v17  ;;  %v4398_v46 = vld [vmem:[%s8094_s12 + $0x1dc] sm:$0xf0]  ;;  %v4156_v19 = vld [vmem:[%s8094_s12 + $0xa8] sm:$0xf]  ;;  %v4359_v38 = vld [vmem:[%s8094_s12 + $0xac] sm:$0xf] }
 0x4af   : > { %v3148_v18 = vperm.slane %v2521_v8, %v6234_v27  ;;  %v4367_v37 = vld [vmem:[%s8094_s12 + $0xe4] sm:$0xf0]  ;;  %v4158_v60 = vld [vmem:[%s8094_s12 + $0xe8] sm:$0xf0]  ;;  %v4358_v28 = vld [vmem:[%s8094_s12 + $0xa4] sm:$0xf] }
 0x4b0   : > { %v4150_v17 = vld [vmem:[%s8094_s12 + $0xe0] sm:$0xf0] }
 0x4b1   : > { %v2805_v36 = vpop.xlane.xlu1 %2804  ;;  %v2807_v32 = vpop.xlane.xlu2 %2806  ;;  %3700 = vmatpush.bf16.msrb.mxu1 %v4065_v52  ;;  %v4153_v52 = vor.u32 %v4358_v28, %v4150_v17 }
 0x4b2   : > { %v3193_v44 = vperm.slane %v2805_v36, %v6234_v27  ;;  %v3194_v39 = vperm.slane %v2807_v32, %v6237_v50  ;;  %v4269_v36 = vor.u32 %v4397_v51, %v4268_v6  ;;  %v4206_v32 = vld [vmem:[%s8094_s12 + $0x158] sm:$0xf0]  ;;  %v4342_v6 = vld [vmem:[%s8094_s12 + $0x24] sm:$0xf] }
 0x4b3   : > { %v4086_v51 = vld [vmem:[%s8094_s12 + $0x60] sm:$0xf0] }
 0x4b4   : > { %v3195_v20 = vsel %vm2833_vm0, %v3194_v39, %v3193_v44  ;;  %v4212_v44 = vld [vmem:[%s8094_s12 + $0x120] sm:$0xf] }
 0x4b5   : > { %v3204_v21 = vsel %vm2866_vm6, %v3195_v20, %v3203_v49  ;;  %v4273_v49 = vor.u32 %v4389_v40, %v4270_v53  ;;  %v4382_v39 = vld [vmem:[%s8094_s12 + $0x15c] sm:$0xf0]  ;;  %v4204_v20 = vld [vmem:[%s8094_s12 + $0x118] sm:$0xf]  ;;  %v4092_v40 = vld [vmem:[%s8094_s12 + $0x28] sm:$0xf] }
 0x4b6   : > { %v2811_v34 = vpop.xlane.xlu0 %2810  ;;  %v4351_v53 = vld [vmem:[%s8094_s12 + $0x64] sm:$0xf0] }
 0x4b7   : > { %v3197_v63 = vperm.slane %v2811_v34, %v6237_v50  ;;  %v4209_v34 = vor.u32 %v4373_v35, %v4206_v32  ;;  %v4089_v35 = vor.u32 %v4342_v6, %v4086_v51  ;;  %v4401_v32 = vld [vmem:[%s8094_s12 + $0x1f4] sm:$0xf0] }
 0x4b9   : > { %v2523_v31 = vpop.xlane.xlu1 %2522  ;;  %v2809_v54 = vpop.xlane.xlu2 %2808 }
 0x4ba   : > { %v3149_v22 = vperm.slane %v2523_v31, %v6237_v50  ;;  %v3196_v58 = vperm.slane %v2809_v54, %v6234_v27  ;;  %v4396_v50 = vld [vmem:[%s8094_s12 + $0x1cc] sm:$0xf0]  ;;  %v4388_v27 = vld [vmem:[%s8094_s12 + $0x194] sm:$0xf]  ;;  %v4213_v31 = vor.u32 %v4382_v39, %v4212_v44  ;;  %v4357_v54 = vld [vmem:[%s8094_s12 + $0x9c] sm:$0xf] }
 0x4bb   : > { %v4261_v16 = vor.u32 %v4396_v50, %v4260_v12  ;;  %v4265_v10 = vor.u32 %v4388_v27, %v4262_v57  ;;  %v4078_v50 = vld [vmem:[%s8094_s12 + $0x58] sm:$0xf0]  ;;  %v4084_v27 = vld [vmem:[%s8094_s12 + $0x20] sm:$0xf]  ;;  %v4076_v57 = vld [vmem:[%s8094_s12 + $0x18] sm:$0xf] }
 0x4bc   : > { %v3150_v0 = vsel %vm2833_vm0, %v3149_v22, %v3148_v18  ;;  %v3198_v25 = vsel %vm2833_vm0, %v3197_v63, %v3196_v58  ;;  %v4142_v63 = vld [vmem:[%s8094_s12 + $0xd8] sm:$0xf0]  ;;  %v4148_v22 = vld [vmem:[%s8094_s12 + $0xa0] sm:$0xf]  ;;  %v4077_v42 = vor.u32 %v4349_v14, %v4076_v57  ;;  %v4360_v57 = vld [vmem:[%s8094_s12 + $0xb4] sm:$0xf] }
 0x4bd   : > { %v3157_v48 = vsel %vm2868_vm7, %v3150_v0, %v3156_v9  ;;  %v3205_v11 = vsel %vm2868_vm7, %v3198_v25, %v3204_v21  ;;  %3711 = vmatpush.bf16.msrb.mxu2 %v4261_v16  ;;  %3725 = vmatpush.bf16.msrb.mxu3 %v4265_v10  ;;  %v4277_v9 = vor.u32 %v4398_v46, %v4276_v59  ;;  %v4381_v21 = vld [vmem:[%s8094_s12 + $0x154] sm:$0xf0]  ;;  %v4366_v58 = vld [vmem:[%s8094_s12 + $0xdc] sm:$0xf0]  ;;  %v4343_v59 = vld [vmem:[%s8094_s12 + $0x2c] sm:$0xf] }
 0x4be   : > { %v3210_v7 = vpack.c.bf16 %v3205_v11, %v3157_v48  ;;  %v4205_v18 = vor.u32 %v4381_v21, %v4204_v20  ;;  %v4140_v0 = vld [vmem:[%s8094_s12 + $0x98] sm:$0xf]  ;;  %v4145_v48 = vor.u32 %v4357_v54, %v4142_v63  ;;  %v4149_v11 = vor.u32 %v4366_v58, %v4148_v22  ;;  %v4350_v16 = vld [vmem:[%s8094_s12 + $0x5c] sm:$0xf0]  ;;  %v4094_v46 = vld [vmem:[%s8094_s12 + $0x68] sm:$0xf0] }
 0x4bf   : > { %v4365_v25 = vld [vmem:[%s8094_s12 + $0xd4] sm:$0xf0]  ;;  %v4085_v10 = vor.u32 %v4350_v16, %v4084_v27  ;;  %v4393_v44 = vld [vmem:[%s8094_s12 + $0x1bc] sm:$0xf]  ;;  %v4392_v20 = vld [vmem:[%s8094_s12 + $0x1b4] sm:$0xf] }
 0x4c0   : > { %3314 = vxpose.xlu1.c.b16.end [4/4] (short) (narrow) %v3210_v7, 16  ;;  %v4341_v7 = vld [vmem:[%s8094_s12 + $0x1c] sm:$0xf]  ;;  %v4141_v12 = vor.u32 %v4365_v25, %v4140_v0  ;;  %v4294_v21 = vld [vmem:[%s8094_s12 + $0x1f0] sm:$0xf0] }
 0x4c1   : > { %3712 = vmatpush.bf16.msrb.mxu2 %v4197_v62  ;;  %3726 = vmatpush.bf16.msrb.mxu3 %v4201_v55  ;;  %v4081_v15 = vor.u32 %v4341_v7, %v4078_v50  ;;  %v4286_v62 = vld [vmem:[%s8094_s12 + $0x1e8] sm:$0xf0]  ;;  %v4302_v39 = vld [vmem:[%s8094_s12 + $0x1f8] sm:$0xf0]  ;;  %v4297_v54 = vor.u32 %v4392_v20, %v4294_v21  ;;  %v4385_v63 = vld [vmem:[%s8094_s12 + $0x174] sm:$0xf0] }
 0x4c2   : > { %v4289_v55 = vor.u32 %v4391_v4, %v4286_v62  ;;  %v4377_v22 = vld [vmem:[%s8094_s12 + $0x13c] sm:$0xf]  ;;  %v4376_v0 = vld [vmem:[%s8094_s12 + $0x134] sm:$0xf]  ;;  %v4369_v50 = vld [vmem:[%s8094_s12 + $0xf4] sm:$0xf0] }
 0x4c3   : > { %v4238_v58 = vld [vmem:[%s8094_s12 + $0x178] sm:$0xf0]  ;;  %v4230_v25 = vld [vmem:[%s8094_s12 + $0x170] sm:$0xf0]  ;;  %v4353_v4 = vld [vmem:[%s8094_s12 + $0x74] sm:$0xf0] }
 0x4c4   : > { %v4233_v7 = vor.u32 %v4376_v0, %v4230_v25  ;;  %v4361_v27 = vld [vmem:[%s8094_s12 + $0xbc] sm:$0xf]  ;;  %v4166_v14 = vld [vmem:[%s8094_s12 + $0xf0] sm:$0xf0] }
 0x4c5   : > { %3713 = vmatpush.bf16.msrb.mxu2 %v4133_v3  ;;  %3727 = vmatpush.bf16.msrb.mxu3 %v4137_v29  ;;  %v4221_v3 = vor.u32 %v4383_v5, %v4220_v33  ;;  %v4225_v29 = vor.u32 %v4375_v45, %v4222_v23  ;;  %v4174_v16 = vld [vmem:[%s8094_s12 + $0xf8] sm:$0xf0]  ;;  %v4169_v61 = vor.u32 %v4360_v57, %v4166_v14  ;;  %v7552_v33 = vld [vmem:[%s8096_s13] sm:$0xff]  ;;  %v7557_v5 = vld [vmem:[%s8096_s13 + $0x8] sm:$0xff] }
 0x4c6   : > { %v4110_v62 = vld [vmem:[%s8094_s12 + $0x78] sm:$0xf0]  ;;  %v3279_v45 = vperm.slane %v7552_v33, 0  ;;  %v3291_v23 = vperm.slane %v7557_v5, 4  ;;  %v3285_v21 = vperm.slane %v7552_v33, 6  ;;  %v3287_v0 = vperm.slane %v7557_v5, 0 }
 0x4c9   : > { %3714 = vmatpush.bf16.msrb.mxu2 %v4069_v2  ;;  %3728 = vmatpush.bf16.msrb.mxu3 %v4073_v24  ;;  %v4157_v2 = vor.u32 %v4367_v37, %v4156_v19  ;;  %v4161_v24 = vor.u32 %v4359_v38, %v4158_v60 }
 0x53c   : > { %v7319_v8 = vpop.trf.xlu1 }
 0x53d   : > { %4306 = vmatmul.msk.bf16.vlgmr.msra.gmra.mxu1 %vm3647_vm8, %v7319_v8  ;;  %4307 = vmatmul.msk.bf16.vlgmr.msra.gmra.mxu2 %vm3647_vm8, %v7319_v8 }
 0x53e   : > { %4308 = vmatmul.msk.bf16.vlgmr.msra.gmra.mxu3 %vm3647_vm8, %v7319_v8  ;;  %4318 = vmatmul.msk.bf16.vlgmr.msrb.gmra.mxu0 %vm3647_vm8, %v7319_v8 }
 0x53f   : > { %3753 = vmatpush.bf16.msra.mxu2 %v4273_v49  ;;  %3767 = vmatpush.bf16.msra.mxu3 %v4277_v9  ;;  %v4093_v49 = vor.u32 %v4351_v53, %v4092_v40  ;;  %v4097_v9 = vor.u32 %v4343_v59, %v4094_v46 }
 0x540   : > { %3739 = vmatpush.bf16.msra.mxu1 %v4269_v36  ;;  %v4300_v36 = vld [vmem:[%s8094_s12 + $0x1b8] sm:$0xf] }
 0x543   : > { %3754 = vmatpush.bf16.msra.mxu2 %v4209_v34  ;;  %3768 = vmatpush.bf16.msra.mxu3 %v4213_v31  ;;  %v4301_v34 = vor.u32 %v4401_v32, %v4300_v36  ;;  %v4305_v31 = vor.u32 %v4393_v44, %v4302_v39 }
 0x544   : > { %3740 = vmatpush.bf16.msra.mxu1 %v4205_v18  ;;  %v4236_v18 = vld [vmem:[%s8094_s12 + $0x138] sm:$0xf] }
 0x547   : > { %3755 = vmatpush.bf16.msra.mxu2 %v4145_v48  ;;  %3769 = vmatpush.bf16.msra.mxu3 %v4149_v11  ;;  %v4237_v48 = vor.u32 %v4385_v63, %v4236_v18  ;;  %v4241_v11 = vor.u32 %v4377_v22, %v4238_v58  ;;  %v3286_v58 = vperm.slane %v7552_v33, 7 }
 0x548   : > { %3741 = vmatpush.bf16.msra.mxu1 %v4141_v12  ;;  %v4172_v12 = vld [vmem:[%s8094_s12 + $0xb8] sm:$0xf] }
 0x54b   : > { %3756 = vmatpush.bf16.msra.mxu2 %v4081_v15  ;;  %3770 = vmatpush.bf16.msra.mxu3 %v4085_v10  ;;  %v4173_v15 = vor.u32 %v4369_v50, %v4172_v12  ;;  %v4177_v10 = vor.u32 %v4361_v27, %v4174_v16  ;;  %v3288_v27 = vperm.slane %v7557_v5, 1 }
 0x54c   : > { %3742 = vmatpush.bf16.msra.mxu1 %v4077_v42  ;;  %v4345_v42 = vld [vmem:[%s8094_s12 + $0x3c] sm:$0xf] }
 0x54d   : > { %4309 = vmatmul.msk.bf16.vlgmr.msrb.gmra.mxu1 %vm3647_vm8, %v7319_v8  ;;  %4310 = vmatmul.msk.bf16.vlgmr.msrb.gmra.mxu2 %vm3647_vm8, %v7319_v8 }
 0x54e   : > { %4311 = vmatmul.msk.bf16.vlgmr.msrb.gmra.mxu3 %vm3647_vm8, %v7319_v8 }
 0x54f   : > { %3795 = vmatpush.bf16.msrb.mxu2 %v4285_v43  ;;  %3809 = vmatpush.bf16.msrb.mxu3 %v4289_v55  ;;  %v4109_v43 = vor.u32 %v4353_v4, %v4108_v56  ;;  %v4113_v55 = vor.u32 %v4345_v42, %v4110_v62  ;;  %v3289_v56 = vperm.slane %v7557_v5, 2  ;;  %v3290_v4 = vperm.slane %v7557_v5, 3 }
 0x550   : > { %3781 = vmatpush.bf16.msrb.mxu1 %v4281_v47  ;;  %v4105_v47 = vor.u32 %v4344_v1, %v4102_v26 }
 0x553   : > { %3796 = vmatpush.bf16.msrb.mxu2 %v4221_v3  ;;  %3810 = vmatpush.bf16.msrb.mxu3 %v4225_v29  ;;  %v3280_v29 = vperm.slane %v7552_v33, 1 }
 0x554   : > { %3782 = vmatpush.bf16.msrb.mxu1 %v4217_v13  ;;  %v3281_v13 = vperm.slane %v7552_v33, 2 }
 0x557   : > { %3797 = vmatpush.bf16.msrb.mxu2 %v4157_v2  ;;  %3811 = vmatpush.bf16.msrb.mxu3 %v4161_v24 }
 0x558   : > { %3783 = vmatpush.bf16.msrb.mxu1 %v4153_v52  ;;  %v3282_v52 = vperm.slane %v7552_v33, 3 }
 0x55b   : > { %3798 = vmatpush.bf16.msrb.mxu2 %v4093_v49  ;;  %3812 = vmatpush.bf16.msrb.mxu3 %v4097_v9  ;;  %v3283_v49 = vperm.slane %v7552_v33, 4  ;;  %v3284_v9 = vperm.slane %v7552_v33, 5 }
 0x55c   : > { %3784 = vmatpush.bf16.msrb.mxu1 %v4089_v35 }
 0x55d   : > { %4312 = vmatmul.msk.bf16.vlgmr.msra.gmra.mxu1 %vm3647_vm8, %v7319_v8  ;;  %4313 = vmatmul.msk.bf16.vlgmr.msra.gmra.mxu2 %vm3647_vm8, %v7319_v8 }
 0x55e   : > { %4314 = vmatmul.msk.bf16.vlgmr.msra.gmra.mxu3 %vm3647_vm8, %v7319_v8 }
 0x55f   : > { %3851 = vmatpush.bf16.msra.mxu2 %v4301_v34  ;;  %3865 = vmatpush.bf16.msra.mxu3 %v4305_v31 }
 0x560   : > { %3837 = vmatpush.bf16.msra.mxu1 %v4297_v54 }
 0x563   : > { %3852 = vmatpush.bf16.msra.mxu2 %v4237_v48  ;;  %3866 = vmatpush.bf16.msra.mxu3 %v4241_v11 }
 0x564   : > { %3838 = vmatpush.bf16.msra.mxu1 %v4233_v7 }
 0x567   : > { %3853 = vmatpush.bf16.msra.mxu2 %v4173_v15  ;;  %3867 = vmatpush.bf16.msra.mxu3 %v4177_v10 }
 0x568   : > { %3839 = vmatpush.bf16.msra.mxu1 %v4169_v61 }
 0x56b   : > { %3854 = vmatpush.bf16.msra.mxu2 %v4109_v43  ;;  %3868 = vmatpush.bf16.msra.mxu3 %v4113_v55 }
 0x56c   : > { %3840 = vmatpush.bf16.msra.mxu1 %v4105_v47  ;;  %v3292_v47 = vperm.slane %v7557_v5, 5 }
 0x56d   : > { %4315 = vmatmul.msk.bf16.vlgmr.msrb.gmra.mxu1 %vm3647_vm8, %v7319_v8  ;;  %4316 = vmatmul.msk.bf16.vlgmr.msrb.gmra.mxu2 %vm3647_vm8, %v7319_v8 }
 0x56e   : > { %4317 = vmatmul.msk.bf16.vlgmr.msrb.gmra.mxu3 %vm3647_vm8, %v7319_v8 }
 0x57d   : > { %4319 = vmatmul.msk.bf16.vlgmr.msra.gmra.mxu1 %vm3647_vm8, %v7319_v8  ;;  %4320 = vmatmul.msk.bf16.vlgmr.msra.gmra.mxu2 %vm3647_vm8, %v7319_v8 }
 0x57e   : > { %4321 = vmatmul.msk.bf16.vlgmr.msra.gmra.mxu3 %vm3647_vm8, %v7319_v8 }
 0x5ba   : > { %v3660_v30 = vpop.f32.mrf.mxu1 }
 0x5bb   : > { %v3661_v41 = vadd.f32 %v3660_v30, %v3279_v45  ;;  %v3828_v8 = vpop.f32.mrf.mxu0 }
 0x5bc   : > { %v3829_v3 = vadd.f32 %v3828_v8, %v3291_v23 }
 0x5bd   : > { %3875 = vst [vmem:[%s7563_s23] sm:$0xff] %v3661_v41 }
 0x5be   : > { %3887 = vst [vmem:[%s7563_s23 + $0x60] sm:$0xff] %v3829_v3  ;;  %v3293_v3 = vperm.slane %v7557_v5, 6 }
 0x5c0   : > { %v3674_v19 = vpop.f32.mrf.mxu2 }
 0x5c1   : > { %v3675_v37 = vadd.f32 %v3674_v19, %v3280_v29  ;;  %v3688_v38 = vpop.f32.mrf.mxu3 }
 0x5c2   : > { %v3689_v60 = vadd.f32 %v3688_v38, %v3281_v13  ;;  %v3662_v28 = vpop.f32.mrf.mxu1 }
 0x5c3   : > { %3876 = vst [vmem:[%s7563_s23 + $0x8] sm:$0xff] %v3675_v37  ;;  %v3663_v17 = vadd.f32 %v3662_v28, %v3279_v45  ;;  %v3830_v2 = vpop.f32.mrf.mxu0 }
 0x5c4   : > { %3877 = vst [vmem:[%s7563_s23 + $0x10] sm:$0xff] %v3689_v60  ;;  %v3831_v24 = vadd.f32 %v3830_v2, %v3291_v23 }
 0x5c5   : > { %3892 = vst [vmem:[%s7563_s23 + $0x80] sm:$0xff] %v3663_v17 }
 0x5c6   : > { %3904 = vst [vmem:[%s7563_s23 + $0xe0] sm:$0xff] %v3831_v24 }
 0x5c8   : > { %v3676_v40 = vpop.f32.mrf.mxu2 }
 0x5c9   : > { %v3677_v53 = vadd.f32 %v3676_v40, %v3280_v29  ;;  %v3690_v59 = vpop.f32.mrf.mxu3  ;;  %v3294_v29 = vperm.slane %v7557_v5, 7 }
 0x5ca   : > { %v3691_v46 = vadd.f32 %v3690_v59, %v3281_v13  ;;  %v3702_v6 = vpop.f32.mrf.mxu1 }
 0x5cb   : > { %3893 = vst [vmem:[%s7563_s23 + $0x88] sm:$0xff] %v3677_v53  ;;  %v3703_v51 = vadd.f32 %v3702_v6, %v3282_v52 }
 0x5cc   : > { %3894 = vst [vmem:[%s7563_s23 + $0x90] sm:$0xff] %v3691_v46 }
 0x5cd   : > { %3878 = vst [vmem:[%s7563_s23 + $0x18] sm:$0xff] %v3703_v51 }
 0x5d0   : > { %v3716_v35 = vpop.f32.mrf.mxu2 }
 0x5d1   : > { %v3717_v36 = vadd.f32 %v3716_v35, %v3283_v49  ;;  %v3730_v32 = vpop.f32.mrf.mxu3 }
 0x5d2   : > { %v3731_v44 = vadd.f32 %v3730_v32, %v3284_v9  ;;  %v3704_v39 = vpop.f32.mrf.mxu1 }
 0x5d3   : > { %3879 = vst [vmem:[%s7563_s23 + $0x20] sm:$0xff] %v3717_v36  ;;  %v3705_v20 = vadd.f32 %v3704_v39, %v3282_v52 }
 0x5d4   : > { %3880 = vst [vmem:[%s7563_s23 + $0x28] sm:$0xff] %v3731_v44 }
 0x5d5   : > { %3895 = vst [vmem:[%s7563_s23 + $0x98] sm:$0xff] %v3705_v20 }
 0x5d8   : > { %v3718_v34 = vpop.f32.mrf.mxu2 }
 0x5d9   : > { %v3719_v31 = vadd.f32 %v3718_v34, %v3283_v49  ;;  %v3732_v54 = vpop.f32.mrf.mxu3 }
 0x5da   : > { %v3733_v18 = vadd.f32 %v3732_v54, %v3284_v9  ;;  %v3744_v63 = vpop.f32.mrf.mxu1 }
 0x5db   : > { %3896 = vst [vmem:[%s7563_s23 + $0xa0] sm:$0xff] %v3719_v31  ;;  %v3745_v22 = vadd.f32 %v3744_v63, %v3285_v21 }
 0x5dc   : > { %3897 = vst [vmem:[%s7563_s23 + $0xa8] sm:$0xff] %v3733_v18 }
 0x5dd   : > { %3881 = vst [vmem:[%s7563_s23 + $0x30] sm:$0xff] %v3745_v22 }
 0x5e0   : > { %v3758_v25 = vpop.f32.mrf.mxu2 }
 0x5e1   : > { %v3759_v48 = vadd.f32 %v3758_v25, %v3286_v58  ;;  %v3772_v11 = vpop.f32.mrf.mxu3 }
 0x5e2   : > { %v3773_v7 = vadd.f32 %v3772_v11, %v3287_v0  ;;  %v3746_v12 = vpop.f32.mrf.mxu1 }
 0x5e3   : > { %3882 = vst [vmem:[%s7563_s23 + $0x38] sm:$0xff] %v3759_v48  ;;  %v3747_v50 = vadd.f32 %v3746_v12, %v3285_v21 }
 0x5e4   : > { %3883 = vst [vmem:[%s7563_s23 + $0x40] sm:$0xff] %v3773_v7 }
 0x5e5   : > { %3898 = vst [vmem:[%s7563_s23 + $0xb0] sm:$0xff] %v3747_v50 }
 0x5e8   : > { %v3760_v16 = vpop.f32.mrf.mxu2 }
 0x5e9   : > { %v3761_v57 = vadd.f32 %v3760_v16, %v3286_v58  ;;  %v3774_v14 = vpop.f32.mrf.mxu3 }
 0x5ea   : > { %v3775_v15 = vadd.f32 %v3774_v14, %v3287_v0  ;;  %v3786_v10 = vpop.f32.mrf.mxu1 }
 0x5eb   : > { %3899 = vst [vmem:[%s7563_s23 + $0xb8] sm:$0xff] %v3761_v57  ;;  %v3787_v61 = vadd.f32 %v3786_v10, %v3288_v27 }
 0x5ec   : > { %3900 = vst [vmem:[%s7563_s23 + $0xc0] sm:$0xff] %v3775_v15 }
 0x5ed   : > { %3884 = vst [vmem:[%s7563_s23 + $0x48] sm:$0xff] %v3787_v61 }
 0x5f0   : > { %v3800_v42 = vpop.f32.mrf.mxu2 }
 0x5f1   : > { %v3801_v62 = vadd.f32 %v3800_v42, %v3289_v56  ;;  %v3814_v1 = vpop.f32.mrf.mxu3 }
 0x5f2   : > { %v3815_v26 = vadd.f32 %v3814_v1, %v3290_v4  ;;  %v3788_v43 = vpop.f32.mrf.mxu1 }
 0x5f3   : > { %3885 = vst [vmem:[%s7563_s23 + $0x50] sm:$0xff] %v3801_v62  ;;  %v3789_v55 = vadd.f32 %v3788_v43, %v3288_v27 }
 0x5f4   : > { %3886 = vst [vmem:[%s7563_s23 + $0x58] sm:$0xff] %v3815_v26 }
 0x5f5   : > { %3901 = vst [vmem:[%s7563_s23 + $0xc8] sm:$0xff] %v3789_v55 }
 0x5f8   : > { %v3802_v33 = vpop.f32.mrf.mxu2 }
 0x5f9   : > { %v3803_v45 = vadd.f32 %v3802_v33, %v3289_v56  ;;  %v3816_v23 = vpop.f32.mrf.mxu3 }
 0x5fa   : > { %v3817_v30 = vadd.f32 %v3816_v23, %v3290_v4  ;;  %v3842_v41 = vpop.f32.mrf.mxu1 }
 0x5fb   : > { %3902 = vst [vmem:[%s7563_s23 + $0xd0] sm:$0xff] %v3803_v45  ;;  %v3843_v8 = vadd.f32 %v3842_v41, %v3292_v47 }
 0x5fc   : > { %3903 = vst [vmem:[%s7563_s23 + $0xd8] sm:$0xff] %v3817_v30 }
 0x5fd   : > { %3888 = vst [vmem:[%s7563_s23 + $0x68] sm:$0xff] %v3843_v8 }
 0x600   : > { %v3856_v13 = vpop.f32.mrf.mxu2 }
 0x601   : > { %v3857_v19 = vadd.f32 %v3856_v13, %v3293_v3  ;;  %v3870_v37 = vpop.f32.mrf.mxu3 }
 0x602   : > { %v3871_v38 = vadd.f32 %v3870_v37, %v3294_v29  ;;  %v3844_v60 = vpop.f32.mrf.mxu1 }
 0x603   : > { %3889 = vst [vmem:[%s7563_s23 + $0x70] sm:$0xff] %v3857_v19  ;;  %v3845_v28 = vadd.f32 %v3844_v60, %v3292_v47 }
 0x604   : > { %3891 = vst.msk [vmem:[%s7563_s23 + $0x78] sm:$0xff] %vm3890_vm9, %v3871_v38 }
 0x605   : > { %3905 = vst [vmem:[%s7563_s23 + $0xe8] sm:$0xff] %v3845_v28 }
 0x608   : > { %v3858_v5 = vpop.f32.mrf.mxu2 }
 0x609   : > { %v3859_v17 = vadd.f32 %v3858_v5, %v3293_v3  ;;  %v3872_v2 = vpop.f32.mrf.mxu3 }
 0x60a   : > { %v3873_v24 = vadd.f32 %v3872_v2, %v3294_v29 }
 0x60b   : > { %3906 = vst [vmem:[%s7563_s23 + $0xf0] sm:$0xff] %v3859_v17 }
 0x60c   : > { %3907 = vst.msk [vmem:[%s7563_s23 + $0xf8] sm:$0xff] %vm3890_vm9, %v3873_v24 }
 0x60d   : > { %4967 = shalt.err (!%p4964_p8)
}
 0x60e   : > { %s5012_s2 = smov 2048   ;;  %s5013_s17 = smov 128  }
 0x60f   : > { %4792 = dma.vmem_to_hbm [thread:$0]  (%p5087_p5), %s3922_s15, 4096, %s3924_s22, %s3909_s28, %s5012_s2, %s5012_s2, %s5013_s17  }
 0x610 PF: > { %s8100_s21 = sld [smem:[#allocation11_spill]] }
 0x611   : > { %s8101_s19 = sld [smem:[#allocation8_spill]] }
 0x616   : > { %p4804_p9 = scmp.ge.s32.totalorder %s8100_s21, 2 }
 0x617   : > { %s3938_s7 = sand.u32 1, %s8101_s19  }
 0x618   : > { %p4799_p10 = pnand %p4804_p9, %p5091_p6  ;;  %s3939_s29 = scalar_lea.sflag [#allocation4], %s3938_s7 }
 0x61a   : > { %p4800_p11 = pneg %p4799_p10 }
 0x61c   : > { %4989 = dma.done.wait (%p4800_p11), %s3939_s29, 4096  }
 0x61d   : > { %4991 = vsyncadd (%p4800_p11), %s3939_s29, 4294963200  ;;  %s8103_s24 = sld [smem:[#allocation13_spill]] }
 0x61e   : > { %s8104_s21 = sld [smem:[#allocation9_spill]] }
 0x61f   : > { %s8105_s22 = sld [smem:[#allocation10_spill]] }
 0x620   : > { %s8106_s23 = sld [smem:[#allocation14_spill]] }
 0x623   : > { %p17_p12 = scmp.ge.s32.totalorder %s8103_s24, 4  }
 0x625   :  { %19 = sbr.rel (!%p17_p12) target bundleno = 12 (0xc), region = 84 }
 0x62a   :  { %3945 = vsyncpa [#allocation3], 1 }
 0x62b   :  { %3947 = vsyncpa [#allocation3 + $0x1], 1 }
 0x62c   :  { %3948 = vsyncpa [#allocation4], 1 }
 0x62d   :  { %3950 = vsyncpa [#allocation4 + $0x1], 1 }

</bundles_post_ra>
